<compile_context>
chip_gen: v7x
topology: tpu7x:2x2x1
jax: 0.10.0
libtpu: 0.0.40
codegen_flags: <defaults>
</compile_context>

<pallas_src>
import functools

import jax
import jax.numpy as jnp
from jax import lax
from jax.experimental import pallas as pl
from jax.experimental.pallas import tpu as pltpu


def _rup(x, m):
    return (x + m - 1) // m * m


def _vmem_budget():
    """Per-generation VMEM budget (~3/4 of physical, capped at 96 MiB)."""
    try:
        cap = int(pltpu.get_tpu_info().vmem_capacity_bytes)
    except Exception:
        cap = 64 * 1024 * 1024
    return max(32 * 1024 * 1024, min(cap * 3 // 4, 96 * 1024 * 1024))


def _apply_act(x, act):
    if act == "relu":
        return jnp.maximum(x, 0.0)
    if act == "relu6":
        return jnp.clip(x, 0.0, 6.0)
    return x


# ----------------------------------------------------------------------------
# Kernel 1: fused 1x1 expansion (MXU) + ReLU6 + 3x3 depthwise + bn2 + pool sum
# ----------------------------------------------------------------------------
def _expdw_kernel(x_ref, w1_ref, b1_ref, wd_ref, bd_ref, o_ref, pool_ref, xpad_ref):
    _, H, W, tc = o_ref.shape
    # 1x1 expansion on the MXU (bf16 operands, f32 accumulate) + bn1 + ReLU6.
    exp = jnp.dot(x_ref[0], w1_ref[...], preferred_element_type=jnp.float32)
    exp = jnp.clip(exp + b1_ref[...], 0.0, 6.0)
    # Stage with a zero halo in VMEM: no host-side pad, no HBM round trip of the
    # expansion tensor.  Scratch is fully rewritten every grid step, so both
    # grid axes stay safely "parallel" (megacore).
    xpad_ref[...] = jnp.zeros_like(xpad_ref)
    xpad_ref[1:H + 1, 1:W + 1, :] = exp.reshape(H, W, tc)
    # 3x3 depthwise conv (stride 1, pad 1) + folded bn2 bias, all in f32.
    acc = jnp.zeros((H, W, tc), jnp.float32)
    for t in range(9):
        dy, dx = t // 3, t % 3
        acc = acc + xpad_ref[dy:dy + H, dx:dx + W, :] * wd_ref[t][None, None, :]
    acc = acc + bd_ref[0][None, None, :]
    o_ref[0] = acc.astype(o_ref.dtype)
    # Fused spatial sum feeding SqueezeExcite pooling (saves an HBM read pass).
    pool_ref[0] = jnp.sum(jnp.sum(acc, axis=0), axis=0, keepdims=True)


def expand_dw_bn(x, w1, b1, wd, bd, *, vmem_limit):
    """x: (B,H,W,Cin) f32; w1: (Cin,Ce) folded; b1: (Ce,); wd: (3,3,Ce); bd: (Ce,).
    Returns (dw output (B,H,W,Cep) bf16 with zero-padded channels,
             spatial sum (B,Cep) f32)."""
    B, H, W, Cin = x.shape
    Ce = w1.shape[1]
    Cep = _rup(Ce, 128)
    HW = H * W
    Wpad = _rup(W + 2, 8)
    # Largest channel tile whose per-step footprint (double-buffered blocks plus
    # the halo scratch) fits comfortably inside the VMEM budget.
    tc = 128
    for cand in (512, 256, 128):
        if Cep % cand != 0:
            continue
        est = (2 * HW * Cin * 2            # x block (bf16, double-buffered)
               + 2 * Cin * cand * 2        # w1 block (bf16)
               + 2 * HW * cand * 2         # dw output block (bf16, double-buffered)
               + (H + 2) * Wpad * cand * 4  # halo scratch (f32)
               + 4 * HW * cand)            # in-register working set (f32)
        if est <= vmem_limit // 2:
            tc = cand
            break

    x_flat = x.reshape(B, HW, Cin).astype(jnp.bfloat16)
    w1p = jnp.pad(w1, ((0, 0), (0, Cep - Ce))).astype(jnp.bfloat16)
    b1p = jnp.pad(b1.reshape(1, Ce), ((0, 0), (0, Cep - Ce)))
    wdp = jnp.pad(wd.reshape(9, Ce), ((0, 0), (0, Cep - Ce)))
    bdp = jnp.pad(bd.reshape(1, Ce), ((0, 0), (0, Cep - Ce)))

    out, pool = pl.pallas_call(
        _expdw_kernel,
        out_shape=(jax.ShapeDtypeStruct((B, H, W, Cep), jnp.bfloat16),
                   jax.ShapeDtypeStruct((B, 1, Cep), jnp.float32)),
        grid_spec=pltpu.PrefetchScalarGridSpec(
            num_scalar_prefetch=0,
            grid=(B, Cep // tc),
            in_specs=[
                pl.BlockSpec((1, HW, Cin), lambda bi, ci: (bi, 0, 0)),
                pl.BlockSpec((Cin, tc), lambda bi, ci: (0, ci)),
                pl.BlockSpec((1, tc), lambda bi, ci: (0, ci)),
                pl.BlockSpec((9, tc), lambda bi, ci: (0, ci)),
                pl.BlockSpec((1, tc), lambda bi, ci: (0, ci)),
            ],
            out_specs=(
                pl.BlockSpec((1, H, W, tc), lambda bi, ci: (bi, 0, 0, ci)),
                pl.BlockSpec((1, 1, tc), lambda bi, ci: (bi, 0, ci)),
            ),
            scratch_shapes=[pltpu.VMEM((H + 2, Wpad, tc), jnp.float32)],
        ),
        compiler_params=pltpu.CompilerParams(
            dimension_semantics=("parallel", "parallel"),
            vmem_limit_bytes=vmem_limit,
        ),
    )(x_flat, w1p, b1p, wdp, bdp)
    return out, pool[:, 0, :]


# ----------------------------------------------------------------------------
# Kernel 2: tiled matmul  C = act(A @ B + bias), bf16 operands, f32 accumulator
# ----------------------------------------------------------------------------
def _mm_kernel(a_ref, b_ref, bias_ref, o_ref, acc_ref, *, act, nk):
    @pl.when(pl.program_id(2) == 0)
    def _():
        acc_ref[...] = jnp.zeros_like(acc_ref)

    acc_ref[...] += jnp.dot(a_ref[...], b_ref[...],
                            preferred_element_type=jnp.float32)

    @pl.when(pl.program_id(2) == nk - 1)
    def _():
        out = acc_ref[...] + bias_ref[...]
        o_ref[...] = _apply_act(out, act).astype(o_ref.dtype)


def fused_matmul(a, b, bias=None, act=None, out_dtype=jnp.float32,
                 keep_n_pad=False, vmem_limit=48 * 1024 * 1024):
    """C = act(A @ B + bias). a: (M,K) f32, b: (K,N) f32, bias: (N,)."""
    M, K = a.shape
    K2, N = b.shape
    assert K == K2
    tm = min(256, _rup(M, 8))
    Np = _rup(N, 128)
    tn = next(t for t in (512, 256, 128) if Np % t == 0)
    if K < 128:
        # Full-dim contraction block (legal) - no zero-padded A traffic / MXU passes.
        tk, Kp = K, K
    else:
        Kp = _rup(K, 128)
        tk = next(t for t in (512, 256, 128) if Kp % t == 0)
    Mp = _rup(M, tm)
    # Host-side bf16 cast so the DMA moves bf16 (half the A/B read bytes).
    a_p = jnp.pad(a.astype(jnp.bfloat16), ((0, Mp - M), (0, Kp - K)))
    b_p = jnp.pad(b, ((0, Kp - K), (0, Np - N))).astype(jnp.bfloat16)
    if bias is None:
        bias = jnp.zeros((N,), jnp.float32)
    bias_p = jnp.pad(bias.reshape(1, N), ((0, 0), (0, Np - N)))
    grid = (Mp // tm, Np // tn, Kp // tk)
    out = pl.pallas_call(
        functools.partial(_mm_kernel, act=act, nk=grid[2]),
        out_shape=jax.ShapeDtypeStruct((Mp, Np), out_dtype),
        grid_spec=pltpu.PrefetchScalarGridSpec(
            num_scalar_prefetch=0,
            grid=grid,
            in_specs=[
                pl.BlockSpec((tm, tk), lambda i, j, k: (i, k)),
                pl.BlockSpec((tk, tn), lambda i, j, k: (k, j)),
                pl.BlockSpec((1, tn), lambda i, j, k: (0, j)),
            ],
            out_specs=pl.BlockSpec((tm, tn), lambda i, j, k: (i, j)),
            scratch_shapes=[pltpu.VMEM((tm, tn), jnp.float32)],
        ),
        compiler_params=pltpu.CompilerParams(
            dimension_semantics=("parallel", "parallel", "arbitrary"),
            vmem_limit_bytes=vmem_limit,
        ),
    )(a_p, b_p, bias_p)
    out = out[:M]
    return out if keep_n_pad else out[:, :N]


def conv1x1(x, w_mat, bias, act=None, out_dtype=jnp.float32, keep_n_pad=False,
            vmem_limit=48 * 1024 * 1024):
    """x: (B,H,W,Cin) NHWC, w_mat: (Cin, Cout), bias: (Cout,)."""
    B, H, W, C = x.shape
    out = fused_matmul(x.reshape(B * H * W, C), w_mat, bias, act=act,
                       out_dtype=out_dtype, keep_n_pad=keep_n_pad,
                       vmem_limit=vmem_limit)
    return out.reshape(B, H, W, -1)


# ----------------------------------------------------------------------------
# Kernel 3: SqueezeExcite gates = sigmoid(fc2(relu6(fc1(pooled))))
# ----------------------------------------------------------------------------
def _se_kernel(p_ref, w1_ref, b1_ref, w2_ref, b2_ref, o_ref):
    h = jnp.dot(p_ref[...].astype(jnp.bfloat16), w1_ref[...],
                preferred_element_type=jnp.float32) + b1_ref[...]
    h = jnp.clip(h, 0.0, 6.0)                                    # ReLU6
    g = jnp.dot(h.astype(jnp.bfloat16), w2_ref[...],
                preferred_element_type=jnp.float32) + b2_ref[...]
    o_ref[...] = pl.reciprocal(1.0 + jnp.exp(-g))                # exact sigmoid


def se_gates(pooled, w1, b1, w2, b2):
    """pooled: (B, C) spatial mean; returns sigmoid gates (B, C) f32."""
    B, C = pooled.shape
    Cr = w1.shape[1]
    Bp, Cp, Crp = _rup(B, 8), _rup(C, 128), _rup(Cr, 128)
    p = jnp.pad(pooled, ((0, Bp - B), (0, Cp - C)))
    w1p = jnp.pad(w1, ((0, Cp - C), (0, Crp - Cr))).astype(jnp.bfloat16)
    b1p = jnp.pad(b1.reshape(1, Cr), ((0, 0), (0, Crp - Cr)))
    w2p = jnp.pad(w2, ((0, Crp - Cr), (0, Cp - C))).astype(jnp.bfloat16)
    b2p = jnp.pad(b2.reshape(1, C), ((0, 0), (0, Cp - C)))
    g = pl.pallas_call(
        _se_kernel,
        out_shape=jax.ShapeDtypeStruct((Bp, Cp), jnp.float32),
    )(p, w1p, b1p, w2p, b2p)
    return g[:B, :C]


# ----------------------------------------------------------------------------
# Kernel 4: projection 1x1 conv with fused SE gate, bn3 bias and residual add
# ----------------------------------------------------------------------------
def _pw1_kernel(a_ref, s_ref, w_ref, b_ref, *rest, has_res):
    if has_res:
        r_ref, o_ref = rest
    else:
        (o_ref,) = rest
    # SE channel gate applied in f32 (v5e VPU has no bf16); cast at the MXU feed.
    a = (a_ref[0].astype(jnp.float32) * s_ref[0]).astype(jnp.bfloat16)
    out = jnp.dot(a, w_ref[...], preferred_element_type=jnp.float32) + b_ref[...]
    if has_res:
        out = out + r_ref[0].astype(jnp.float32)     # fused residual / shortcut
    o_ref[0] = out


def pw1_se_residual(x, gates, w, b, residual=None, vmem_limit=48 * 1024 * 1024):
    """x: (B,Ho,Wo,K) dw output (bf16, channel-padded), gates: (B,<=K) f32,
    w: (<=K, N), b: (N,), residual: (B,Ho,Wo,<=Np) or None.  Returns (B,Ho,Wo,N)."""
    B, H, W, K = x.shape
    Kw, N = w.shape
    HW = H * W
    Np = _rup(N, 128)
    tm = min(256, _rup(HW, 8))
    HWp = _rup(HW, tm)
    a = x.reshape(B, HW, K)
    if HWp != HW:
        a = jnp.pad(a, ((0, 0), (0, HWp - HW), (0, 0)))
    s = gates.reshape(B, 1, gates.shape[-1]).astype(jnp.float32)
    if s.shape[-1] != K:
        s = jnp.pad(s, ((0, 0), (0, 0), (0, K - s.shape[-1])))
    w_p = jnp.pad(w, ((0, K - Kw), (0, Np - N))).astype(jnp.bfloat16)
    b_p = jnp.pad(b.reshape(1, N), ((0, 0), (0, Np - N)))
    has_res = residual is not None
    inputs = [a, s, w_p, b_p]
    in_specs = [
        pl.BlockSpec((1, tm, K), lambda bi, mi: (bi, mi, 0)),
        pl.BlockSpec((1, 1, K), lambda bi, mi: (bi, 0, 0)),
        pl.BlockSpec((K, Np), lambda bi, mi: (0, 0)),
        pl.BlockSpec((1, Np), lambda bi, mi: (0, 0)),
    ]
    if has_res:
        rN = residual.shape[-1]
        r = residual.reshape(B, HW, rN)
        if HWp != HW or rN != Np:
            r = jnp.pad(r, ((0, 0), (0, HWp - HW), (0, Np - rN)))
        inputs.append(r)
        in_specs.append(pl.BlockSpec((1, tm, Np), lambda bi, mi: (bi, mi, 0)))
    out = pl.pallas_call(
        functools.partial(_pw1_kernel, has_res=has_res),
        out_shape=jax.ShapeDtypeStruct((B, HWp, Np), jnp.float32),
        grid_spec=pltpu.PrefetchScalarGridSpec(
            num_scalar_prefetch=0,
            grid=(B, HWp // tm),
            in_specs=in_specs,
            out_specs=pl.BlockSpec((1, tm, Np), lambda bi, mi: (bi, mi, 0)),
        ),
        compiler_params=pltpu.CompilerParams(
            dimension_semantics=("parallel", "parallel"),
            vmem_limit_bytes=vmem_limit,
        ),
    )(*inputs)
    return out[:, :HW, :N].reshape(B, H, W, N)


# ----------------------------------------------------------------------------
# BatchNorm folding (inference mode) and small glue helpers
# ----------------------------------------------------------------------------
def fold_bn_mat(w, b, bn, eps=1e-5):
    """w: (I, O) 1x1 conv as matmul, b: (O,)."""
    scale = bn["gamma"] / jnp.sqrt(bn["var"] + eps)
    return w * scale[None, :], (b - bn["mean"]) * scale + bn["beta"]


def fold_bn_dw(w, b, bn, eps=1e-5):
    """w: (3, 3, C) depthwise, b: (C,)."""
    scale = bn["gamma"] / jnp.sqrt(bn["var"] + eps)
    return w * scale[None, None, :], (b - bn["mean"]) * scale + bn["beta"]


def maxpool2x2(x):
    # TODO(synk): 2x2 max-pool of the stride-2 shortcut kept in plain XLA glue.
    B, H, W, C = x.shape
    return x.reshape(B, H // 2, 2, W // 2, 2, C).max(axis=(2, 4))


# ----------------------------------------------------------------------------
# MBConv forward (Pallas kernels + thin JAX glue)
# ----------------------------------------------------------------------------
def mbconv_forward(params, x_nchw, *, stride=1, has_skip=False):
    """MBConv forward.  x_nchw: (B, Cin, H, W) -> (B, Cout, Ho, Wo)."""
    x = jnp.transpose(x_nchw, (0, 2, 3, 1)).astype(jnp.float32)   # NCHW -> NHWC
    B, H, W, in_ch = x.shape
    out_ch = params["pw1_w"].shape[1]
    exp_ch = params["pw_w"].shape[1]
    skip = has_skip or (in_ch != out_ch)
    vmem_limit = _vmem_budget()

    # ---- shortcut branch (only computed when it is actually added) --------
    shortcut = None
    if skip:
        if stride == 2:
            shortcut = conv1x1(maxpool2x2(x), params["sc_w"], params["sc_b"],
                               out_dtype=jnp.bfloat16, keep_n_pad=True,
                               vmem_limit=vmem_limit)
        elif in_ch != out_ch:
            shortcut = conv1x1(x, params["sc_w"], params["sc_b"],
                               out_dtype=jnp.bfloat16, keep_n_pad=True,
                               vmem_limit=vmem_limit)
        else:
            shortcut = x                                          # nn.Identity()

    # ---- pw (expand) + bn1 + ReLU6 + dw 3x3 + bn2, fused into ONE kernel ---
    w1, b1 = fold_bn_mat(params["pw_w"], params["pw_b"], params["bn1"])
    wd, bd = fold_bn_dw(params["dw_w"], params["dw_b"], params["bn2"])
    net, pool_sum = expand_dw_bn(x, w1, b1, wd, bd, vmem_limit=vmem_limit)

    if stride == 2:
        # TODO(synk): stride-2 realized by subsampling the stride-1 depthwise
        # output in XLA glue instead of a strided output inside the kernel.
        net = net[:, ::2, ::2, :]
        pooled = jnp.mean(net.astype(jnp.float32), axis=(1, 2))[:, :exp_ch]
    else:
        pooled = pool_sum[:, :exp_ch] * (1.0 / float(H * W))

    # ---- SqueezeExcite gates ----------------------------------------------
    gates = se_gates(pooled, params["se_w1"], params["se_b1"],
                     params["se_w2"], params["se_b2"])

    # ---- pw1 (project) + bn3 + SE gate + residual, all fused ---------------
    # DropPath(rate=0) is the identity, so the residual is added directly.
    w3, b3 = fold_bn_mat(params["pw1_w"], params["pw1_b"], params["bn3"])
    out = pw1_se_residual(net, gates, w3, b3,
                          shortcut if skip else None, vmem_limit=vmem_limit)
    return jnp.transpose(out, (0, 3, 1, 2))                       # NHWC -> NCHW


# ----------------------------------------------------------------------------
# Deterministic parameters
# ----------------------------------------------------------------------------
def make_mbconv_params(key, in_ch, out_ch, exp_ratio=4.0, reduction=0.25):
    exp_ch = round(in_ch * exp_ratio)
    inter = round(exp_ch * reduction)
    ks = jax.random.split(key, 12)

    def conv_w(k, i, o, fan):
        return ((2.0 / fan) ** 0.5) * jax.random.normal(k, (i, o), jnp.float32)

    def conv_b(k, o, fan):
        return ((1.0 / fan) ** 0.5) * jax.random.normal(k, (o,), jnp.float32)

    def bn(c):
        return {"gamma": jnp.ones((c,), jnp.float32),
                "beta": jnp.zeros((c,), jnp.float32),
                "mean": jnp.zeros((c,), jnp.float32),
                "var": jnp.ones((c,), jnp.float32)}

    return {
        "pw_w": conv_w(ks[0], in_ch, exp_ch, in_ch),
        "pw_b": conv_b(ks[1], exp_ch, in_ch),
        "bn1": bn(exp_ch),
        "dw_w": ((2.0 / 9.0) ** 0.5) * jax.random.normal(ks[2], (3, 3, exp_ch), jnp.float32),
        "dw_b": conv_b(ks[3], exp_ch, 9),
        "bn2": bn(exp_ch),
        "se_w1": conv_w(ks[4], exp_ch, inter, exp_ch),
        "se_b1": conv_b(ks[5], inter, exp_ch),
        "se_w2": conv_w(ks[6], inter, exp_ch, inter),
        "se_b2": conv_b(ks[7], exp_ch, inter),
        "pw1_w": conv_w(ks[8], exp_ch, out_ch, exp_ch),
        "pw1_b": conv_b(ks[9], out_ch, exp_ch),
        "bn3": bn(out_ch),
        "sc_w": conv_w(ks[10], in_ch, out_ch, in_ch),
        "sc_b": conv_b(ks[11], out_ch, in_ch),
    }


# ----------------------------------------------------------------------------
# Plain-JAX / XLA reference for numeric verification
# ----------------------------------------------------------------------------
def ref_mbconv(params, x_nchw, *, stride=1, has_skip=False):
    x = jnp.transpose(x_nchw, (0, 2, 3, 1)).astype(jnp.float32)
    B, H, W, in_ch = x.shape
    out_ch = params["pw1_w"].shape[1]
    skip = has_skip or (in_ch != out_ch)

    def c1x1(t, w, b):
        return jnp.einsum("bhwi,io->bhwo", t, w) + b

    sc = None
    if skip:
        if stride == 2:
            sc = c1x1(maxpool2x2(x), params["sc_w"], params["sc_b"])
        elif in_ch != out_ch:
            sc = c1x1(x, params["sc_w"], params["sc_b"])
        else:
            sc = x

    w1, b1 = fold_bn_mat(params["pw_w"], params["pw_b"], params["bn1"])
    net = jnp.clip(c1x1(x, w1, b1), 0.0, 6.0)
    wd, bd = fold_bn_dw(params["dw_w"], params["dw_b"], params["bn2"])
    C = net.shape[-1]
    net = lax.conv_general_dilated(
        net, wd.reshape(3, 3, 1, C), (stride, stride), ((1, 1), (1, 1)),
        dimension_numbers=("NHWC", "HWIO", "NHWC"),
        feature_group_count=C) + bd
    pooled = jnp.mean(net, axis=(1, 2))
    h = jnp.clip(pooled @ params["se_w1"] + params["se_b1"], 0.0, 6.0)
    g = jax.nn.sigmoid(h @ params["se_w2"] + params["se_b2"])
    net = net * g[:, None, None, :]
    w3, b3 = fold_bn_mat(params["pw1_w"], params["pw1_b"], params["bn3"])
    net = c1x1(net, w3, b3)
    if skip:
        net = net + sc
    return jnp.transpose(net, (0, 3, 1, 2))


# ----------------------------------------------------------------------------
if __name__ == "__main__":
    root = jax.random.PRNGKey(0)
    B, H, W = 2, 16, 16
    configs = [
        dict(in_ch=32, out_ch=64, stride=1, has_skip=False),  # conv shortcut + residual
        dict(in_ch=32, out_ch=32, stride=1, has_skip=True),   # identity shortcut + residual
        dict(in_ch=32, out_ch=64, stride=2, has_skip=False),  # maxpool+conv shortcut
    ]
    for i, cfg in enumerate(configs):
        kp, kx = jax.random.split(jax.random.fold_in(root, i))
        params = make_mbconv_params(kp, cfg["in_ch"], cfg["out_ch"])
        x = jax.random.normal(kx, (B, cfg["in_ch"], H, W), jnp.float32)

        fwd = jax.jit(functools.partial(
            mbconv_forward, stride=cfg["stride"], has_skip=cfg["has_skip"]))
        out = fwd(params, x)
        jax.block_until_ready(out)

        ref = ref_mbconv(params, x, stride=cfg["stride"], has_skip=cfg["has_skip"])
        assert out.shape == ref.shape, (out.shape, ref.shape)
        assert bool(jnp.all(jnp.isfinite(out)))
        err = float(jnp.max(jnp.abs(out - ref)) / (jnp.max(jnp.abs(ref)) + 1e-6))
        assert err < 0.1, f"config {i}: relative error {err:.4f}"

    print("KERNEL_OK")
</pallas_src>

<mosaic_0001>
module attributes {stable_mosaic.version = 11 : i64} {
  func.func @_expdw_kernel(%arg0: i32, %arg1: i32, %arg2: memref<1x256x32xbf16, #tpu.memory_space<vmem>>, %arg3: memref<32x128xbf16, #tpu.memory_space<vmem>>, %arg4: memref<1x128xf32, #tpu.memory_space<vmem>>, %arg5: memref<9x128xf32, #tpu.memory_space<vmem>>, %arg6: memref<1x128xf32, #tpu.memory_space<vmem>>, %arg7: memref<1x16x16x128xbf16, #tpu.memory_space<vmem>>, %arg8: memref<1x1x128xf32, #tpu.memory_space<vmem>>, %arg9: memref<18x24x128xf32, #tpu.memory_space<vmem>>) attributes {dimension_semantics = [#tpu.dimension_semantics<parallel>, #tpu.dimension_semantics<parallel>], iteration_bounds = array<i64: 2, 1>, scalar_prefetch = 0 : i64, scratch_operands = 1 : i64, tpu.core_type = #tpu.core_type<tc>, window_params = [{transform_indices = @transform_0, window_bounds = array<i64: 1, 256, 32>}, {transform_indices = @transform_1, window_bounds = array<i64: 32, 128>}, {transform_indices = @transform_2, window_bounds = array<i64: 1, 128>}, {transform_indices = @transform_3, window_bounds = array<i64: 9, 128>}, {transform_indices = @transform_4, window_bounds = array<i64: 1, 128>}, {transform_indices = @transform_5, window_bounds = array<i64: 1, 16, 16, 128>}, {transform_indices = @transform_6, window_bounds = array<i64: 1, 1, 128>}]} {
    %c0 = arith.constant 0 : index
    %c0_0 = arith.constant 0 : index
    %c0_1 = arith.constant 0 : index
    %0 = vector.load %arg2[%c0, %c0_0, %c0_1] : memref<1x256x32xbf16, #tpu.memory_space<vmem>>, vector<1x256x32xbf16>
    %1 = vector.shape_cast %0 : vector<1x256x32xbf16> to vector<256x32xbf16>
    %c0_2 = arith.constant 0 : index
    %c0_3 = arith.constant 0 : index
    %2 = vector.load %arg3[%c0_2, %c0_3] : memref<32x128xbf16, #tpu.memory_space<vmem>>, vector<32x128xbf16>
    %cst = arith.constant dense<0.000000e+00> : vector<256x128xf32>
    %3 = tpu.matmul %1, %2, %cst {dimension_numbers = #tpu.dot_dimension_numbers<[1], [0], [0], [1], [0, 0, 1, 1], [], []>} : vector<256x32xbf16>, vector<32x128xbf16>, vector<256x128xf32> -> vector<256x128xf32>
    %c0_4 = arith.constant 0 : index
    %c0_5 = arith.constant 0 : index
    %4 = vector.load %arg4[%c0_4, %c0_5] : memref<1x128xf32, #tpu.memory_space<vmem>>, vector<1x128xf32>
    %5 = vector.broadcast %4 : vector<1x128xf32> to vector<256x128xf32>
    %6 = arith.addf %3, %5 : vector<256x128xf32>
    %cst_6 = arith.constant 0.000000e+00 : f32
    %cst_7 = arith.constant 6.000000e+00 : f32
    %7 = vector.broadcast %cst_6 : f32 to vector<256x128xf32>
    %8 = arith.maximumf %7, %6 : vector<256x128xf32>
    %9 = vector.broadcast %cst_7 : f32 to vector<256x128xf32>
    %10 = arith.minimumf %9, %8 : vector<256x128xf32>
    %cst_8 = arith.constant 0.000000e+00 : f32
    %11 = vector.broadcast %cst_8 : f32 to vector<18x24x128xf32>
    %c0_9 = arith.constant 0 : index
    %c0_10 = arith.constant 0 : index
    %c0_11 = arith.constant 0 : index
    %12 = vector.load %arg9[%c0_9, %c0_10, %c0_11] : memref<18x24x128xf32, #tpu.memory_space<vmem>>, vector<18x24x128xf32>
    tpu.vector_store %arg9[%c0_9, %c0_10, %c0_11], %11 {strides = array<i32>} : memref<18x24x128xf32, #tpu.memory_space<vmem>>, vector<18x24x128xf32>,
    %13 = vector.shape_cast %10 : vector<256x128xf32> to vector<16x16x128xf32>
    %c1 = arith.constant 1 : index
    %c1_12 = arith.constant 1 : index
    %c0_13 = arith.constant 0 : index
    %14 = vector.load %arg9[%c1, %c1_12, %c0_13] : memref<18x24x128xf32, #tpu.memory_space<vmem>>, vector<16x16x128xf32>
    tpu.vector_store %arg9[%c1, %c1_12, %c0_13], %13 {strides = array<i32>} : memref<18x24x128xf32, #tpu.memory_space<vmem>>, vector<16x16x128xf32>,
    %cst_14 = arith.constant 0.000000e+00 : f32
    %15 = vector.broadcast %cst_14 : f32 to vector<16x16x128xf32>
    %c0_15 = arith.constant 0 : index
    %c0_16 = arith.constant 0 : index
    %c0_17 = arith.constant 0 : index
    %16 = vector.load %arg9[%c0_15, %c0_16, %c0_17] : memref<18x24x128xf32, #tpu.memory_space<vmem>>, vector<16x16x128xf32>
    %c0_18 = arith.constant 0 : index
    %c0_19 = arith.constant 0 : index
    %17 = vector.load %arg5[%c0_18, %c0_19] : memref<9x128xf32, #tpu.memory_space<vmem>>, vector<1x128xf32>
    %18 = vector.shape_cast %17 : vector<1x128xf32> to vector<128xf32>
    %19 = vector.shape_cast %18 : vector<128xf32> to vector<1x1x128xf32>
    %20 = vector.broadcast %19 : vector<1x1x128xf32> to vector<16x16x128xf32>
    %21 = arith.mulf %16, %20 : vector<16x16x128xf32>
    %22 = arith.addf %15, %21 : vector<16x16x128xf32>
    %c0_20 = arith.constant 0 : index
    %c1_21 = arith.constant 1 : index
    %c0_22 = arith.constant 0 : index
    %23 = vector.load %arg9[%c0_20, %c1_21, %c0_22] : memref<18x24x128xf32, #tpu.memory_space<vmem>>, vector<16x16x128xf32>
    %c1_23 = arith.constant 1 : index
    %c0_24 = arith.constant 0 : index
    %24 = vector.load %arg5[%c1_23, %c0_24] : memref<9x128xf32, #tpu.memory_space<vmem>>, vector<1x128xf32>
    %25 = vector.shape_cast %24 : vector<1x128xf32> to vector<128xf32>
    %26 = vector.shape_cast %25 : vector<128xf32> to vector<1x1x128xf32>
    %27 = vector.broadcast %26 : vector<1x1x128xf32> to vector<16x16x128xf32>
    %28 = arith.mulf %23, %27 : vector<16x16x128xf32>
    %29 = arith.addf %22, %28 : vector<16x16x128xf32>
    %c0_25 = arith.constant 0 : index
    %c2 = arith.constant 2 : index
    %c0_26 = arith.constant 0 : index
    %30 = vector.load %arg9[%c0_25, %c2, %c0_26] : memref<18x24x128xf32, #tpu.memory_space<vmem>>, vector<16x16x128xf32>
    %c2_27 = arith.constant 2 : index
    %c0_28 = arith.constant 0 : index
    %31 = vector.load %arg5[%c2_27, %c0_28] : memref<9x128xf32, #tpu.memory_space<vmem>>, vector<1x128xf32>
    %32 = vector.shape_cast %31 : vector<1x128xf32> to vector<128xf32>
    %33 = vector.shape_cast %32 : vector<128xf32> to vector<1x1x128xf32>
    %34 = vector.broadcast %33 : vector<1x1x128xf32> to vector<16x16x128xf32>
    %35 = arith.mulf %30, %34 : vector<16x16x128xf32>
    %36 = arith.addf %29, %35 : vector<16x16x128xf32>
    %c1_29 = arith.constant 1 : index
    %c0_30 = arith.constant 0 : index
    %c0_31 = arith.constant 0 : index
    %37 = vector.load %arg9[%c1_29, %c0_30, %c0_31] : memref<18x24x128xf32, #tpu.memory_space<vmem>>, vector<16x16x128xf32>
    %c3 = arith.constant 3 : index
    %c0_32 = arith.constant 0 : index
    %38 = vector.load %arg5[%c3, %c0_32] : memref<9x128xf32, #tpu.memory_space<vmem>>, vector<1x128xf32>
    %39 = vector.shape_cast %38 : vector<1x128xf32> to vector<128xf32>
    %40 = vector.shape_cast %39 : vector<128xf32> to vector<1x1x128xf32>
    %41 = vector.broadcast %40 : vector<1x1x128xf32> to vector<16x16x128xf32>
    %42 = arith.mulf %37, %41 : vector<16x16x128xf32>
    %43 = arith.addf %36, %42 : vector<16x16x128xf32>
    %c1_33 = arith.constant 1 : index
    %c1_34 = arith.constant 1 : index
    %c0_35 = arith.constant 0 : index
    %44 = vector.load %arg9[%c1_33, %c1_34, %c0_35] : memref<18x24x128xf32, #tpu.memory_space<vmem>>, vector<16x16x128xf32>
    %c4 = arith.constant 4 : index
    %c0_36 = arith.constant 0 : index
    %45 = vector.load %arg5[%c4, %c0_36] : memref<9x128xf32, #tpu.memory_space<vmem>>, vector<1x128xf32>
    %46 = vector.shape_cast %45 : vector<1x128xf32> to vector<128xf32>
    %47 = vector.shape_cast %46 : vector<128xf32> to vector<1x1x128xf32>
    %48 = vector.broadcast %47 : vector<1x1x128xf32> to vector<16x16x128xf32>
    %49 = arith.mulf %44, %48 : vector<16x16x128xf32>
    %50 = arith.addf %43, %49 : vector<16x16x128xf32>
    %c1_37 = arith.constant 1 : index
    %c2_38 = arith.constant 2 : index
    %c0_39 = arith.constant 0 : index
    %51 = vector.load %arg9[%c1_37, %c2_38, %c0_39] : memref<18x24x128xf32, #tpu.memory_space<vmem>>, vector<16x16x128xf32>
    %c5 = arith.constant 5 : index
    %c0_40 = arith.constant 0 : index
    %52 = vector.load %arg5[%c5, %c0_40] : memref<9x128xf32, #tpu.memory_space<vmem>>, vector<1x128xf32>
    %53 = vector.shape_cast %52 : vector<1x128xf32> to vector<128xf32>
    %54 = vector.shape_cast %53 : vector<128xf32> to vector<1x1x128xf32>
    %55 = vector.broadcast %54 : vector<1x1x128xf32> to vector<16x16x128xf32>
    %56 = arith.mulf %51, %55 : vector<16x16x128xf32>
    %57 = arith.addf %50, %56 : vector<16x16x128xf32>
    %c2_41 = arith.constant 2 : index
    %c0_42 = arith.constant 0 : index
    %c0_43 = arith.constant 0 : index
    %58 = vector.load %arg9[%c2_41, %c0_42, %c0_43] : memref<18x24x128xf32, #tpu.memory_space<vmem>>, vector<16x16x128xf32>
    %c6 = arith.constant 6 : index
    %c0_44 = arith.constant 0 : index
    %59 = vector.load %arg5[%c6, %c0_44] : memref<9x128xf32, #tpu.memory_space<vmem>>, vector<1x128xf32>
    %60 = vector.shape_cast %59 : vector<1x128xf32> to vector<128xf32>
    %61 = vector.shape_cast %60 : vector<128xf32> to vector<1x1x128xf32>
    %62 = vector.broadcast %61 : vector<1x1x128xf32> to vector<16x16x128xf32>
    %63 = arith.mulf %58, %62 : vector<16x16x128xf32>
    %64 = arith.addf %57, %63 : vector<16x16x128xf32>
    %c2_45 = arith.constant 2 : index
    %c1_46 = arith.constant 1 : index
    %c0_47 = arith.constant 0 : index
    %65 = vector.load %arg9[%c2_45, %c1_46, %c0_47] : memref<18x24x128xf32, #tpu.memory_space<vmem>>, vector<16x16x128xf32>
    %c7 = arith.constant 7 : index
    %c0_48 = arith.constant 0 : index
    %66 = vector.load %arg5[%c7, %c0_48] : memref<9x128xf32, #tpu.memory_space<vmem>>, vector<1x128xf32>
    %67 = vector.shape_cast %66 : vector<1x128xf32> to vector<128xf32>
    %68 = vector.shape_cast %67 : vector<128xf32> to vector<1x1x128xf32>
    %69 = vector.broadcast %68 : vector<1x1x128xf32> to vector<16x16x128xf32>
    %70 = arith.mulf %65, %69 : vector<16x16x128xf32>
    %71 = arith.addf %64, %70 : vector<16x16x128xf32>
    %c2_49 = arith.constant 2 : index
    %c2_50 = arith.constant 2 : index
    %c0_51 = arith.constant 0 : index
    %72 = vector.load %arg9[%c2_49, %c2_50, %c0_51] : memref<18x24x128xf32, #tpu.memory_space<vmem>>, vector<16x16x128xf32>
    %c8 = arith.constant 8 : index
    %c0_52 = arith.constant 0 : index
    %73 = vector.load %arg5[%c8, %c0_52] : memref<9x128xf32, #tpu.memory_space<vmem>>, vector<1x128xf32>
    %74 = vector.shape_cast %73 : vector<1x128xf32> to vector<128xf32>
    %75 = vector.shape_cast %74 : vector<128xf32> to vector<1x1x128xf32>
    %76 = vector.broadcast %75 : vector<1x1x128xf32> to vector<16x16x128xf32>
    %77 = arith.mulf %72, %76 : vector<16x16x128xf32>
    %78 = arith.addf %71, %77 : vector<16x16x128xf32>
    %c0_53 = arith.constant 0 : index
    %c0_54 = arith.constant 0 : index
    %79 = vector.load %arg6[%c0_53, %c0_54] : memref<1x128xf32, #tpu.memory_space<vmem>>, vector<1x128xf32>
    %80 = vector.shape_cast %79 : vector<1x128xf32> to vector<128xf32>
    %81 = vector.shape_cast %80 : vector<128xf32> to vector<1x1x128xf32>
    %82 = vector.broadcast %81 : vector<1x1x128xf32> to vector<16x16x128xf32>
    %83 = arith.addf %78, %82 : vector<16x16x128xf32>
    %84 = arith.truncf %83 : vector<16x16x128xf32> to vector<16x16x128xbf16>
    %c0_55 = arith.constant 0 : index
    %c0_56 = arith.constant 0 : index
    %c0_57 = arith.constant 0 : index
    %c0_58 = arith.constant 0 : index
    %85 = vector.load %arg7[%c0_55, %c0_56, %c0_57, %c0_58] : memref<1x16x16x128xbf16, #tpu.memory_space<vmem>>, vector<1x16x16x128xbf16>
    %86 = vector.shape_cast %85 : vector<1x16x16x128xbf16> to vector<16x16x128xbf16>
    %87 = vector.shape_cast %84 : vector<16x16x128xbf16> to vector<1x16x16x128xbf16>
    tpu.vector_store %arg7[%c0_55, %c0_56, %c0_57, %c0_58], %87 {strides = array<i32>} : memref<1x16x16x128xbf16, #tpu.memory_space<vmem>>, vector<1x16x16x128xbf16>,
    %cst_59 = arith.constant dense<0.000000e+00> : vector<16x128xf32>
    %88 = vector.multi_reduction <add>, %83, %cst_59 [0] : vector<16x16x128xf32> to vector<16x128xf32>
    %cst_60 = arith.constant dense<0.000000e+00> : vector<128xf32>
    %89 = vector.multi_reduction <add>, %88, %cst_60 [0] : vector<16x128xf32> to vector<128xf32>
    %90 = vector.shape_cast %89 : vector<128xf32> to vector<1x128xf32>
    %c0_61 = arith.constant 0 : index
    %c0_62 = arith.constant 0 : index
    %c0_63 = arith.constant 0 : index
    %91 = vector.load %arg8[%c0_61, %c0_62, %c0_63] : memref<1x1x128xf32, #tpu.memory_space<vmem>>, vector<1x1x128xf32>
    %92 = vector.shape_cast %91 : vector<1x1x128xf32> to vector<1x128xf32>
    %93 = vector.shape_cast %90 : vector<1x128xf32> to vector<1x1x128xf32>
    tpu.vector_store %arg8[%c0_61, %c0_62, %c0_63], %93 {strides = array<i32>} : memref<1x1x128xf32, #tpu.memory_space<vmem>>, vector<1x1x128xf32>,
    return
  }
  func.func @transform_0(%arg0: i32, %arg1: i32) -> (i32, i32, i32) {
    %c0_i32 = arith.constant 0 : i32
    %c0_i32_0 = arith.constant 0 : i32
    %c0_i32_1 = arith.constant 0 : i32
    return %arg0, %c0_i32, %c0_i32_0 : i32, i32, i32
  }
  func.func @transform_1(%arg0: i32, %arg1: i32) -> (i32, i32) {
    %c0_i32 = arith.constant 0 : i32
    %c0_i32_0 = arith.constant 0 : i32
    return %c0_i32, %arg1 : i32, i32
  }
  func.func @transform_2(%arg0: i32, %arg1: i32) -> (i32, i32) {
    %c0_i32 = arith.constant 0 : i32
    %c0_i32_0 = arith.constant 0 : i32
    return %c0_i32, %arg1 : i32, i32
  }
  func.func @transform_3(%arg0: i32, %arg1: i32) -> (i32, i32) {
    %c0_i32 = arith.constant 0 : i32
    %c0_i32_0 = arith.constant 0 : i32
    return %c0_i32, %arg1 : i32, i32
  }
  func.func @transform_4(%arg0: i32, %arg1: i32) -> (i32, i32) {
    %c0_i32 = arith.constant 0 : i32
    %c0_i32_0 = arith.constant 0 : i32
    return %c0_i32, %arg1 : i32, i32
  }
  func.func @transform_5(%arg0: i32, %arg1: i32) -> (i32, i32, i32, i32) {
    %c0_i32 = arith.constant 0 : i32
    %c0_i32_0 = arith.constant 0 : i32
    %c0_i32_1 = arith.constant 0 : i32
    return %arg0, %c0_i32, %c0_i32_0, %arg1 : i32, i32, i32, i32
  }
  func.func @transform_6(%arg0: i32, %arg1: i32) -> (i32, i32, i32) {
    %c0_i32 = arith.constant 0 : i32
    %c0_i32_0 = arith.constant 0 : i32
    return %arg0, %c0_i32, %arg1 : i32, i32, i32
  }
}

module attributes {stable_mosaic.version = 11 : i64} {
  func.func @_se_kernel(%arg0: memref<8x128xf32, #tpu.memory_space<vmem>>, %arg1: memref<128x128xbf16, #tpu.memory_space<vmem>>, %arg2: memref<1x128xf32, #tpu.memory_space<vmem>>, %arg3: memref<128x128xbf16, #tpu.memory_space<vmem>>, %arg4: memref<1x128xf32, #tpu.memory_space<vmem>>, %arg5: memref<8x128xf32, #tpu.memory_space<vmem>>) attributes {dimension_semantics = [], scalar_prefetch = 0 : i64, scratch_operands = 0 : i64, tpu.core_type = #tpu.core_type<tc>} {
    %c0 = arith.constant 0 : index
    %c0_0 = arith.constant 0 : index
    %0 = vector.load %arg0[%c0, %c0_0] : memref<8x128xf32, #tpu.memory_space<vmem>>, vector<8x128xf32>
    %1 = arith.truncf %0 : vector<8x128xf32> to vector<8x128xbf16>
    %c0_1 = arith.constant 0 : index
    %c0_2 = arith.constant 0 : index
    %2 = vector.load %arg1[%c0_1, %c0_2] : memref<128x128xbf16, #tpu.memory_space<vmem>>, vector<128x128xbf16>
    %cst = arith.constant dense<0.000000e+00> : vector<8x128xf32>
    %3 = tpu.matmul %1, %2, %cst {dimension_numbers = #tpu.dot_dimension_numbers<[1], [0], [0], [1], [0, 0, 1, 1], [], []>} : vector<8x128xbf16>, vector<128x128xbf16>, vector<8x128xf32> -> vector<8x128xf32>
    %c0_3 = arith.constant 0 : index
    %c0_4 = arith.constant 0 : index
    %4 = vector.load %arg2[%c0_3, %c0_4] : memref<1x128xf32, #tpu.memory_space<vmem>>, vector<1x128xf32>
    %5 = vector.broadcast %4 : vector<1x128xf32> to vector<8x128xf32>
    %6 = arith.addf %3, %5 : vector<8x128xf32>
    %cst_5 = arith.constant 0.000000e+00 : f32
    %cst_6 = arith.constant 6.000000e+00 : f32
    %7 = vector.broadcast %cst_5 : f32 to vector<8x128xf32>
    %8 = arith.maximumf %7, %6 : vector<8x128xf32>
    %9 = vector.broadcast %cst_6 : f32 to vector<8x128xf32>
    %10 = arith.minimumf %9, %8 : vector<8x128xf32>
    %11 = arith.truncf %10 : vector<8x128xf32> to vector<8x128xbf16>
    %c0_7 = arith.constant 0 : index
    %c0_8 = arith.constant 0 : index
    %12 = vector.load %arg3[%c0_7, %c0_8] : memref<128x128xbf16, #tpu.memory_space<vmem>>, vector<128x128xbf16>
    %cst_9 = arith.constant dense<0.000000e+00> : vector<8x128xf32>
    %13 = tpu.matmul %11, %12, %cst_9 {dimension_numbers = #tpu.dot_dimension_numbers<[1], [0], [0], [1], [0, 0, 1, 1], [], []>} : vector<8x128xbf16>, vector<128x128xbf16>, vector<8x128xf32> -> vector<8x128xf32>
    %c0_10 = arith.constant 0 : index
    %c0_11 = arith.constant 0 : index
    %14 = vector.load %arg4[%c0_10, %c0_11] : memref<1x128xf32, #tpu.memory_space<vmem>>, vector<1x128xf32>
    %15 = vector.broadcast %14 : vector<1x128xf32> to vector<8x128xf32>
    %16 = arith.addf %13, %15 : vector<8x128xf32>
    %cst_12 = arith.constant 0.000000e+00 : f32
    %17 = vector.broadcast %cst_12 : f32 to vector<8x128xf32>
    %18 = arith.subf %17, %16 : vector<8x128xf32>
    %19 = math.exp %18 : vector<8x128xf32>
    %cst_13 = arith.constant 1.000000e+00 : f32
    %20 = vector.broadcast %cst_13 : f32 to vector<8x128xf32>
    %21 = arith.addf %20, %19 : vector<8x128xf32>
    %22 = tpu.reciprocal %21 : vector<8x128xf32> -> vector<8x128xf32>
    %c0_14 = arith.constant 0 : index
    %c0_15 = arith.constant 0 : index
    %23 = vector.load %arg5[%c0_14, %c0_15] : memref<8x128xf32, #tpu.memory_space<vmem>>, vector<8x128xf32>
    tpu.vector_store %arg5[%c0_14, %c0_15], %22 {strides = array<i32>} : memref<8x128xf32, #tpu.memory_space<vmem>>, vector<8x128xf32>,
    return
  }
}

module attributes {stable_mosaic.version = 11 : i64} {
  func.func @_mm_kernel(%arg0: i32, %arg1: i32, %arg2: i32, %arg3: memref<256x32xbf16, #tpu.memory_space<vmem>>, %arg4: memref<32x128xbf16, #tpu.memory_space<vmem>>, %arg5: memref<1x128xf32, #tpu.memory_space<vmem>>, %arg6: memref<256x128xbf16, #tpu.memory_space<vmem>>, %arg7: memref<256x128xf32, #tpu.memory_space<vmem>>) attributes {dimension_semantics = [#tpu.dimension_semantics<parallel>, #tpu.dimension_semantics<parallel>, #tpu.dimension_semantics<arbitrary>], iteration_bounds = array<i64: 2, 1, 1>, scalar_prefetch = 0 : i64, scratch_operands = 1 : i64, tpu.core_type = #tpu.core_type<tc>, window_params = [{transform_indices = @transform_0, window_bounds = array<i64: 256, 32>}, {transform_indices = @transform_1, window_bounds = array<i64: 32, 128>}, {transform_indices = @transform_2, window_bounds = array<i64: 1, 128>}, {transform_indices = @transform_3, window_bounds = array<i64: 256, 128>}]} {
    %c0_i32 = arith.constant 0 : i32
    %0 = arith.cmpi eq, %arg2, %c0_i32 : i32
    %1 = arith.extui %0 : i1 to i32
    %c0_i32_0 = arith.constant 0 : i32
    %2 = arith.cmpi ne, %1, %c0_i32_0 : i32
    scf.if %2 {
      %cst_10 = arith.constant 0.000000e+00 : f32
      %12 = vector.broadcast %cst_10 : f32 to vector<256x128xf32>
      %c0_11 = arith.constant 0 : index
      %c0_12 = arith.constant 0 : index
      %13 = vector.load %arg7[%c0_11, %c0_12] : memref<256x128xf32, #tpu.memory_space<vmem>>, vector<256x128xf32>
      tpu.vector_store %arg7[%c0_11, %c0_12], %12 {strides = array<i32>} : memref<256x128xf32, #tpu.memory_space<vmem>>, vector<256x128xf32>,
    } else {
    }
    %c0 = arith.constant 0 : index
    %c0_1 = arith.constant 0 : index
    %3 = vector.load %arg7[%c0, %c0_1] : memref<256x128xf32, #tpu.memory_space<vmem>>, vector<256x128xf32>
    %c0_2 = arith.constant 0 : index
    %c0_3 = arith.constant 0 : index
    %4 = vector.load %arg3[%c0_2, %c0_3] : memref<256x32xbf16, #tpu.memory_space<vmem>>, vector<256x32xbf16>
    %c0_4 = arith.constant 0 : index
    %c0_5 = arith.constant 0 : index
    %5 = vector.load %arg4[%c0_4, %c0_5] : memref<32x128xbf16, #tpu.memory_space<vmem>>, vector<32x128xbf16>
    %cst = arith.constant dense<0.000000e+00> : vector<256x128xf32>
    %6 = tpu.matmul %4, %5, %cst {dimension_numbers = #tpu.dot_dimension_numbers<[1], [0], [0], [1], [0, 0, 1, 1], [], []>} : vector<256x32xbf16>, vector<32x128xbf16>, vector<256x128xf32> -> vector<256x128xf32>
    %7 = arith.addf %3, %6 : vector<256x128xf32>
    %c0_6 = arith.constant 0 : index
    %c0_7 = arith.constant 0 : index
    %8 = vector.load %arg7[%c0_6, %c0_7] : memref<256x128xf32, #tpu.memory_space<vmem>>, vector<256x128xf32>
    tpu.vector_store %arg7[%c0_6, %c0_7], %7 {strides = array<i32>} : memref<256x128xf32, #tpu.memory_space<vmem>>, vector<256x128xf32>,
    %c0_i32_8 = arith.constant 0 : i32
    %9 = arith.cmpi eq, %arg2, %c0_i32_8 : i32
    %10 = arith.extui %9 : i1 to i32
    %c0_i32_9 = arith.constant 0 : i32
    %11 = arith.cmpi ne, %10, %c0_i32_9 : i32
    scf.if %11 {
      %c0_10 = arith.constant 0 : index
      %c0_11 = arith.constant 0 : index
      %12 = vector.load %arg7[%c0_10, %c0_11] : memref<256x128xf32, #tpu.memory_space<vmem>>, vector<256x128xf32>
      %c0_12 = arith.constant 0 : index
      %c0_13 = arith.constant 0 : index
      %13 = vector.load %arg5[%c0_12, %c0_13] : memref<1x128xf32, #tpu.memory_space<vmem>>, vector<1x128xf32>
      %14 = vector.broadcast %13 : vector<1x128xf32> to vector<256x128xf32>
      %15 = arith.addf %12, %14 : vector<256x128xf32>
      %16 = arith.truncf %15 : vector<256x128xf32> to vector<256x128xbf16>
      %c0_14 = arith.constant 0 : index
      %c0_15 = arith.constant 0 : index
      %17 = vector.load %arg6[%c0_14, %c0_15] : memref<256x128xbf16, #tpu.memory_space<vmem>>, vector<256x128xbf16>
      tpu.vector_store %arg6[%c0_14, %c0_15], %16 {strides = array<i32>} : memref<256x128xbf16, #tpu.memory_space<vmem>>, vector<256x128xbf16>,
    } else {
    }
    return
  }
  func.func @transform_0(%arg0: i32, %arg1: i32, %arg2: i32) -> (i32, i32) {
    %c0_i32 = arith.constant 0 : i32
    return %arg0, %arg2 : i32, i32
  }
  func.func @transform_1(%arg0: i32, %arg1: i32, %arg2: i32) -> (i32, i32) {
    %c0_i32 = arith.constant 0 : i32
    return %arg2, %arg1 : i32, i32
  }
  func.func @transform_2(%arg0: i32, %arg1: i32, %arg2: i32) -> (i32, i32) {
    %c0_i32 = arith.constant 0 : i32
    %c0_i32_0 = arith.constant 0 : i32
    return %c0_i32, %arg1 : i32, i32
  }
  func.func @transform_3(%arg0: i32, %arg1: i32, %arg2: i32) -> (i32, i32) {
    %c0_i32 = arith.constant 0 : i32
    return %arg0, %arg1 : i32, i32
  }
}

module attributes {stable_mosaic.version = 11 : i64} {
  func.func @_pw1_kernel(%arg0: i32, %arg1: i32, %arg2: memref<1x256x128xbf16, #tpu.memory_space<vmem>>, %arg3: memref<1x1x128xf32, #tpu.memory_space<vmem>>, %arg4: memref<128x128xbf16, #tpu.memory_space<vmem>>, %arg5: memref<1x128xf32, #tpu.memory_space<vmem>>, %arg6: memref<1x256x128xbf16, #tpu.memory_space<vmem>>, %arg7: memref<1x256x128xf32, #tpu.memory_space<vmem>>) attributes {dimension_semantics = [#tpu.dimension_semantics<parallel>, #tpu.dimension_semantics<parallel>], iteration_bounds = array<i64: 2, 1>, scalar_prefetch = 0 : i64, scratch_operands = 0 : i64, tpu.core_type = #tpu.core_type<tc>, window_params = [{transform_indices = @transform_0, window_bounds = array<i64: 1, 256, 128>}, {transform_indices = @transform_1, window_bounds = array<i64: 1, 1, 128>}, {pipeline_mode = #tpu.pipeline_mode<synchronous>, transform_indices = @transform_2, window_bounds = array<i64: 128, 128>}, {pipeline_mode = #tpu.pipeline_mode<synchronous>, transform_indices = @transform_3, window_bounds = array<i64: 1, 128>}, {transform_indices = @transform_4, window_bounds = array<i64: 1, 256, 128>}, {transform_indices = @transform_5, window_bounds = array<i64: 1, 256, 128>}]} {
    %c0 = arith.constant 0 : index
    %c0_0 = arith.constant 0 : index
    %c0_1 = arith.constant 0 : index
    %0 = vector.load %arg2[%c0, %c0_0, %c0_1] : memref<1x256x128xbf16, #tpu.memory_space<vmem>>, vector<1x256x128xbf16>
    %1 = vector.shape_cast %0 : vector<1x256x128xbf16> to vector<256x128xbf16>
    %2 = arith.extf %1 : vector<256x128xbf16> to vector<256x128xf32>
    %c0_2 = arith.constant 0 : index
    %c0_3 = arith.constant 0 : index
    %c0_4 = arith.constant 0 : index
    %3 = vector.load %arg3[%c0_2, %c0_3, %c0_4] : memref<1x1x128xf32, #tpu.memory_space<vmem>>, vector<1x1x128xf32>
    %4 = vector.shape_cast %3 : vector<1x1x128xf32> to vector<1x128xf32>
    %5 = vector.broadcast %4 : vector<1x128xf32> to vector<256x128xf32>
    %6 = arith.mulf %2, %5 : vector<256x128xf32>
    %7 = arith.truncf %6 : vector<256x128xf32> to vector<256x128xbf16>
    %c0_5 = arith.constant 0 : index
    %c0_6 = arith.constant 0 : index
    %8 = vector.load %arg4[%c0_5, %c0_6] : memref<128x128xbf16, #tpu.memory_space<vmem>>, vector<128x128xbf16>
    %cst = arith.constant dense<0.000000e+00> : vector<256x128xf32>
    %9 = tpu.matmul %7, %8, %cst {dimension_numbers = #tpu.dot_dimension_numbers<[1], [0], [0], [1], [0, 0, 1, 1], [], []>} : vector<256x128xbf16>, vector<128x128xbf16>, vector<256x128xf32> -> vector<256x128xf32>
    %c0_7 = arith.constant 0 : index
    %c0_8 = arith.constant 0 : index
    %10 = vector.load %arg5[%c0_7, %c0_8] : memref<1x128xf32, #tpu.memory_space<vmem>>, vector<1x128xf32>
    %11 = vector.broadcast %10 : vector<1x128xf32> to vector<256x128xf32>
    %12 = arith.addf %9, %11 : vector<256x128xf32>
    %c0_9 = arith.constant 0 : index
    %c0_10 = arith.constant 0 : index
    %c0_11 = arith.constant 0 : index
    %13 = vector.load %arg6[%c0_9, %c0_10, %c0_11] : memref<1x256x128xbf16, #tpu.memory_space<vmem>>, vector<1x256x128xbf16>
    %14 = vector.shape_cast %13 : vector<1x256x128xbf16> to vector<256x128xbf16>
    %15 = arith.extf %14 : vector<256x128xbf16> to vector<256x128xf32>
    %16 = arith.addf %12, %15 : vector<256x128xf32>
    %c0_12 = arith.constant 0 : index
    %c0_13 = arith.constant 0 : index
    %c0_14 = arith.constant 0 : index
    %17 = vector.load %arg7[%c0_12, %c0_13, %c0_14] : memref<1x256x128xf32, #tpu.memory_space<vmem>>, vector<1x256x128xf32>
    %18 = vector.shape_cast %17 : vector<1x256x128xf32> to vector<256x128xf32>
    %19 = vector.shape_cast %16 : vector<256x128xf32> to vector<1x256x128xf32>
    tpu.vector_store %arg7[%c0_12, %c0_13, %c0_14], %19 {strides = array<i32>} : memref<1x256x128xf32, #tpu.memory_space<vmem>>, vector<1x256x128xf32>,
    return
  }
  func.func @transform_0(%arg0: i32, %arg1: i32) -> (i32, i32, i32) {
    %c0_i32 = arith.constant 0 : i32
    %c0_i32_0 = arith.constant 0 : i32
    return %arg0, %arg1, %c0_i32 : i32, i32, i32
  }
  func.func @transform_1(%arg0: i32, %arg1: i32) -> (i32, i32, i32) {
    %c0_i32 = arith.constant 0 : i32
    %c0_i32_0 = arith.constant 0 : i32
    %c0_i32_1 = arith.constant 0 : i32
    return %arg0, %c0_i32, %c0_i32_0 : i32, i32, i32
  }
  func.func @transform_2(%arg0: i32, %arg1: i32) -> (i32, i32) {
    %c0_i32 = arith.constant 0 : i32
    %c0_i32_0 = arith.constant 0 : i32
    %c0_i32_1 = arith.constant 0 : i32
    return %c0_i32, %c0_i32_0 : i32, i32
  }
  func.func @transform_3(%arg0: i32, %arg1: i32) -> (i32, i32) {
    %c0_i32 = arith.constant 0 : i32
    %c0_i32_0 = arith.constant 0 : i32
    %c0_i32_1 = arith.constant 0 : i32
    return %c0_i32, %c0_i32_0 : i32, i32
  }
  func.func @transform_4(%arg0: i32, %arg1: i32) -> (i32, i32, i32) {
    %c0_i32 = arith.constant 0 : i32
    %c0_i32_0 = arith.constant 0 : i32
    return %arg0, %arg1, %c0_i32 : i32, i32, i32
  }
  func.func @transform_5(%arg0: i32, %arg1: i32) -> (i32, i32, i32) {
    %c0_i32 = arith.constant 0 : i32
    %c0_i32_0 = arith.constant 0 : i32
    return %arg0, %arg1, %c0_i32 : i32, i32, i32
  }
}

</mosaic_0001>

<bundles_post_ra>
// kernel: mbconv_forward.6
= control target key start
LH: loop header
LB: loop body
LE: loop exit
PB: predicated region body
PF: predicated region fallthrough
CT: control target
= control target key end

     0   :  { %v356_v0 = vmov 0.0   ;;  %vm357_vm0 = vmmov 0   ;;  %s448_s1 = inlined_call_operand.vmem [shape: bf16[128,128], index: 1, kind: input, shape index: {}]   ;;  %s449_s3 = inlined_call_operand.vmem [shape: bf16[128,128], index: 3, kind: input, shape index: {}]   ;;  %s450_s0 = inlined_call_operand.vmem [shape: f32[8,128], index: 0, kind: input, shape index: {}]   ;;  %s451_s2 = inlined_call_operand.vmem [shape: f32[1,128], index: 2, kind: input, shape index: {}]   ;;  %s452_s4 = inlined_call_operand.vmem [shape: f32[1,128], index: 4, kind: input, shape index: {}]   ;;  %s453_s5 = inlined_call_operand.vmem [shape: f32[8,128], index: 5, kind: output, shape index: {}]  }
   0x1   :  { %294 = vmatprep.subr.bf16.mxu0 %v356_v0  ;;  %v336_v1 = vld [vmem:[%s448_s1] sm:$0xff]   ;;  %310 = vmatprep.mubr.msk.bf16.mxu0 %vm357_vm0, %v356_v0  ;;  %v337_v2 = vld [vmem:[%s448_s1 + $0x8] sm:$0xff]   ;;  %v338_v3 = vld [vmem:[%s448_s1 + $0x10] sm:$0xff]  }
   0x2   :  { %314 = vmatprep.subr.bf16.mxu1 %v356_v0  ;;  %330 = vmatprep.mubr.msk.bf16.mxu1 %vm357_vm0, %v356_v0  ;;  %v344_v4 = vld [vmem:[%s449_s3] sm:$0xff]   ;;  %v339_v5 = vld [vmem:[%s448_s1 + $0x18] sm:$0xff]   ;;  %v345_v6 = vld [vmem:[%s449_s3 + $0x8] sm:$0xff]  }
   0x3   :  { %295 = vmatpush3.bf16.msra.mxu0 %v336_v1  ;;  %315 = vmatpush3.bf16.msra.mxu1 %v344_v4  ;;  %v340_v7 = vld [vmem:[%s448_s1 + $0x20] sm:$0xff]   ;;  %v346_v8 = vld [vmem:[%s449_s3 + $0x10] sm:$0xff]   ;;  %v341_v9 = vld [vmem:[%s448_s1 + $0x28] sm:$0xff]  }
   0x4   :  { %296 = vmatprep.subr.bf16.mxu0 %v356_v0  ;;  %316 = vmatprep.subr.bf16.mxu1 %v356_v0  ;;  %v347_v10 = vld [vmem:[%s449_s3 + $0x18] sm:$0xff]   ;;  %v342_v11 = vld [vmem:[%s448_s1 + $0x30] sm:$0xff]   ;;  %v348_v12 = vld [vmem:[%s449_s3 + $0x20] sm:$0xff]  }
   0x5   :  { %v343_v13 = vld [vmem:[%s448_s1 + $0x38] sm:$0xff]   ;;  %v21_v14 = vld [vmem:[%s450_s0] sm:$0xff]  ;;  %v349_v15 = vld [vmem:[%s449_s3 + $0x28] sm:$0xff]  }
   0x6   :  { %v22_v16 = vpack.c.bf16 %v21_v14, %v21_v14  ;;  %v350_v17 = vld [vmem:[%s449_s3 + $0x30] sm:$0xff]   ;;  %v351_v18 = vld [vmem:[%s449_s3 + $0x38] sm:$0xff]   ;;  %v258_v19 = vld [vmem:[%s451_s2] ss:$0 sm:$0xff] }
   0x7   :  { %297 = vmatpush3.bf16.msra.mxu0 %v337_v2  ;;  %317 = vmatpush3.bf16.msra.mxu1 %v345_v6  ;;  %v267_v28 = vld [vmem:[%s452_s4] ss:$0 sm:$0xff] }
   0x8   :  { %298 = vmatprep.subr.bf16.mxu0 %v356_v0  ;;  %318 = vmatprep.subr.bf16.mxu1 %v356_v0 }
   0xb   :  { %299 = vmatpush3.bf16.msra.mxu0 %v338_v3  ;;  %319 = vmatpush3.bf16.msra.mxu1 %v346_v8 }
   0xc   :  { %300 = vmatprep.subr.bf16.mxu0 %v356_v0  ;;  %320 = vmatprep.subr.bf16.mxu1 %v356_v0 }
   0xf   :  { %301 = vmatpush3.bf16.msra.mxu0 %v339_v5  ;;  %321 = vmatpush3.bf16.msra.mxu1 %v347_v10 }
  0x10   :  { %302 = vmatprep.subr.bf16.mxu0 %v356_v0  ;;  %322 = vmatprep.subr.bf16.mxu1 %v356_v0 }
  0x13   :  { %303 = vmatpush3.bf16.msra.mxu0 %v340_v7  ;;  %323 = vmatpush3.bf16.msra.mxu1 %v348_v12 }
  0x14   :  { %304 = vmatprep.subr.bf16.mxu0 %v356_v0  ;;  %324 = vmatprep.subr.bf16.mxu1 %v356_v0 }
  0x17   :  { %305 = vmatpush3.bf16.msra.mxu0 %v341_v9  ;;  %325 = vmatpush3.bf16.msra.mxu1 %v349_v15 }
  0x18   :  { %306 = vmatprep.subr.bf16.mxu0 %v356_v0  ;;  %326 = vmatprep.subr.bf16.mxu1 %v356_v0 }
  0x1b   :  { %307 = vmatpush3.bf16.msra.mxu0 %v342_v11  ;;  %327 = vmatpush3.bf16.msra.mxu1 %v350_v17 }
  0x1c   :  { %308 = vmatprep.subr.bf16.mxu0 %v356_v0  ;;  %328 = vmatprep.subr.bf16.mxu1 %v356_v0 }
  0x1f   :  { %309 = vmatpush3.bf16.msra.mxu0 %v343_v13  ;;  %329 = vmatpush3.bf16.msra.mxu1 %v351_v18 }
  0x22   :  { %311 = vmatmul.mubr.bf16.vlgmr.msra.gmra.mrb[0].mxu0 %v22_v16 }
  0xf5   :  { %v128_v20 = vpop.f32.mrb[0].mxu0 }
  0xf6   :  { %v129_v21 = vadd.f32 %v258_v19, %v128_v20  ;;  %v312_v22 = vpop.f32.mrb[1].mxu0 }
  0xf7   :  { %v131_v23 = vpop.f32.mrb[2].mxu0 }
  0xf8   :  { %v134_v24 = vmax.f32 %v129_v21, 0.0  ;;  %v313_v25 = vpop.f32.mrb[3].mxu0 }
  0xfa   :  { %v135_v26 = vmin.f32 %v134_v24, 6.0 }
  0xfc   :  { %v136_v27 = vpack.c.bf16 %v135_v26, %v135_v26 }
  0xfe   :  { %331 = vmatmul.mubr.bf16.vlgmr.msra.gmra.mrb[0].mxu1 %v136_v27 }
 0x1d1   :  { %v242_v29 = vpop.f32.mrb[0].mxu1 }
 0x1d2   :  { %v243_v30 = vadd.f32 %v267_v28, %v242_v29  ;;  %v332_v31 = vpop.f32.mrb[1].mxu1 }
 0x1d3   :  { %v245_v32 = vpop.f32.mrb[2].mxu1 }
 0x1d4   :  { %v248_v33 = vsub.f32 0.0, %v243_v30  ;;  %v333_v34 = vpop.f32.mrb[3].mxu1 }
 0x1d6   :  { %v249_v35 = vmul.f32 1.442695, %v248_v33 }
 0x1d8   :  { %352 = vpow2.f32 %v249_v35 }
 0x1e2   :  { %v353_v36 = vpop.eup %352 }
 0x1e3   :  { %v251_v37 = vadd.f32 1.0, %v353_v36 }
 0x1e5   :  { %354 = vrcp.f32 %v251_v37 }
 0x1ef   :  { %v355_v38 = vpop.eup %354 }
 0x1f0   :  { %253 = vst [vmem:[%s453_s5] sm:$0xff] %v355_v38 }

// kernel: mbconv_forward.7
= control target key start
LH: loop header
LB: loop body
LE: loop exit
PB: predicated region body
PF: predicated region fallthrough
CT: control target
= control target key end

     0   :  { %10 = vsyncpa [#allocation3], 0  ;;  %s1660_s0 = inlined_call_operand.vmem [shape: bf16[2,256,128], index: 0, kind: input, shape index: {}]   ;;  %s1661_s1 = inlined_call_operand.vmem [shape: f32[2,1,128], index: 1, kind: input, shape index: {}]   ;;  %s1662_s2 = inlined_call_operand.vmem [shape: bf16[128,128], index: 2, kind: input, shape index: {}]   ;;  %s1663_s3 = inlined_call_operand.vmem [shape: f32[1,128], index: 3, kind: input, shape index: {}]   ;;  %s1664_s4 = inlined_call_operand.vmem [shape: bf16[2,256,128], index: 4, kind: input, shape index: {}]   ;;  %s1665_s5 = inlined_call_operand.hbm [shape: f32[2,256,128], index: 5, kind: output, shape index: {}]  }
   0x1   :  { %12 = vsyncpa [#allocation3 + $0x1], 0  ;;  %s1358_s18 = smov 0   ;;  %s1360_s19 = smov 0  }
   0x2   :  { %s1362_s20 = smov 0   ;;  %s1364_s21 = smov 0  }
   0x3   :  { %s1366_s22 = smov 0   ;;  %s1368_s23 = smov 0  }
   0x4 LB: > { %s906_s24 = sadd.s32 4294967295, %s1323_s23   ;;  %s907_s25 = sadd.s32 4294967294, %s1323_s23   ;;  %s1323_s23 = sphi %s1368_s23, %s18_s23   ;;  %s1319_s22 = sphi %s1366_s22, %s1672_s22   ;;  %s1315_s21 = sphi %s1364_s21, %s1671_s21   ;;  %s1311_s20 = sphi %s1362_s20, %s1670_s20   ;;  %s1307_s19 = sphi %s1360_s19, %s1669_s19   ;;  %s1303_s18 = sphi %s1358_s18, %s1668_s18  }
   0x5   : > { %s30_s26 = sadd.s32 1, %s1319_s22  ;;  %s163_s27 = sadd.s32 1, %s1311_s20 }
   0x6   : > { %p32_p0 = scmp.ge.s32.totalorder %s30_s26, 2  ;;  %p173_p1 = scmp.ne.s32.totalorder %s1311_s20, %s1307_s19 }
   0x7   : > { %p174_p2 = scmp.eq.s32.totalorder %s906_s24, 1  ;;  %p179_p3 = scmp.ne.s32.totalorder %s1307_s19, %s1303_s18 }
   0x8   : > { %s1674_s26 = smov (%p32_p0, %s30_s26), 0  ;;  %p180_p5 = scmp.eq.s32.totalorder %s907_s25, 1 }
   0x9   : > { %p1398_p4 = por %p174_p2, %p173_p1  ;;  %s158_s29 = ssub.s32 %s1319_s22, %s1674_s26 }
   0xa   : > { %p910_p6 = scmp.ge.s32.totalorder %s1323_s23, 1  ;;  %p161_p7 = scmp.eq.s32.totalorder %s158_s29, 0 }
   0xb   : > { %p1405_p8 = por %p180_p5, %p179_p3  ;;  %p236_p9 = scmp.lt.s32.totalorder %s1323_s23, 3 }
   0xc   : > { %s1411_s6 = scalar_select %p161_p7, %s1311_s20, %s163_s27  }
   0xd   : > { %p237_p10 = pnand %p910_p6, %p236_p9 }
   0xe   : > { %v1237_v0 = vld [vmem:[%s1662_s2] sm:$0xff] (!%p237_p10)   ;;  %p281_p11 = scmp.lt.s32.totalorder (!%p237_p10), %s1315_s21, 1  ;;  %v1238_v1 = vld [vmem:[%s1662_s2 + $0x8] sm:$0xff] (!%p237_p10)   ;;  %v1239_v2 = vld [vmem:[%s1662_s2 + $0x10] sm:$0xff] (!%p237_p10)   ;;  %s277_s29 = sand.u32 (!%p237_p10), 1, %s1307_s19  }
   0xf   : > { %240 = sbr.rel (%p237_p10) target bundleno = 305 (0x131), region = 40  ;;  %1116 = vmatprep.subr.bf16.mxu0 (!%p237_p10), %v1237_v0  ;;  %1164 = vmatprep.subr.bf16.mxu1 (!%p237_p10), %v1237_v0  ;;  %v1240_v3 = vld [vmem:[%s1662_s2 + $0x18] sm:$0xff] (!%p237_p10)   ;;  %v1241_v14 = vld [vmem:[%s1662_s2 + $0x20] sm:$0xff] (!%p237_p10)   ;;  %v1242_v18 = vld [vmem:[%s1662_s2 + $0x28] sm:$0xff] (!%p237_p10)   ;;  %s933_s9 = sshll.u32 (!%p237_p10), %s1315_s21, 12 }
  0x10   : > { %1117 = vmatpush3.bf16.msra.mxu0 (!%p237_p10), %v1237_v0  ;;  %1172 = vmatpush3.bf16.msra.mxu1 (!%p237_p10), %v1237_v0  ;;  %v1243_v22 = vld [vmem:[%s1662_s2 + $0x30] sm:$0xff] (!%p237_p10)   ;;  %v1244_v32 = vld [vmem:[%s1662_s2 + $0x38] sm:$0xff] (!%p237_p10)   ;;  %s1602_s13 = scalar_lea.hbm (!%p237_p10), %s1665_s5, %s933_s9  ;;  %s1614_s15 = scalar_lea.sflag (!%p237_p10), [#allocation3], %s277_s29 }
  0x11   : > { %1118 = vmatprep.subr.bf16.mxu0 (!%p237_p10), %v1238_v1  ;;  %1165 = vmatprep.subr.bf16.mxu1 (!%p237_p10), %v1238_v1  ;;  %s1325_s24 = smov (!%p237_p10), [#allocation2]  }
  0x14   : > { %1119 = vmatpush3.bf16.msra.mxu0 (!%p237_p10), %v1238_v1  ;;  %1173 = vmatpush3.bf16.msra.mxu1 (!%p237_p10), %v1238_v1 }
  0x15   : > { %1120 = vmatprep.subr.bf16.mxu0 (!%p237_p10), %v1239_v2  ;;  %1166 = vmatprep.subr.bf16.mxu1 (!%p237_p10), %v1239_v2 }
  0x16   : > { %s1421_s11 = scalar_select %p281_p11, %s1315_s21, 1 }
  0x18   : > { %s931_s14 = sshll.u32 %s1421_s11, 7  ;;  %s292_s27 = scalar_lea.vmem %s1661_s1, %s1421_s11  ;;  %1121 = vmatpush3.bf16.msra.mxu0 %v1239_v2  ;;  %1174 = vmatpush3.bf16.msra.mxu1 %v1239_v2 }
  0x19   : > { %s1432_s17 = scalar_lea.vmem %s1660_s0, %s931_s14  ;;  %v1442_v5 = vld [vmem:[%s292_s27] ss:$0 sm:$0xff]  ;;  %1122 = vmatprep.subr.bf16.mxu0 %v1240_v3  ;;  %1167 = vmatprep.subr.bf16.mxu1 %v1240_v3  ;;  %s1508_s27 = scalar_lea.vmem %s1664_s4, %s931_s14 }
  0x1a   : > { %v935_v4 = vld [vmem:[%s1432_s17] sm:$0xff]   ;;  %v1062_v19 = vld [vmem:[%s1432_s17 + $0x8] sm:$0xff]   ;;  %v1063_v21 = vld [vmem:[%s1432_s17 + $0x10] sm:$0xff]   ;;  %s1522_s11 = sshll.u32 %s277_s29, 8 }
  0x1b   : > { %v1069_v6 = vld [vmem:[%s1432_s17 + $0x40] sm:$0xff]   ;;  %v936_v7 = vunpack.c.l.bf16 %v935_v4  ;;  %v937_v8 = vunpack.c.h.bf16 %v935_v4  ;;  %v1070_v20 = vld [vmem:[%s1432_s17 + $0x48] sm:$0xff]   ;;  %v1071_v23 = vld [vmem:[%s1432_s17 + $0x50] sm:$0xff]   ;;  %v940_v24 = vunpack.c.l.bf16 %v1062_v19  ;;  %v941_v25 = vunpack.c.h.bf16 %v1062_v19  ;;  %s1535_s14 = scalar_lea.vmem [#allocation2], %s1522_s11 }
  0x1c   : > { %v968_v9 = vunpack.c.l.bf16 %v1069_v6  ;;  %v969_v10 = vunpack.c.h.bf16 %v1069_v6  ;;  %1123 = vmatpush3.bf16.msra.mxu0 %v1240_v3  ;;  %1175 = vmatpush3.bf16.msra.mxu1 %v1240_v3  ;;  %v972_v26 = vunpack.c.l.bf16 %v1070_v20  ;;  %v973_v27 = vunpack.c.h.bf16 %v1070_v20  ;;  %v1064_v38 = vld [vmem:[%s1432_s17 + $0x18] sm:$0xff]   ;;  %v1065_v43 = vld [vmem:[%s1432_s17 + $0x20] sm:$0xff]   ;;  %v1066_v63 = vld [vmem:[%s1432_s17 + $0x28] sm:$0xff]   ;;  %s800_s10 = sshll.u32 %s1535_s14, 4  ;;  %s1604_s10 = int_to_ptr.vmem [resolvable:$true] %s800_s10 }
  0x1d   : > { %v376_v11 = vmul.f32 %v936_v7, %v1442_v5  ;;  %v377_v12 = vmul.f32 %v937_v8, %v1442_v5  ;;  %1124 = vmatprep.subr.bf16.mxu0 %v1241_v14  ;;  %1168 = vmatprep.subr.bf16.mxu1 %v1241_v14  ;;  %v944_v28 = vunpack.c.l.bf16 %v1063_v21  ;;  %v945_v29 = vunpack.c.h.bf16 %v1063_v21  ;;  %v1072_v39 = vld [vmem:[%s1432_s17 + $0x58] sm:$0xff]   ;;  %v1073_v44 = vld [vmem:[%s1432_s17 + $0x60] sm:$0xff]   ;;  %v1074_v2 = vld [vmem:[%s1432_s17 + $0x68] sm:$0xff]   ;;  %s1245_s16 = scalar_lea.vmem %s1604_s10, 4096 }
  0x1e   : > { %v392_v13 = vmul.f32 %v968_v9, %v1442_v5  ;;  %v393_v15 = vmul.f32 %v969_v10, %v1442_v5  ;;  %v976_v30 = vunpack.c.l.bf16 %v1071_v23  ;;  %v977_v31 = vunpack.c.h.bf16 %v1071_v23  ;;  %v1067_v3 = vld [vmem:[%s1432_s17 + $0x30] sm:$0xff]   ;;  %v1068_v23 = vld [vmem:[%s1432_s17 + $0x38] sm:$0xff]   ;;  %p1246_p12 = scmp.ne.s32.totalorder %s1604_s10, %s1245_s16 }
  0x1f   : > { %v408_v16 = vpack.c.bf16 %v377_v12, %v376_v11  ;;  %v378_v33 = vmul.f32 %v940_v24, %v1442_v5  ;;  %v379_v34 = vmul.f32 %v941_v25, %v1442_v5  ;;  %v394_v35 = vmul.f32 %v972_v26, %v1442_v5  ;;  %v1075_v4 = vld [vmem:[%s1432_s17 + $0x70] sm:$0xff]  }
  0x20   : > { %v416_v17 = vpack.c.bf16 %v393_v15, %v392_v13  ;;  %1125 = vmatpush3.bf16.msra.mxu0 %v1241_v14  ;;  %1176 = vmatpush3.bf16.msra.mxu1 %v1241_v14  ;;  %v395_v36 = vmul.f32 %v973_v27, %v1442_v5  ;;  %v380_v37 = vmul.f32 %v944_v28, %v1442_v5  ;;  %v948_v45 = vunpack.c.l.bf16 %v1064_v38  ;;  %v1076_v27 = vld [vmem:[%s1432_s17 + $0x78] sm:$0xff]   ;;  %p1247_p13 = pnand %p1246_p12, %p1398_p4  ;;  %s1249_s17 = sshll.u32 %s1325_s24, 4  ;;  %s1250_s17 = int_to_ptr.vmem [resolvable:$false] %s1249_s17 }
  0x21   : > { %1132 = vmatprep.mubr.bf16.mxu0 %v408_v16  ;;  %1126 = vmatprep.subr.bf16.mxu0 %v1242_v18  ;;  %v381_v40 = vmul.f32 %v945_v29, %v1442_v5  ;;  %v396_v41 = vmul.f32 %v976_v30, %v1442_v5  ;;  %v397_v42 = vmul.f32 %v977_v31, %v1442_v5  ;;  %v949_v46 = vunpack.c.h.bf16 %v1064_v38  ;;  %s1251_s25 = scalar_lea.vmem %s1250_s17, 8192  ;;  %p1252_p1 = scmp.lt.s32.totalorder %s1604_s10, %s1250_s17 }
  0x22   : > { %1148 = vmatprep.mubr.bf16.mxu1 %v416_v17  ;;  %1169 = vmatprep.subr.bf16.mxu1 %v1242_v18  ;;  %v980_v47 = vunpack.c.l.bf16 %v1072_v39  ;;  %v981_v48 = vunpack.c.h.bf16 %v1072_v39  ;;  %v409_v49 = vpack.c.bf16 %v379_v34, %v378_v33  ;;  %v417_v50 = vpack.c.bf16 %v395_v36, %v394_v35  ;;  %p1248_p0 = pneg %p1247_p13  ;;  %p1253_p2 = scmp.lt.s32.totalorder %s1251_s25, %s1245_s16 }
  0x23   : > { %v952_v51 = vunpack.c.l.bf16 %v1065_v43  ;;  %v953_v52 = vunpack.c.h.bf16 %v1065_v43  ;;  %v410_v53 = vpack.c.bf16 %v381_v40, %v380_v37  ;;  %v418_v54 = vpack.c.bf16 %v397_v42, %v396_v41  ;;  %v1077_v42 = vld [vmem:[%s1508_s27 + $0x8] sm:$0xff]  }
  0x24   : > { %1127 = vmatpush3.bf16.msra.mxu0 %v1242_v18  ;;  %1177 = vmatpush3.bf16.msra.mxu1 %v1242_v18  ;;  %v984_v55 = vunpack.c.l.bf16 %v1073_v44  ;;  %v985_v56 = vunpack.c.h.bf16 %v1073_v44  ;;  %v382_v57 = vmul.f32 %v948_v45, %v1442_v5  ;;  %v383_v58 = vmul.f32 %v949_v46, %v1442_v5  ;;  %v1085_v43 = vld [vmem:[%s1508_s27 + $0x48] sm:$0xff]   ;;  %v1084_v44 = vld [vmem:[%s1508_s27 + $0x40] sm:$0xff]   ;;  %p1254_p3 = por %p1253_p2, %p1252_p1 }
  0x25   : > { %1128 = vmatprep.subr.bf16.mxu0 %v1243_v22  ;;  %1170 = vmatprep.subr.bf16.mxu1 %v1243_v22  ;;  %v398_v59 = vmul.f32 %v980_v47, %v1442_v5  ;;  %v399_v60 = vmul.f32 %v981_v48, %v1442_v5  ;;  %v384_v61 = vmul.f32 %v952_v51, %v1442_v5  ;;  %v956_v8 = vunpack.c.l.bf16 %v1066_v63  ;;  %v1518_v45 = vld [vmem:[%s1663_s3] ss:$0 sm:$0xff] }
  0x26   : > { %v385_v62 = vmul.f32 %v953_v52, %v1442_v5  ;;  %v400_v0 = vmul.f32 %v984_v55, %v1442_v5  ;;  %v401_v1 = vmul.f32 %v985_v56, %v1442_v5  ;;  %v411_v6 = vpack.c.bf16 %v383_v58, %v382_v57  ;;  %p1255_p5 = pnand %p1254_p3, %p1248_p0 }
  0x27   : > { %v419_v7 = vpack.c.bf16 %v399_v60, %v398_v59  ;;  %v957_v9 = vunpack.c.h.bf16 %v1066_v63  ;;  %v988_v11 = vunpack.c.l.bf16 %v1074_v2  ;;  %v989_v12 = vunpack.c.h.bf16 %v1074_v2 }
  0x28   : > { %1129 = vmatpush3.bf16.msra.mxu0 %v1243_v22  ;;  %1178 = vmatpush3.bf16.msra.mxu1 %v1243_v22  ;;  %v412_v10 = vpack.c.bf16 %v385_v62, %v384_v61  ;;  %v960_v13 = vunpack.c.l.bf16 %v1067_v3  ;;  %v420_v14 = vpack.c.bf16 %v401_v1, %v400_v0  ;;  %v961_v15 = vunpack.c.h.bf16 %v1067_v3 }
  0x29   : > { %1130 = vmatprep.subr.bf16.mxu0 %v1244_v32  ;;  %1171 = vmatprep.subr.bf16.mxu1 %v1244_v32  ;;  %v992_v16 = vunpack.c.l.bf16 %v1075_v4  ;;  %v993_v17 = vunpack.c.h.bf16 %v1075_v4  ;;  %v386_v18 = vmul.f32 %v956_v8, %v1442_v5  ;;  %v387_v19 = vmul.f32 %v957_v9, %v1442_v5 }
  0x2a   : > { %v402_v20 = vmul.f32 %v988_v11, %v1442_v5  ;;  %v403_v21 = vmul.f32 %v989_v12, %v1442_v5  ;;  %v388_v22 = vmul.f32 %v960_v13, %v1442_v5  ;;  %v389_v24 = vmul.f32 %v961_v15, %v1442_v5  ;;  %v1079_v11 = vld [vmem:[%s1508_s27 + $0x18] sm:$0xff]   ;;  %v1078_v15 = vld [vmem:[%s1508_s27 + $0x10] sm:$0xff]  }
  0x2b   : > { %v404_v25 = vmul.f32 %v992_v16, %v1442_v5  ;;  %v405_v26 = vmul.f32 %v993_v17, %v1442_v5  ;;  %v413_v28 = vpack.c.bf16 %v387_v19, %v386_v18  ;;  %v964_v29 = vunpack.c.l.bf16 %v1068_v23  ;;  %v1087_v12 = vld [vmem:[%s1508_s27 + $0x58] sm:$0xff]   ;;  %v1086_v16 = vld [vmem:[%s1508_s27 + $0x50] sm:$0xff]  }
  0x2c   : > { %1131 = vmatpush3.bf16.msra.mxu0 %v1244_v32  ;;  %1179 = vmatpush3.bf16.msra.mxu1 %v1244_v32  ;;  %v421_v30 = vpack.c.bf16 %v403_v21, %v402_v20  ;;  %v965_v31 = vunpack.c.h.bf16 %v1068_v23  ;;  %v996_v32 = vunpack.c.l.bf16 %v1076_v27  ;;  %v997_v33 = vunpack.c.h.bf16 %v1076_v27 }
  0x2d   : > { %v414_v34 = vpack.c.bf16 %v389_v24, %v388_v22  ;;  %v422_v35 = vpack.c.bf16 %v405_v26, %v404_v25  ;;  %v390_v36 = vmul.f32 %v964_v29, %v1442_v5  ;;  %v1004_v46 = vunpack.c.l.bf16 %v1077_v42 }
  0x2e   : > { %v391_v37 = vmul.f32 %v965_v31, %v1442_v5  ;;  %v406_v38 = vmul.f32 %v996_v32, %v1442_v5  ;;  %v407_v39 = vmul.f32 %v997_v33, %v1442_v5  ;;  %v999_v5 = vld [vmem:[%s1508_s27] sm:$0xff]   ;;  %v1036_v47 = vunpack.c.l.bf16 %v1085_v43 }
  0x2f   : > { %1133 = vmatmul.mubr.bf16.vlgmr.msra.gmra.mrb[0].mxu0 %v409_v49  ;;  %1149 = vmatmul.mubr.bf16.vlgmr.msra.gmra.mrb[0].mxu1 %v417_v50  ;;  %v1000_v50 = vunpack.c.l.bf16 %v999_v5  ;;  %v1032_v51 = vunpack.c.l.bf16 %v1084_v44  ;;  %v1005_v56 = vunpack.c.h.bf16 %v1077_v42  ;;  %v1037_v57 = vunpack.c.h.bf16 %v1085_v43 }
  0x30   : > { %1136 = vmatprep.mubr.bf16.mxu0 %v410_v53  ;;  %1152 = vmatprep.mubr.bf16.mxu1 %v418_v54  ;;  %v415_v40 = vpack.c.bf16 %v391_v37, %v390_v36  ;;  %v423_v41 = vpack.c.bf16 %v407_v39, %v406_v38  ;;  %v1001_v62 = vunpack.c.h.bf16 %v999_v5  ;;  %v1033_v63 = vunpack.c.h.bf16 %v1084_v44 }
  0x31   : > { %v1012_v19 = vunpack.c.l.bf16 %v1079_v11  ;;  %v1044_v20 = vunpack.c.l.bf16 %v1087_v12  ;;  %v1008_v23 = vunpack.c.l.bf16 %v1078_v15  ;;  %v1040_v24 = vunpack.c.l.bf16 %v1086_v16 }
  0x32   : > { %v1013_v29 = vunpack.c.h.bf16 %v1079_v11  ;;  %v1041_v36 = vunpack.c.h.bf16 %v1086_v16 }
  0x37   : > { %1137 = vmatmul.mubr.bf16.gmra.mrb[4].mxu0 %v411_v6  ;;  %1153 = vmatmul.mubr.bf16.gmra.mrb[4].mxu1 %v419_v7 }
  0x38   : > { %1140 = vmatprep.mubr.bf16.mxu0 %v412_v10  ;;  %1156 = vmatprep.mubr.bf16.mxu1 %v420_v14 }
  0x3f   : > { %1141 = vmatmul.mubr.bf16.gmra.mrb[8].mxu0 %v413_v28  ;;  %1157 = vmatmul.mubr.bf16.gmra.mrb[8].mxu1 %v421_v30  ;;  %v1045_v30 = vunpack.c.h.bf16 %v1087_v12 }
  0x40   : > { %1144 = vmatprep.mubr.bf16.mxu0 %v414_v34  ;;  %1160 = vmatprep.mubr.bf16.mxu1 %v422_v35  ;;  %v1009_v35 = vunpack.c.h.bf16 %v1078_v15 }
  0x47   : > { %1145 = vmatmul.mubr.bf16.gmra.mrb[12].mxu0 %v415_v40  ;;  %1161 = vmatmul.mubr.bf16.gmra.mrb[12].mxu1 %v423_v41 }
 0x102   : > { %v1134_v48 = vpop.f32.mrb[0].mxu0  ;;  %v1150_v49 = vpop.f32.mrb[0].mxu1 }
 0x103   : > { %v538_v52 = vadd.f32 %v1134_v48, %v1518_v45  ;;  %v602_v53 = vadd.f32 %v1150_v49, %v1518_v45  ;;  %v529_v54 = vpop.f32.mrb[1].mxu0  ;;  %v593_v55 = vpop.f32.mrb[1].mxu1  ;;  %v1089_v48 = vld [vmem:[%s1508_s27 + $0x68] sm:$0xff]  }
 0x104   : > { %v530_v58 = vadd.f32 %v1518_v45, %v529_v54  ;;  %v594_v59 = vadd.f32 %v1518_v45, %v593_v55  ;;  %v1135_v60 = vpop.f32.mrb[2].mxu0  ;;  %v1151_v61 = vpop.f32.mrb[2].mxu1 }
 0x105   : > { %v722_v0 = vadd.f32 %v1004_v46, %v538_v52  ;;  %v738_v1 = vadd.f32 %v1036_v47, %v602_v53  ;;  %v541_v2 = vadd.f32 %v1135_v60, %v1518_v45  ;;  %v605_v3 = vadd.f32 %v1151_v61, %v1518_v45  ;;  %v532_v4 = vpop.f32.mrb[3].mxu0  ;;  %v596_v6 = vpop.f32.mrb[3].mxu1  ;;  %v1081_v47 = vld [vmem:[%s1508_s27 + $0x28] sm:$0xff]   ;;  %v1088_v52 = vld [vmem:[%s1508_s27 + $0x60] sm:$0xff]  }
 0x106   : > { %v720_v7 = vadd.f32 %v1000_v50, %v530_v58  ;;  %v736_v8 = vadd.f32 %v1032_v51, %v594_v59  ;;  %v533_v9 = vadd.f32 %v1518_v45, %v532_v4  ;;  %v597_v10 = vadd.f32 %v1518_v45, %v596_v6  ;;  %v1080_v51 = vld [vmem:[%s1508_s27 + $0x20] sm:$0xff]  }
 0x107   : > { %754 = vst [vmem:[%s1535_s14 + $0x10] sm:$0xff] %v722_v0  ;;  %770 = vst [vmem:[%s1535_s14 + $0x90] sm:$0xff] %v738_v1  ;;  %v723_v13 = vadd.f32 %v1005_v56, %v541_v2  ;;  %v739_v14 = vadd.f32 %v1037_v57, %v605_v3  ;;  %v1020_v55 = vunpack.c.l.bf16 %v1081_v47  ;;  %v1052_v56 = vunpack.c.l.bf16 %v1089_v48 }
 0x108   : > { %752 = vst [vmem:[%s1535_s14] sm:$0xff] %v720_v7  ;;  %768 = vst [vmem:[%s1535_s14 + $0x80] sm:$0xff] %v736_v8  ;;  %v721_v17 = vadd.f32 %v1001_v62, %v533_v9  ;;  %v737_v18 = vadd.f32 %v1033_v63, %v597_v10  ;;  %v1016_v59 = vunpack.c.l.bf16 %v1080_v51  ;;  %v1048_v60 = vunpack.c.l.bf16 %v1088_v52 }
 0x109   : > { %755 = vst [vmem:[%s1535_s14 + $0x18] sm:$0xff] %v723_v13  ;;  %771 = vst [vmem:[%s1535_s14 + $0x98] sm:$0xff] %v739_v14  ;;  %v1021_v1 = vunpack.c.h.bf16 %v1081_v47  ;;  %v1053_v2 = vunpack.c.h.bf16 %v1089_v48  ;;  %v1017_v8 = vunpack.c.h.bf16 %v1080_v51  ;;  %v1049_v9 = vunpack.c.h.bf16 %v1088_v52 }
 0x10a   : > { %753 = vst [vmem:[%s1535_s14 + $0x8] sm:$0xff] %v721_v17  ;;  %769 = vst [vmem:[%s1535_s14 + $0x88] sm:$0xff] %v737_v18  ;;  %v1138_v21 = vpop.f32.mrb[4].mxu0  ;;  %v1154_v22 = vpop.f32.mrb[4].mxu1 }
 0x10b   : > { %v554_v25 = vadd.f32 %v1138_v21, %v1518_v45  ;;  %v618_v26 = vadd.f32 %v1154_v22, %v1518_v45  ;;  %v545_v27 = vpop.f32.mrb[5].mxu0  ;;  %v609_v28 = vpop.f32.mrb[5].mxu1  ;;  %v1091_v21 = vld [vmem:[%s1508_s27 + $0x78] sm:$0xff]  }
 0x10c   : > { %v546_v31 = vadd.f32 %v1518_v45, %v545_v27  ;;  %v610_v32 = vadd.f32 %v1518_v45, %v609_v28  ;;  %v1139_v33 = vpop.f32.mrb[6].mxu0  ;;  %v1155_v34 = vpop.f32.mrb[6].mxu1 }
 0x10d   : > { %v726_v37 = vadd.f32 %v1012_v19, %v554_v25  ;;  %v742_v38 = vadd.f32 %v1044_v20, %v618_v26  ;;  %v557_v39 = vadd.f32 %v1139_v33, %v1518_v45  ;;  %v621_v40 = vadd.f32 %v1155_v34, %v1518_v45  ;;  %v548_v41 = vpop.f32.mrb[7].mxu0  ;;  %v612_v42 = vpop.f32.mrb[7].mxu1  ;;  %v1083_v20 = vld [vmem:[%s1508_s27 + $0x38] sm:$0xff]   ;;  %v1090_v25 = vld [vmem:[%s1508_s27 + $0x70] sm:$0xff]  }
 0x10e   : > { %v724_v43 = vadd.f32 %v1008_v23, %v546_v31  ;;  %v740_v5 = vadd.f32 %v1040_v24, %v610_v32  ;;  %v549_v44 = vadd.f32 %v1518_v45, %v548_v41  ;;  %v613_v46 = vadd.f32 %v1518_v45, %v612_v42  ;;  %v1082_v24 = vld [vmem:[%s1508_s27 + $0x30] sm:$0xff]  }
 0x10f   : > { %758 = vst [vmem:[%s1535_s14 + $0x30] sm:$0xff] %v726_v37  ;;  %774 = vst [vmem:[%s1535_s14 + $0xb0] sm:$0xff] %v742_v38  ;;  %v727_v49 = vadd.f32 %v1013_v29, %v557_v39  ;;  %v743_v50 = vadd.f32 %v1045_v30, %v621_v40  ;;  %v1028_v28 = vunpack.c.l.bf16 %v1083_v20  ;;  %v1060_v29 = vunpack.c.l.bf16 %v1091_v21 }
 0x110   : > { %756 = vst [vmem:[%s1535_s14 + $0x20] sm:$0xff] %v724_v43  ;;  %772 = vst [vmem:[%s1535_s14 + $0xa0] sm:$0xff] %v740_v5  ;;  %v725_v53 = vadd.f32 %v1009_v35, %v549_v44  ;;  %v741_v54 = vadd.f32 %v1041_v36, %v613_v46  ;;  %v1024_v32 = vunpack.c.l.bf16 %v1082_v24  ;;  %v1056_v33 = vunpack.c.l.bf16 %v1090_v25 }
 0x111   : > { %759 = vst [vmem:[%s1535_s14 + $0x38] sm:$0xff] %v727_v49  ;;  %775 = vst [vmem:[%s1535_s14 + $0xb8] sm:$0xff] %v743_v50  ;;  %v1029_v38 = vunpack.c.h.bf16 %v1083_v20  ;;  %v1061_v39 = vunpack.c.h.bf16 %v1091_v21  ;;  %v1025_v5 = vunpack.c.h.bf16 %v1082_v24  ;;  %v1057_v44 = vunpack.c.h.bf16 %v1090_v25 }
 0x112   : > { %757 = vst [vmem:[%s1535_s14 + $0x28] sm:$0xff] %v725_v53  ;;  %773 = vst [vmem:[%s1535_s14 + $0xa8] sm:$0xff] %v741_v54  ;;  %v1142_v57 = vpop.f32.mrb[8].mxu0  ;;  %v1158_v58 = vpop.f32.mrb[8].mxu1 }
 0x113   : > { %v570_v61 = vadd.f32 %v1142_v57, %v1518_v45  ;;  %v634_v62 = vadd.f32 %v1158_v58, %v1518_v45  ;;  %v561_v63 = vpop.f32.mrb[9].mxu0  ;;  %v625_v0 = vpop.f32.mrb[9].mxu1 }
 0x114   : > { %v562_v3 = vadd.f32 %v1518_v45, %v561_v63  ;;  %v626_v4 = vadd.f32 %v1518_v45, %v625_v0  ;;  %v1143_v6 = vpop.f32.mrb[10].mxu0  ;;  %v1159_v7 = vpop.f32.mrb[10].mxu1 }
 0x115   : > { %v730_v10 = vadd.f32 %v1020_v55, %v570_v61  ;;  %v746_v11 = vadd.f32 %v1052_v56, %v634_v62  ;;  %v573_v12 = vadd.f32 %v1143_v6, %v1518_v45  ;;  %v637_v13 = vadd.f32 %v1159_v7, %v1518_v45  ;;  %v564_v14 = vpop.f32.mrb[11].mxu0  ;;  %v628_v15 = vpop.f32.mrb[11].mxu1 }
 0x116   : > { %v728_v16 = vadd.f32 %v1016_v59, %v562_v3  ;;  %v744_v17 = vadd.f32 %v1048_v60, %v626_v4  ;;  %v565_v18 = vadd.f32 %v1518_v45, %v564_v14  ;;  %v629_v19 = vadd.f32 %v1518_v45, %v628_v15 }
 0x117   : > { %762 = vst [vmem:[%s1535_s14 + $0x50] sm:$0xff] %v730_v10  ;;  %778 = vst [vmem:[%s1535_s14 + $0xd0] sm:$0xff] %v746_v11  ;;  %v731_v22 = vadd.f32 %v1021_v1, %v573_v12  ;;  %v747_v23 = vadd.f32 %v1053_v2, %v637_v13 }
 0x118   : > { %760 = vst [vmem:[%s1535_s14 + $0x40] sm:$0xff] %v728_v16  ;;  %776 = vst [vmem:[%s1535_s14 + $0xc0] sm:$0xff] %v744_v17  ;;  %v729_v26 = vadd.f32 %v1017_v8, %v565_v18  ;;  %v745_v27 = vadd.f32 %v1049_v9, %v629_v19 }
 0x119   : > { %763 = vst [vmem:[%s1535_s14 + $0x58] sm:$0xff] %v731_v22  ;;  %779 = vst [vmem:[%s1535_s14 + $0xd8] sm:$0xff] %v747_v23 }
 0x11a   : > { %761 = vst [vmem:[%s1535_s14 + $0x48] sm:$0xff] %v729_v26  ;;  %777 = vst [vmem:[%s1535_s14 + $0xc8] sm:$0xff] %v745_v27  ;;  %v1146_v30 = vpop.f32.mrb[12].mxu0  ;;  %v1162_v31 = vpop.f32.mrb[12].mxu1 }
 0x11b   : > { %v586_v34 = vadd.f32 %v1146_v30, %v1518_v45  ;;  %v650_v35 = vadd.f32 %v1162_v31, %v1518_v45  ;;  %v577_v36 = vpop.f32.mrb[13].mxu0  ;;  %v641_v37 = vpop.f32.mrb[13].mxu1 }
 0x11c   : > { %v578_v40 = vadd.f32 %v1518_v45, %v577_v36  ;;  %v642_v41 = vadd.f32 %v1518_v45, %v641_v37  ;;  %v1147_v42 = vpop.f32.mrb[14].mxu0  ;;  %v1163_v43 = vpop.f32.mrb[14].mxu1 }
 0x11d   : > { %v734_v46 = vadd.f32 %v1028_v28, %v586_v34  ;;  %v750_v47 = vadd.f32 %v1060_v29, %v650_v35  ;;  %v589_v48 = vadd.f32 %v1147_v42, %v1518_v45  ;;  %v653_v49 = vadd.f32 %v1163_v43, %v1518_v45  ;;  %v580_v50 = vpop.f32.mrb[15].mxu0  ;;  %v644_v51 = vpop.f32.mrb[15].mxu1 }
 0x11e   : > { %v732_v52 = vadd.f32 %v1024_v32, %v578_v40  ;;  %v748_v53 = vadd.f32 %v1056_v33, %v642_v41  ;;  %v581_v54 = vadd.f32 %v1518_v45, %v580_v50  ;;  %v645_v55 = vadd.f32 %v1518_v45, %v644_v51 }
 0x11f   : > { %766 = vst [vmem:[%s1535_s14 + $0x70] sm:$0xff] %v734_v46  ;;  %782 = vst [vmem:[%s1535_s14 + $0xf0] sm:$0xff] %v750_v47  ;;  %v735_v56 = vadd.f32 %v1029_v38, %v589_v48  ;;  %v751_v57 = vadd.f32 %v1061_v39, %v653_v49 }
 0x120   : > { %764 = vst [vmem:[%s1535_s14 + $0x60] sm:$0xff] %v732_v52  ;;  %780 = vst [vmem:[%s1535_s14 + $0xe0] sm:$0xff] %v748_v53  ;;  %v733_v58 = vadd.f32 %v1025_v5, %v581_v54  ;;  %v749_v59 = vadd.f32 %v1057_v44, %v645_v55 }
 0x121   : > { %767 = vst [vmem:[%s1535_s14 + $0x78] sm:$0xff] %v735_v56  ;;  %783 = vst [vmem:[%s1535_s14 + $0xf8] sm:$0xff] %v751_v57 }
 0x122   : > { %765 = vst [vmem:[%s1535_s14 + $0x68] sm:$0xff] %v733_v58  ;;  %781 = vst [vmem:[%s1535_s14 + $0xe8] sm:$0xff] %v749_v59 }
 0x123   : > { %1258 = shalt.err (!%p1255_p5)
}
 0x124   : > { %s1259_s27 = scalar_lea.hbm %s1602_s13, 4096  ;;  %s1263_s8 = scalar_lea.hbm %s1665_s5, 8192 }
 0x125   : > { %p1260_p6 = scmp.ne.s32.totalorder %s1602_s13, %s1259_s27  ;;  %p1264_p10 = scmp.lt.u32.totalorder %s1602_s13, %s1665_s5 }
 0x126   : > { %p1265_p11 = scmp.lt.u32.totalorder %s1263_s8, %s1259_s27  ;;  %p1267_p13 = scmp.lt.u32.totalorder %s1259_s27, %s1602_s13 }
 0x127   : > { %p1261_p7 = pnand %p1260_p6, %p1398_p4 }
 0x128   : > { %p1266_p12 = por %p1265_p11, %p1264_p10 }
 0x129   : > { %p1262_p9 = pneg %p1261_p7 }
 0x12a   : > { %p1268_p0 = por %p1267_p13, %p1266_p12 }
 0x12c   : > { %p1269_p1 = pnand %p1268_p0, %p1262_p9 }
 0x12e   : > { %1272 = shalt.err (!%p1269_p1)
}
 0x12f   : > { %s1326_s9 = smov 128   ;;  %s1327_s21 = smov 8  }
 0x130   : > { %1180 = dma.vmem_to_hbm [thread:$0]  (%p1398_p4), %s1604_s10, 4096, %s1602_s13, %s1614_s15, %s1326_s9, %s1326_s9, %s1327_s21  }
 0x131 PF: > { %p1186_p2 = scmp.ge.s32.totalorder %s1323_s23, 2  ;;  %s815_s12 = sand.u32 1, %s1303_s18  }
 0x132   : > { %s816_s16 = scalar_lea.sflag [#allocation3], %s815_s12 }
 0x133   : > { %p1183_p3 = pnand %p1186_p2, %p1405_p8 }
 0x135   : > { %1298 = dma.done.wait (!%p1183_p3), %s816_s16, 4096  }
 0x136   : > { %1300 = vsyncadd (!%p1183_p3), %s816_s16, 4294963200  ;;  %s18_s23 = sadd.s32 1, %s1323_s23   ;;  %s1668_s18 = smov %s1307_s19 }
 0x137   : > { %p15_p5 = scmp.ge.s32.totalorder %s18_s23, 4   ;;  %s1669_s19 = smov %s1311_s20 }
 0x138   : > { %s1670_s20 = smov %s1411_s6  ;;  %s1671_s21 = smov %s1319_s22 }
 0x139   : > { %s1672_s22 = smov %s1674_s26  ;;  %17 = sbr.rel (!%p15_p5) target bundleno = 4 (0x4), region = 81 }
 0x140   :  { %821 = vsyncpa [#allocation3], 1 }
 0x141   :  { %823 = vsyncpa [#allocation3 + $0x1], 1 }

// kernel: mbconv_forward.4
= control target key start
LH: loop header
LB: loop body
LE: loop exit
PB: predicated region body
PF: predicated region fallthrough
CT: control target
= control target key end

     0   :  { %s1426_s12 = smov 0   ;;  %s1428_s13 = smov 0   ;;  %s1561_s0 = inlined_call_operand.vmem [shape: bf16[512,32], index: 0, kind: input, shape index: {}]   ;;  %s1562_s1 = inlined_call_operand.vmem [shape: bf16[32,128], index: 1, kind: input, shape index: {}]   ;;  %s1563_s2 = inlined_call_operand.vmem [shape: f32[1,128], index: 2, kind: input, shape index: {}]   ;;  %s1564_s3 = inlined_call_operand.vmem [shape: bf16[512,128], index: 3, kind: output, shape index: {}]  }
   0x1   :  { %s1430_s14 = smov 0  }
   0x2 LB: > { %s32_s15 = sadd.s32 1, %s1400_s13  ;;  %p1081_p0 = scmp.ge.s32.totalorder %s1404_s14, 1  ;;  %s1404_s14 = sphi %s1430_s14, %s13_s14   ;;  %s1400_s13 = sphi %s1428_s13, %s1566_s13   ;;  %s1396_s12 = sphi %s1426_s12, %s1565_s12  }
   0x3   : > { %p34_p1 = scmp.ge.s32.totalorder %s32_s15, 2  ;;  %p188_p2 = scmp.lt.s32.totalorder %s1404_s14, 3 }
   0x5   : > { %s1568_s15 = smov (%p34_p1, %s32_s15), 0  ;;  %p189_p3 = pnand %p1081_p0, %p188_p2 }
   0x6   : > { %v1364_v0 = vld [vmem:[%s1562_s1] sm:$0xff] (!%p189_p3)   ;;  %s1082_s18 = sshll.u32 (!%p189_p3), %s1396_s12, 5  ;;  %v1365_v1 = vld [vmem:[%s1562_s1 + $0x8] sm:$0xff] (!%p189_p3)   ;;  %vm456_vm0 = vcmask (!%p189_p3), 261120  }
   0x7   : > { %192 = sbr.rel (%p189_p3) target bundleno = 264 (0x108), region = 32  ;;  %p230_p4 = scmp.lt.s32.totalorder (!%p189_p3), %s1082_s18, 63  ;;  %1300 = vmatprep.subr.bf16.mxu0 (!%p189_p3), %v1364_v0  ;;  %1336 = vmatprep.subr.bf16.mxu1 (!%p189_p3), %v1364_v0  ;;  %v1495_v19 = vld [vmem:[%s1563_s2] ss:$0 sm:$0xff] (!%p189_p3) }
   0x8   : > { %1301 = vmatpush3.bf16.msra.mxu0 (!%p189_p3), %v1364_v0  ;;  %1338 = vmatpush3.bf16.msra.mxu1 (!%p189_p3), %v1364_v0 }
   0x9   : > { %1302 = vmatprep.subr.bf16.mxu0 (!%p189_p3), %v1365_v1  ;;  %1337 = vmatprep.subr.bf16.mxu1 (!%p189_p3), %v1365_v1 }
   0xc   : > { %1303 = vmatpush3.bf16.msra.mxu0 (!%p189_p3), %v1365_v1  ;;  %1339 = vmatpush3.bf16.msra.mxu1 (!%p189_p3), %v1365_v1 }
   0xe   : > { %s1570_s18 = smov (!%p230_p4, %s1082_s18), 63 }
   0xf   : > { %s1083_s21 = sshll.u32 %s1570_s18, 2 }
  0x10   : > { %s1458_s24 = scalar_lea.vmem %s1561_s0, %s1083_s21  ;;  %s1506_s29 = scalar_lea.vmem %s1564_s3, %s1083_s21 }
  0x11   : > { %v1366_v2 = vld [vmem:[%s1458_s24] sm:$0xff]   ;;  %v1368_v4 = vld [vmem:[%s1458_s24 + $0x8] sm:$0xff]   ;;  %v1370_v6 = vld [vmem:[%s1458_s24 + $0x10] sm:$0xff]  }
  0x12   : > { %v1367_v3 = vld [vmem:[%s1458_s24 + $0x40] sm:$0xff]   ;;  %1304 = vmatprep.mubr.msk.bf16.mxu0 %vm456_vm0, %v1366_v2  ;;  %v1369_v5 = vld [vmem:[%s1458_s24 + $0x48] sm:$0xff]   ;;  %v1371_v7 = vld [vmem:[%s1458_s24 + $0x50] sm:$0xff]  }
  0x13   : > { %1320 = vmatprep.mubr.msk.bf16.mxu1 %vm456_vm0, %v1367_v3  ;;  %1305 = vmatmul.mubr.msk.bf16.vlgmr.msra.gmra.mrb[0].mxu0 %vm456_vm0, %v1368_v4  ;;  %v1372_v8 = vld [vmem:[%s1458_s24 + $0x18] sm:$0xff]   ;;  %v1374_v10 = vld [vmem:[%s1458_s24 + $0x20] sm:$0xff]   ;;  %v1376_v12 = vld [vmem:[%s1458_s24 + $0x28] sm:$0xff]  }
  0x14   : > { %1321 = vmatmul.mubr.msk.bf16.vlgmr.msra.gmra.mrb[0].mxu1 %vm456_vm0, %v1369_v5  ;;  %1308 = vmatprep.mubr.msk.bf16.mxu0 %vm456_vm0, %v1370_v6  ;;  %v1373_v9 = vld [vmem:[%s1458_s24 + $0x58] sm:$0xff]   ;;  %v1375_v11 = vld [vmem:[%s1458_s24 + $0x60] sm:$0xff]   ;;  %v1377_v13 = vld [vmem:[%s1458_s24 + $0x68] sm:$0xff]  }
  0x15   : > { %1324 = vmatprep.mubr.msk.bf16.mxu1 %vm456_vm0, %v1371_v7  ;;  %v1378_v14 = vld [vmem:[%s1458_s24 + $0x30] sm:$0xff]   ;;  %v1380_v16 = vld [vmem:[%s1458_s24 + $0x38] sm:$0xff]  }
  0x16   : > { %v1379_v15 = vld [vmem:[%s1458_s24 + $0x70] sm:$0xff]   ;;  %v1381_v17 = vld [vmem:[%s1458_s24 + $0x78] sm:$0xff]  }
  0x1b   : > { %1309 = vmatmul.mubr.msk.bf16.gmra.mrb[4].mxu0 %vm456_vm0, %v1372_v8 }
  0x1c   : > { %1325 = vmatmul.mubr.msk.bf16.gmra.mrb[4].mxu1 %vm456_vm0, %v1373_v9  ;;  %1312 = vmatprep.mubr.msk.bf16.mxu0 %vm456_vm0, %v1374_v10 }
  0x1d   : > { %1328 = vmatprep.mubr.msk.bf16.mxu1 %vm456_vm0, %v1375_v11 }
  0x23   : > { %1313 = vmatmul.mubr.msk.bf16.gmra.mrb[8].mxu0 %vm456_vm0, %v1376_v12 }
  0x24   : > { %1329 = vmatmul.mubr.msk.bf16.gmra.mrb[8].mxu1 %vm456_vm0, %v1377_v13  ;;  %1316 = vmatprep.mubr.msk.bf16.mxu0 %vm456_vm0, %v1378_v14 }
  0x25   : > { %1332 = vmatprep.mubr.msk.bf16.mxu1 %vm456_vm0, %v1379_v15 }
  0x2b   : > { %1317 = vmatmul.mubr.msk.bf16.gmra.mrb[12].mxu0 %vm456_vm0, %v1380_v16 }
  0x2c   : > { %1333 = vmatmul.mubr.msk.bf16.gmra.mrb[12].mxu1 %vm456_vm0, %v1381_v17 }
  0xe6   : > { %v1306_v18 = vpop.f32.mrb[0].mxu0 }
  0xe7   : > { %v1322_v20 = vpop.f32.mrb[0].mxu1  ;;  %v539_v21 = vpop.f32.mrb[1].mxu0  ;;  %v774_v24 = vadd.f32 %v1306_v18, %v1495_v19 }
  0xe8   : > { %v603_v22 = vpop.f32.mrb[1].mxu1  ;;  %v1307_v23 = vpop.f32.mrb[2].mxu0  ;;  %v790_v28 = vadd.f32 %v1322_v20, %v1495_v19  ;;  %v772_v29 = vadd.f32 %v1495_v19, %v539_v21 }
  0xe9   : > { %v775_v25 = vadd.f32 %v1307_v23, %v1495_v19  ;;  %v1323_v26 = vpop.f32.mrb[2].mxu1  ;;  %v542_v27 = vpop.f32.mrb[3].mxu0  ;;  %v788_v33 = vadd.f32 %v1495_v19, %v603_v22 }
  0xea   : > { %v791_v30 = vadd.f32 %v1323_v26, %v1495_v19  ;;  %v773_v31 = vadd.f32 %v1495_v19, %v542_v27  ;;  %v606_v32 = vpop.f32.mrb[3].mxu1 }
  0xeb   : > { %v1195_v34 = vpack.c.bf16 %v775_v25, %v774_v24  ;;  %v789_v35 = vadd.f32 %v1495_v19, %v606_v32 }
  0xec   : > { %v1235_v36 = vpack.c.bf16 %v791_v30, %v790_v28  ;;  %v1190_v37 = vpack.c.bf16 %v773_v31, %v772_v29 }
  0xed   : > { %1267 = vst [vmem:[%s1506_s29 + $0x8] sm:$0xff] %v1195_v34   ;;  %v1230_v38 = vpack.c.bf16 %v789_v35, %v788_v33 }
  0xee   : > { %1275 = vst [vmem:[%s1506_s29 + $0x48] sm:$0xff] %v1235_v36   ;;  %1191 = vst [vmem:[%s1506_s29] sm:$0xff] %v1190_v37   ;;  %v1310_v39 = vpop.f32.mrb[4].mxu0 }
  0xef   : > { %1274 = vst [vmem:[%s1506_s29 + $0x40] sm:$0xff] %v1230_v38   ;;  %v1326_v40 = vpop.f32.mrb[4].mxu1  ;;  %v555_v41 = vpop.f32.mrb[5].mxu0  ;;  %v778_v44 = vadd.f32 %v1310_v39, %v1495_v19 }
  0xf0   : > { %v619_v42 = vpop.f32.mrb[5].mxu1  ;;  %v1311_v43 = vpop.f32.mrb[6].mxu0  ;;  %v794_v48 = vadd.f32 %v1326_v40, %v1495_v19  ;;  %v776_v49 = vadd.f32 %v1495_v19, %v555_v41 }
  0xf1   : > { %v779_v45 = vadd.f32 %v1311_v43, %v1495_v19  ;;  %v1327_v46 = vpop.f32.mrb[6].mxu1  ;;  %v558_v47 = vpop.f32.mrb[7].mxu0  ;;  %v792_v53 = vadd.f32 %v1495_v19, %v619_v42 }
  0xf2   : > { %v795_v50 = vadd.f32 %v1327_v46, %v1495_v19  ;;  %v777_v51 = vadd.f32 %v1495_v19, %v558_v47  ;;  %v622_v52 = vpop.f32.mrb[7].mxu1 }
  0xf3   : > { %v1205_v54 = vpack.c.bf16 %v779_v45, %v778_v44  ;;  %v793_v55 = vadd.f32 %v1495_v19, %v622_v52 }
  0xf4   : > { %v1245_v56 = vpack.c.bf16 %v795_v50, %v794_v48  ;;  %v1200_v57 = vpack.c.bf16 %v777_v51, %v776_v49 }
  0xf5   : > { %1269 = vst [vmem:[%s1506_s29 + $0x18] sm:$0xff] %v1205_v54   ;;  %v1240_v58 = vpack.c.bf16 %v793_v55, %v792_v53 }
  0xf6   : > { %1277 = vst [vmem:[%s1506_s29 + $0x58] sm:$0xff] %v1245_v56   ;;  %1268 = vst [vmem:[%s1506_s29 + $0x10] sm:$0xff] %v1200_v57   ;;  %v1314_v59 = vpop.f32.mrb[8].mxu0 }
  0xf7   : > { %1276 = vst [vmem:[%s1506_s29 + $0x50] sm:$0xff] %v1240_v58   ;;  %v1330_v60 = vpop.f32.mrb[8].mxu1  ;;  %v571_v61 = vpop.f32.mrb[9].mxu0  ;;  %v782_v0 = vadd.f32 %v1314_v59, %v1495_v19 }
  0xf8   : > { %v635_v62 = vpop.f32.mrb[9].mxu1  ;;  %v1315_v63 = vpop.f32.mrb[10].mxu0  ;;  %v798_v4 = vadd.f32 %v1330_v60, %v1495_v19  ;;  %v780_v5 = vadd.f32 %v1495_v19, %v571_v61 }
  0xf9   : > { %v783_v1 = vadd.f32 %v1315_v63, %v1495_v19  ;;  %v1331_v2 = vpop.f32.mrb[10].mxu1  ;;  %v574_v3 = vpop.f32.mrb[11].mxu0  ;;  %v796_v9 = vadd.f32 %v1495_v19, %v635_v62 }
  0xfa   : > { %v799_v6 = vadd.f32 %v1331_v2, %v1495_v19  ;;  %v781_v7 = vadd.f32 %v1495_v19, %v574_v3  ;;  %v638_v8 = vpop.f32.mrb[11].mxu1 }
  0xfb   : > { %v1215_v10 = vpack.c.bf16 %v783_v1, %v782_v0  ;;  %v797_v11 = vadd.f32 %v1495_v19, %v638_v8 }
  0xfc   : > { %v1255_v12 = vpack.c.bf16 %v799_v6, %v798_v4  ;;  %v1210_v13 = vpack.c.bf16 %v781_v7, %v780_v5 }
  0xfd   : > { %1271 = vst [vmem:[%s1506_s29 + $0x28] sm:$0xff] %v1215_v10   ;;  %v1250_v14 = vpack.c.bf16 %v797_v11, %v796_v9 }
  0xfe   : > { %1279 = vst [vmem:[%s1506_s29 + $0x68] sm:$0xff] %v1255_v12   ;;  %1270 = vst [vmem:[%s1506_s29 + $0x20] sm:$0xff] %v1210_v13   ;;  %v1318_v15 = vpop.f32.mrb[12].mxu0 }
  0xff   : > { %1278 = vst [vmem:[%s1506_s29 + $0x60] sm:$0xff] %v1250_v14   ;;  %v1334_v16 = vpop.f32.mrb[12].mxu1  ;;  %v587_v17 = vpop.f32.mrb[13].mxu0  ;;  %v786_v21 = vadd.f32 %v1318_v15, %v1495_v19 }
 0x100   : > { %v651_v18 = vpop.f32.mrb[13].mxu1  ;;  %v1319_v20 = vpop.f32.mrb[14].mxu0  ;;  %v802_v25 = vadd.f32 %v1334_v16, %v1495_v19  ;;  %v784_v26 = vadd.f32 %v1495_v19, %v587_v17 }
 0x101   : > { %v787_v22 = vadd.f32 %v1319_v20, %v1495_v19  ;;  %v1335_v23 = vpop.f32.mrb[14].mxu1  ;;  %v590_v24 = vpop.f32.mrb[15].mxu0  ;;  %v800_v30 = vadd.f32 %v1495_v19, %v651_v18 }
 0x102   : > { %v803_v27 = vadd.f32 %v1335_v23, %v1495_v19  ;;  %v785_v28 = vadd.f32 %v1495_v19, %v590_v24  ;;  %v654_v29 = vpop.f32.mrb[15].mxu1 }
 0x103   : > { %v1225_v31 = vpack.c.bf16 %v787_v22, %v786_v21  ;;  %v801_v32 = vadd.f32 %v1495_v19, %v654_v29 }
 0x104   : > { %v1265_v33 = vpack.c.bf16 %v803_v27, %v802_v25  ;;  %v1220_v34 = vpack.c.bf16 %v785_v28, %v784_v26 }
 0x105   : > { %1273 = vst [vmem:[%s1506_s29 + $0x38] sm:$0xff] %v1225_v31   ;;  %v1260_v35 = vpack.c.bf16 %v801_v32, %v800_v30 }
 0x106   : > { %1281 = vst [vmem:[%s1506_s29 + $0x78] sm:$0xff] %v1265_v33   ;;  %1272 = vst [vmem:[%s1506_s29 + $0x30] sm:$0xff] %v1220_v34  }
 0x107   : > { %1280 = vst [vmem:[%s1506_s29 + $0x70] sm:$0xff] %v1260_v35  }
 0x108 PF: > { %s13_s14 = sadd.s32 1, %s1404_s14   ;;  %s1565_s12 = smov %s1400_s13 }
 0x109   : > { %p10_p5 = scmp.ge.s32.totalorder %s13_s14, 4   ;;  %s1566_s13 = smov %s1568_s15 }
 0x10b   :  { %12 = sbr.rel (!%p10_p5) target bundleno = 2 (0x2), region = 76 }

// kernel: mbconv_forward.5
= control target key start
LH: loop header
LB: loop body
LE: loop exit
PB: predicated region body
PF: predicated region fallthrough
CT: control target
= control target key end

     0   :  { %s2556_s21 = smov 0   ;;  %s2558_s22 = smov 0   ;;  %s3670_s0 = inlined_call_operand.vmem [shape: bf16[2,256,32], index: 0, kind: input, shape index: {}]   ;;  %s3671_s1 = inlined_call_operand.vmem [shape: bf16[32,128], index: 1, kind: input, shape index: {}]   ;;  %s3672_s2 = inlined_call_operand.vmem [shape: f32[1,128], index: 2, kind: input, shape index: {}]   ;;  %s3673_s3 = inlined_call_operand.vmem [shape: f32[9,128], index: 3, kind: input, shape index: {}]   ;;  %s3674_s4 = inlined_call_operand.vmem [shape: f32[1,128], index: 4, kind: input, shape index: {}]   ;;  %s3675_s5 = inlined_call_operand.vmem [shape: bf16[2,16,16,128], index: 5, kind: output, shape index: {0}]   ;;  %s3676_s6 = inlined_call_operand.vmem [shape: f32[2,1,128], index: 6, kind: output, shape index: {1}]  }
   0x1   :  { %s2560_s23 = smov 0  }
   0x2 LB: > { %s29_s24 = sadd.s32 1, %s2514_s22  ;;  %p2170_p0 = scmp.ge.s32.totalorder %s2518_s23, 1  ;;  %s2518_s23 = sphi %s2560_s23, %s17_s23   ;;  %s2514_s22 = sphi %s2558_s22, %s3820_s22   ;;  %s2510_s21 = sphi %s2556_s21, %s3819_s21  }
   0x3   : > { %p31_p1 = scmp.ge.s32.totalorder %s29_s24, 2  ;;  %p265_p2 = scmp.lt.s32.totalorder %s2518_s23, 3 }
   0x5   : > { %s3822_s24 = smov (%p31_p1, %s29_s24), 0  ;;  %p266_p3 = pnand %p2170_p0, %p265_p2 }
   0x7   : > { %269 = sbr.rel (%p266_p3) target bundleno = 440 (0x1b8), region = 40 }
   0xe   : > { %v2466_v0 = vld [vmem:[%s3671_s1] sm:$0xff]   ;;  %p318_p4 = scmp.lt.s32.totalorder %s2510_s21, 1  ;;  %v2467_v1 = vld [vmem:[%s3671_s1 + $0x8] sm:$0xff]   ;;  %vm487_vm0 = vcmask 261120   ;;  %v2520_v18 = vmov 0.0  }
   0xf   : > { %2401 = vmatprep.subr.bf16.mxu0 %v2466_v0  ;;  %2437 = vmatprep.subr.bf16.mxu1 %v2466_v0  ;;  %767 = vst [vmem:[#allocation2 + $0x30] sm:$0xff] %v2520_v18  ;;  %768 = vst [vmem:[#allocation2 + $0x38] sm:$0xff] %v2520_v18  ;;  %v2625_v19 = vld [vmem:[%s3673_s3] ss:$0 sm:$0xff]  ;;  %v2630_v21 = vld [vmem:[%s3673_s3 + $0x1] ss:$0 sm:$0xff] }
  0x10   : > { %s3824_s21 = smov (!%p318_p4, %s2510_s21), 1  ;;  %2402 = vmatpush3.bf16.msra.mxu0 %v2466_v0  ;;  %2439 = vmatpush3.bf16.msra.mxu1 %v2466_v0  ;;  %761 = vst [vmem:[#allocation2] sm:$0xff] %v2520_v18  ;;  %762 = vst [vmem:[#allocation2 + $0x8] sm:$0xff] %v2520_v18  ;;  %v2635_v22 = vld [vmem:[%s3672_s2] ss:$0 sm:$0xff]  ;;  %v885_v23 = vmul.f32 0.0, %v2625_v19 }
  0x11   : > { %2403 = vmatprep.subr.bf16.mxu0 %v2467_v1  ;;  %2438 = vmatprep.subr.bf16.mxu1 %v2467_v1  ;;  %s2254_s29 = sshll.u32 %s3824_s21, 7  ;;  %763 = vst [vmem:[#allocation2 + $0x10] sm:$0xff] %v2520_v18  ;;  %764 = vst [vmem:[#allocation2 + $0x18] sm:$0xff] %v2520_v18  ;;  %v2642_v28 = vld [vmem:[%s3673_s3 + $0x2] ss:$0 sm:$0xff]  ;;  %s350_s19 = scalar_lea.vmem %s3676_s6, %s3824_s21 }
  0x12   : > { %s2588_s8 = scalar_lea.vmem %s3670_s0, %s2254_s29  ;;  %765 = vst [vmem:[#allocation2 + $0x20] sm:$0xff] %v2520_v18  ;;  %766 = vst [vmem:[#allocation2 + $0x28] sm:$0xff] %v2520_v18  ;;  %v2657_v58 = vld [vmem:[%s3673_s3 + $0x4] ss:$0 sm:$0xff]  ;;  %v2663_v62 = vld [vmem:[%s3673_s3 + $0x7] ss:$0 sm:$0xff]  ;;  %s2941_s14 = scalar_lea.vmem %s3675_s5, %s2254_s29 }
  0x13   : > { %v2468_v2 = vld [vmem:[%s2588_s8] sm:$0xff]   ;;  %v2469_v3 = vld [vmem:[%s2588_s8 + $0x8] sm:$0xff]   ;;  %v2472_v6 = vld [vmem:[%s2588_s8 + $0x10] sm:$0xff]   ;;  %769 = vst [vmem:[#allocation2 + $0x40] sm:$0xff] %v2520_v18 }
  0x14   : > { %2404 = vmatpush3.bf16.msra.mxu0 %v2467_v1  ;;  %2440 = vmatpush3.bf16.msra.mxu1 %v2467_v1  ;;  %v2470_v4 = vld [vmem:[%s2588_s8 + $0x40] sm:$0xff]   ;;  %v2471_v5 = vld [vmem:[%s2588_s8 + $0x48] sm:$0xff]   ;;  %v2474_v7 = vld [vmem:[%s2588_s8 + $0x50] sm:$0xff]   ;;  %770 = vst [vmem:[#allocation2 + $0x48] sm:$0xff] %v2520_v18 }
  0x15   : > { %2405 = vmatprep.mubr.msk.bf16.mxu0 %vm487_vm0, %v2468_v2  ;;  %2421 = vmatprep.mubr.msk.bf16.mxu1 %vm487_vm0, %v2470_v4  ;;  %v2473_v8 = vld [vmem:[%s2588_s8 + $0x18] sm:$0xff]   ;;  %v2476_v10 = vld [vmem:[%s2588_s8 + $0x20] sm:$0xff]   ;;  %v2477_v12 = vld [vmem:[%s2588_s8 + $0x28] sm:$0xff]   ;;  %771 = vst [vmem:[#allocation2 + $0x50] sm:$0xff] %v2520_v18 }
  0x16   : > { %v2475_v9 = vld [vmem:[%s2588_s8 + $0x58] sm:$0xff]   ;;  %v2478_v11 = vld [vmem:[%s2588_s8 + $0x60] sm:$0xff]   ;;  %v2479_v13 = vld [vmem:[%s2588_s8 + $0x68] sm:$0xff]   ;;  %772 = vst [vmem:[#allocation2 + $0x58] sm:$0xff] %v2520_v18 }
  0x17   : > { %2406 = vmatmul.mubr.msk.bf16.vlgmr.msra.gmra.mrb[0].mxu0 %vm487_vm0, %v2469_v3  ;;  %2422 = vmatmul.mubr.msk.bf16.vlgmr.msra.gmra.mrb[0].mxu1 %vm487_vm0, %v2471_v5  ;;  %v2480_v14 = vld [vmem:[%s2588_s8 + $0x30] sm:$0xff]   ;;  %v2481_v16 = vld [vmem:[%s2588_s8 + $0x38] sm:$0xff]   ;;  %773 = vst [vmem:[#allocation2 + $0x60] sm:$0xff] %v2520_v18  ;;  %774 = vst [vmem:[#allocation2 + $0x68] sm:$0xff] %v2520_v18 }
  0x18   : > { %2409 = vmatprep.mubr.msk.bf16.mxu0 %vm487_vm0, %v2472_v6  ;;  %2425 = vmatprep.mubr.msk.bf16.mxu1 %vm487_vm0, %v2474_v7  ;;  %v2482_v15 = vld [vmem:[%s2588_s8 + $0x70] sm:$0xff]   ;;  %v2483_v17 = vld [vmem:[%s2588_s8 + $0x78] sm:$0xff]   ;;  %775 = vst [vmem:[#allocation2 + $0x70] sm:$0xff] %v2520_v18  ;;  %776 = vst [vmem:[#allocation2 + $0x78] sm:$0xff] %v2520_v18 }
  0x19   : > { %777 = vst [vmem:[#allocation2 + $0x80] sm:$0xff] %v2520_v18  ;;  %778 = vst [vmem:[#allocation2 + $0x88] sm:$0xff] %v2520_v18  ;;  %v949_v20 = vld [vmem:[#allocation2 + $0x1] sm:$0xff]  ;;  %v950_v25 = vld [vmem:[#allocation2 + $0x9] sm:$0xff] }
  0x1a   : > { %779 = vst [vmem:[#allocation2 + $0x90] sm:$0xff] %v2520_v18  ;;  %780 = vst [vmem:[#allocation2 + $0x98] sm:$0xff] %v2520_v18  ;;  %v986_v24 = vmul.f32 %v2630_v21, %v949_v20  ;;  %v1050_v27 = vld [vmem:[#allocation2 + $0x2] sm:$0xff]  ;;  %v987_v31 = vmul.f32 %v2630_v21, %v950_v25  ;;  %v1051_v36 = vld [vmem:[#allocation2 + $0xa] sm:$0xff] }
  0x1b   : > { %781 = vst [vmem:[#allocation2 + $0xa0] sm:$0xff] %v2520_v18  ;;  %782 = vst [vmem:[#allocation2 + $0xa8] sm:$0xff] %v2520_v18  ;;  %v1087_v40 = vmul.f32 %v2642_v28, %v1050_v27  ;;  %v1088_v53 = vmul.f32 %v2642_v28, %v1051_v36 }
  0x1c   : > { %783 = vst [vmem:[#allocation2 + $0xb0] sm:$0xff] %v2520_v18  ;;  %784 = vst [vmem:[#allocation2 + $0xb8] sm:$0xff] %v2520_v18  ;;  %v1018_v34 = vadd.f32 %v986_v24, %v885_v23  ;;  %v1019_v52 = vadd.f32 %v987_v31, %v885_v23  ;;  %v2694_v24 = vld [vmem:[%s3673_s3 + $0x3] ss:$0 sm:$0xff] }
  0x1d   : > { %785 = vst [vmem:[#allocation2 + $0xc0] sm:$0xff] %v2520_v18  ;;  %786 = vst [vmem:[#allocation2 + $0xc8] sm:$0xff] %v2520_v18 }
  0x1e   : > { %787 = vst [vmem:[#allocation2 + $0xd0] sm:$0xff] %v2520_v18  ;;  %788 = vst [vmem:[#allocation2 + $0xd8] sm:$0xff] %v2520_v18  ;;  %v1119_v1 = vadd.f32 %v1087_v40, %v1018_v34  ;;  %v2671_v6 = vadd.f32 %v1088_v53, %v1019_v52 }
  0x1f   : > { %2410 = vmatmul.mubr.msk.bf16.gmra.mrb[4].mxu0 %vm487_vm0, %v2473_v8  ;;  %2426 = vmatmul.mubr.msk.bf16.gmra.mrb[4].mxu1 %vm487_vm0, %v2475_v9  ;;  %789 = vst [vmem:[#allocation2 + $0xe0] sm:$0xff] %v2520_v18  ;;  %790 = vst [vmem:[#allocation2 + $0xe8] sm:$0xff] %v2520_v18 }
  0x20   : > { %2413 = vmatprep.mubr.msk.bf16.mxu0 %vm487_vm0, %v2476_v10  ;;  %2429 = vmatprep.mubr.msk.bf16.mxu1 %vm487_vm0, %v2478_v11  ;;  %791 = vst [vmem:[#allocation2 + $0xf0] sm:$0xff] %v2520_v18  ;;  %792 = vst [vmem:[#allocation2 + $0xf8] sm:$0xff] %v2520_v18 }
  0x21   : > { %793 = vst [vmem:[#allocation2 + $0x100] sm:$0xff] %v2520_v18  ;;  %794 = vst [vmem:[#allocation2 + $0x108] sm:$0xff] %v2520_v18 }
  0x22   : > { %795 = vst [vmem:[#allocation2 + $0x110] sm:$0xff] %v2520_v18  ;;  %796 = vst [vmem:[#allocation2 + $0x118] sm:$0xff] %v2520_v18 }
  0x23   : > { %797 = vst [vmem:[#allocation2 + $0x120] sm:$0xff] %v2520_v18  ;;  %798 = vst [vmem:[#allocation2 + $0x128] sm:$0xff] %v2520_v18 }
  0x24   : > { %799 = vst [vmem:[#allocation2 + $0x130] sm:$0xff] %v2520_v18  ;;  %800 = vst [vmem:[#allocation2 + $0x138] sm:$0xff] %v2520_v18 }
  0x25   : > { %801 = vst [vmem:[#allocation2 + $0x140] sm:$0xff] %v2520_v18  ;;  %802 = vst [vmem:[#allocation2 + $0x148] sm:$0xff] %v2520_v18 }
  0x26   : > { %803 = vst [vmem:[#allocation2 + $0x150] sm:$0xff] %v2520_v18  ;;  %804 = vst [vmem:[#allocation2 + $0x158] sm:$0xff] %v2520_v18 }
  0x27   : > { %2414 = vmatmul.mubr.msk.bf16.gmra.mrb[8].mxu0 %vm487_vm0, %v2477_v12  ;;  %2430 = vmatmul.mubr.msk.bf16.gmra.mrb[8].mxu1 %vm487_vm0, %v2479_v13  ;;  %805 = vst [vmem:[#allocation2 + $0x160] sm:$0xff] %v2520_v18  ;;  %806 = vst [vmem:[#allocation2 + $0x168] sm:$0xff] %v2520_v18 }
  0x28   : > { %2417 = vmatprep.mubr.msk.bf16.mxu0 %vm487_vm0, %v2480_v14  ;;  %2433 = vmatprep.mubr.msk.bf16.mxu1 %vm487_vm0, %v2482_v15  ;;  %807 = vst [vmem:[#allocation2 + $0x170] sm:$0xff] %v2520_v18  ;;  %808 = vst [vmem:[#allocation2 + $0x178] sm:$0xff] %v2520_v18 }
  0x29   : > { %809 = vst [vmem:[#allocation2 + $0x180] sm:$0xff] %v2520_v18  ;;  %810 = vst [vmem:[#allocation2 + $0x188] sm:$0xff] %v2520_v18 }
  0x2a   : > { %811 = vst [vmem:[#allocation2 + $0x190] sm:$0xff] %v2520_v18  ;;  %812 = vst [vmem:[#allocation2 + $0x198] sm:$0xff] %v2520_v18 }
  0x2b   : > { %813 = vst [vmem:[#allocation2 + $0x1a0] sm:$0xff] %v2520_v18  ;;  %814 = vst [vmem:[#allocation2 + $0x1a8] sm:$0xff] %v2520_v18 }
  0x2c   : > { %3697 = vst [vmem:[#allocation3_spill] sm:$0xff] %v2635_v22 }
  0x2f   : > { %2418 = vmatmul.mubr.msk.bf16.gmra.mrb[12].mxu0 %vm487_vm0, %v2481_v16  ;;  %2434 = vmatmul.mubr.msk.bf16.gmra.mrb[12].mxu1 %vm487_vm0, %v2483_v17 }
  0xea   : > { %v2407_v26 = vpop.f32.mrb[0].mxu0  ;;  %v2423_v32 = vpop.f32.mrb[0].mxu1 }
  0xeb   : > { %v579_v29 = vadd.f32 %v2407_v26, %v2635_v22  ;;  %v570_v30 = vpop.f32.mrb[1].mxu0  ;;  %v643_v37 = vadd.f32 %v2423_v32, %v2635_v22  ;;  %v634_v38 = vpop.f32.mrb[1].mxu1 }
  0xec   : > { %v571_v33 = vadd.f32 %v2635_v22, %v570_v30  ;;  %v2408_v35 = vpop.f32.mrb[2].mxu0  ;;  %v635_v43 = vadd.f32 %v2635_v22, %v634_v38  ;;  %v2424_v44 = vpop.f32.mrb[2].mxu1 }
  0xed   : > { %v699_v39 = vmax.f32 %v579_v29, 0.0  ;;  %v582_v41 = vadd.f32 %v2408_v35, %v2635_v22  ;;  %v573_v42 = vpop.f32.mrb[3].mxu0  ;;  %v715_v47 = vmax.f32 %v643_v37, 0.0  ;;  %v646_v48 = vadd.f32 %v2424_v44, %v2635_v22  ;;  %v637_v49 = vpop.f32.mrb[3].mxu1 }
  0xee   : > { %v697_v45 = vmax.f32 %v571_v33, 0.0  ;;  %v574_v46 = vadd.f32 %v2635_v22, %v573_v42  ;;  %v713_v57 = vmax.f32 %v635_v43, 0.0  ;;  %v638_v61 = vadd.f32 %v2635_v22, %v637_v49 }
  0xef   : > { %v731_v50 = vmin.f32 %v699_v39, 6.0  ;;  %v700_v51 = vmax.f32 %v582_v41, 0.0  ;;  %v747_v56 = vmin.f32 %v715_v47, 6.0  ;;  %v716_v60 = vmax.f32 %v646_v48, 0.0  ;;  %v2739_v47 = vld [vmem:[%s3673_s3 + $0x6] ss:$0 sm:$0xff] }
  0xf0   : > { %v729_v54 = vmin.f32 %v697_v45, 6.0  ;;  %v698_v55 = vmax.f32 %v574_v46, 0.0  ;;  %v745_v7 = vmin.f32 %v713_v57, 6.0  ;;  %v714_v13 = vmax.f32 %v638_v61, 0.0 }
  0xf1   : > { %818 = vst [vmem:[#allocation2 + $0x31] sm:$0xff] %v731_v50  ;;  %v732_v59 = vmin.f32 %v700_v51, 6.0  ;;  %834 = vst [vmem:[#allocation2 + $0xf1] sm:$0xff] %v747_v56  ;;  %v990_v4 = vmul.f32 %v2630_v21, %v731_v50  ;;  %v2669_v5 = vmul.f32 %v2657_v58, %v731_v50  ;;  %v2676_v10 = vmul.f32 %v2663_v62, %v731_v50 }
  0xf2   : > { %816 = vst [vmem:[#allocation2 + $0x19] sm:$0xff] %v729_v54  ;;  %v730_v63 = vmin.f32 %v698_v55, 6.0  ;;  %v2411_v0 = vpop.f32.mrb[4].mxu0  ;;  %v2665_v3 = vpop.f32.mrb[4].mxu1  ;;  %v748_v11 = vmin.f32 %v716_v60, 6.0  ;;  %v988_v16 = vmul.f32 %v2630_v21, %v729_v54  ;;  %v1289_v17 = vmul.f32 %v2657_v58, %v729_v54  ;;  %832 = vst [vmem:[#allocation2 + $0xd9] sm:$0xff] %v745_v7 }
  0xf3   : > { %819 = vst [vmem:[#allocation2 + $0x39] sm:$0xff] %v732_v59  ;;  %v586_v2 = vpop.f32.mrb[5].mxu0  ;;  %v2673_v9 = vpop.f32.mrb[5].mxu1  ;;  %v595_v12 = vadd.f32 %v2411_v0, %v2635_v22  ;;  %v2684_v18 = vmul.f32 %v2630_v21, %v732_v59  ;;  %v2687_v20 = vmul.f32 %v2630_v21, %v747_v56  ;;  %v2697_v25 = vmul.f32 %v2657_v58, %v732_v59 }
  0xf4   : > { %817 = vst [vmem:[#allocation2 + $0x21] sm:$0xff] %v730_v63  ;;  %v2412_v8 = vpop.f32.mrb[6].mxu0  ;;  %v2679_v15 = vpop.f32.mrb[6].mxu1  ;;  %v2700_v26 = vmul.f32 %v2663_v62, %v732_v59  ;;  %v2703_v27 = vmul.f32 %v2657_v58, %v747_v56  ;;  %835 = vst [vmem:[#allocation2 + $0xf9] sm:$0xff] %v748_v11  ;;  %v989_v31 = vmul.f32 %v2630_v21, %v730_v63  ;;  %v2706_v32 = vmin.f32 %v714_v13, 6.0 }
  0xf5   : > { %v589_v14 = vpop.f32.mrb[7].mxu0  ;;  %v2689_v23 = vpop.f32.mrb[7].mxu1  ;;  %v703_v29 = vmax.f32 %v595_v12, 0.0  ;;  %v2709_v33 = vadd.f32 %v2635_v22, %v586_v2  ;;  %v2712_v34 = vadd.f32 %v2412_v8, %v2635_v22  ;;  %v2716_v37 = vmul.f32 %v2657_v58, %v730_v63 }
  0xf6   : > { %v2719_v38 = vmul.f32 %v2663_v62, %v747_v56  ;;  %v2725_v43 = vmul.f32 %v2630_v21, %v745_v7  ;;  %v2728_v44 = vmul.f32 %v2657_v58, %v745_v7  ;;  %v2731_v45 = vmul.f32 %v2663_v62, %v745_v7  ;;  %833 = vst [vmem:[#allocation2 + $0xe1] sm:$0xff] %v2706_v32 }
  0xf7   : > { %v2721_v39 = vmin.f32 %v703_v29, 6.0  ;;  %v2745_v51 = vmul.f32 %v2630_v21, %v748_v11  ;;  %v2748_v52 = vmul.f32 %v2657_v58, %v748_v11  ;;  %v2751_v53 = vmul.f32 %v2663_v62, %v748_v11  ;;  %v2775_v11 = vld [vmem:[%s3673_s3 + $0x5] ss:$0 sm:$0xff] }
  0xf8   : > { %v852_v30 = vld [vmem:[#allocation2 + $0x30] sm:$0xff]  ;;  %3698 = vst [vmem:[#allocation4_spill] sm:$0xff] %v2719_v38  ;;  %3699 = vst [vmem:[#allocation5_spill] sm:$0xff] %v2728_v44  ;;  %v2761_v61 = vadd.f32 %v2635_v22, %v589_v14 }
  0xf9   : > { %v889_v35 = vmul.f32 %v2625_v19, %v852_v30  ;;  %v850_v36 = vld [vmem:[#allocation2 + $0x18] sm:$0xff]  ;;  %3700 = vst [vmem:[#allocation6_spill] sm:$0xff] %v2731_v45  ;;  %v2742_v50 = vld [vmem:[#allocation2 + $0xf0] sm:$0xff]  ;;  %3702 = vst [vmem:[#allocation8_spill] sm:$0xff] %v2751_v53  ;;  %v2768_v7 = vmul.f32 %v2694_v24, %v852_v30  ;;  %v1492_v29 = vmul.f32 %v2739_v47, %v852_v30 }
  0xfa   : > { %v1188_v40 = vmul.f32 %v2694_v24, %v850_v36  ;;  %v853_v41 = vld [vmem:[#allocation2 + $0x38] sm:$0xff]  ;;  %v2734_v46 = vpop.f32.mrb[8].mxu0  ;;  %v887_v48 = vmul.f32 %v2625_v19, %v850_v36  ;;  %822 = vst [vmem:[#allocation2 + $0x61] sm:$0xff] %v2721_v39  ;;  %v2756_v55 = vpop.f32.mrb[8].mxu1  ;;  %v905_v36 = vmul.f32 %v2625_v19, %v2742_v50  ;;  %v2791_v38 = vmul.f32 %v2694_v24, %v2742_v50 }
  0xfb   : > { %v1054_v42 = vld [vmem:[#allocation2 + $0x32] sm:$0xff]  ;;  %3701 = vst [vmem:[#allocation7_spill] sm:$0xff] %v2734_v46  ;;  %v851_v49 = vld [vmem:[#allocation2 + $0x20] sm:$0xff]  ;;  %v2754_v54 = vpop.f32.mrb[9].mxu0  ;;  %3704 = vst [vmem:[#allocation10_spill] sm:$0xff] %v2756_v55  ;;  %v2765_v0 = vpop.f32.mrb[9].mxu1  ;;  %v1022_v2 = vadd.f32 %v990_v4, %v889_v35  ;;  %v890_v8 = vmul.f32 %v2625_v19, %v853_v41  ;;  %v1191_v30 = vmul.f32 %v2694_v24, %v853_v41 }
  0xfc   : > { %3703 = vst [vmem:[#allocation9_spill] sm:$0xff] %v2754_v54  ;;  %v1220_v56 = vadd.f32 %v1188_v40, %v1119_v1  ;;  %v1055_v57 = vld [vmem:[#allocation2 + $0x3a] sm:$0xff]  ;;  %v2763_v63 = vpop.f32.mrb[10].mxu0  ;;  %3706 = vst [vmem:[#allocation12_spill] sm:$0xff] %v2765_v0  ;;  %v1091_v1 = vmul.f32 %v2642_v28, %v1054_v42  ;;  %v2779_v14 = vpop.f32.mrb[10].mxu1  ;;  %v888_v35 = vmul.f32 %v2625_v19, %v851_v49  ;;  %v1053_v45 = vld [vmem:[#allocation2 + $0x22] sm:$0xff] }
  0xfd   : > { %3705 = vst [vmem:[#allocation11_spill] sm:$0xff] %v2763_v63  ;;  %v1052_v12 = vld [vmem:[#allocation2 + $0x1a] sm:$0xff]  ;;  %v2777_v13 = vpop.f32.mrb[11].mxu0  ;;  %3708 = vst [vmem:[#allocation14_spill] sm:$0xff] %v2779_v14  ;;  %v2785_v40 = vpop.f32.mrb[11].mxu1  ;;  %v1020_v60 = vadd.f32 %v988_v16, %v887_v48  ;;  %v1092_v59 = vmul.f32 %v2642_v28, %v1055_v57  ;;  %v1189_v53 = vmul.f32 %v2694_v24, %v851_v49 }
  0xfe   : > { %3707 = vst [vmem:[#allocation13_spill] sm:$0xff] %v2777_v13  ;;  %v1321_v4 = vadd.f32 %v1289_v17, %v1220_v56  ;;  %3709 = vst [vmem:[#allocation15_spill] sm:$0xff] %v2785_v40  ;;  %v2797_v17 = vld [vmem:[%s3673_s3 + $0x8] ss:$0 sm:$0xff]  ;;  %v1021_v56 = vadd.f32 %v989_v31, %v888_v35  ;;  %v1089_v44 = vmul.f32 %v2642_v28, %v1052_v12  ;;  %v869_v48 = vld [vmem:[#allocation2 + $0xf8] sm:$0xff] }
  0xff   : > { %v1390_v16 = vmul.f32 %v2775_v11, %v1052_v12  ;;  %v1023_v40 = vadd.f32 %v2684_v18, %v890_v8  ;;  %v2802_v49 = vadd.f32 %v1091_v1, %v1022_v2  ;;  %v2805_v14 = vmul.f32 %v2775_v11, %v1054_v42  ;;  %v866_v55 = vld [vmem:[#allocation2 + $0xd8] sm:$0xff] }
 0x100   : > { %v1221_v0 = vadd.f32 %v1189_v53, %v2671_v6  ;;  %v2809_v13 = vmul.f32 %v2775_v11, %v1055_v57  ;;  %v1493_v31 = vmul.f32 %v2739_v47, %v853_v41  ;;  %v1090_v35 = vmul.f32 %v2642_v28, %v1053_v45  ;;  %v1070_v12 = vld [vmem:[#allocation2 + $0xf2] sm:$0xff] }
 0x101   : > { %3710 = vst [vmem:[#allocation16_spill] sm:$0xff] %v2802_v49  ;;  %v1422_v63 = vadd.f32 %v1390_v16, %v1321_v4  ;;  %v1694_v18 = vmul.f32 %v2797_v17, %v1054_v42  ;;  %v1391_v8 = vmul.f32 %v2775_v11, %v1053_v45  ;;  %v906_v6 = vmul.f32 %v2625_v19, %v869_v48  ;;  %v1071_v16 = vld [vmem:[#allocation2 + $0xfa] sm:$0xff] }
 0x102   : > { %3711 = vst [vmem:[#allocation17_spill] sm:$0xff] %v2809_v13  ;;  %v2813_v54 = vpop.f32.mrb[12].mxu0  ;;  %v1322_v2 = vadd.f32 %v2716_v37, %v1221_v0  ;;  %v2821_v1 = vpop.f32.mrb[12].mxu1  ;;  %v1121_v46 = vadd.f32 %v1089_v44, %v1020_v60  ;;  %v1122_v41 = vadd.f32 %v1090_v35, %v1021_v56  ;;  %v903_v4 = vmul.f32 %v2625_v19, %v866_v55  ;;  %v1068_v35 = vld [vmem:[#allocation2 + $0xda] sm:$0xff] }
 0x103   : > { %3712 = vst [vmem:[#allocation18_spill] sm:$0xff] %v2813_v54  ;;  %v2819_v53 = vpop.f32.mrb[13].mxu0  ;;  %3714 = vst [vmem:[#allocation20_spill] sm:$0xff] %v2821_v1  ;;  %v1524_v49 = vadd.f32 %v1492_v29, %v1422_v63  ;;  %v2826_v54 = vpop.f32.mrb[13].mxu1  ;;  %v1695_v37 = vmul.f32 %v2797_v17, %v1055_v57  ;;  %v1038_v45 = vadd.f32 %v2687_v20, %v905_v36 }
 0x104   : > { %3713 = vst [vmem:[#allocation19_spill] sm:$0xff] %v2819_v53  ;;  %v2824_v13 = vpop.f32.mrb[14].mxu0  ;;  %3716 = vst [vmem:[#allocation22_spill] sm:$0xff] %v2826_v54  ;;  %v1423_v42 = vadd.f32 %v1391_v8, %v1322_v2  ;;  %v1107_v0 = vmul.f32 %v2642_v28, %v1070_v12  ;;  %v2833_v1 = vpop.f32.mrb[14].mxu1  ;;  %v2835_v44 = vadd.f32 %v1092_v59, %v1023_v40  ;;  %v867_v40 = vld [vmem:[#allocation2 + $0xe0] sm:$0xff] }
 0x105   : > { %3715 = vst [vmem:[#allocation21_spill] sm:$0xff] %v2824_v13  ;;  %v2831_v53 = vpop.f32.mrb[15].mxu0  ;;  %3718 = vst [vmem:[#allocation24_spill] sm:$0xff] %v2833_v1  ;;  %v1625_v60 = vadd.f32 %v2676_v10, %v1524_v49  ;;  %v2840_v63 = vmul.f32 %v2739_v47, %v2742_v50  ;;  %v2843_v29 = vmul.f32 %v2694_v24, %v866_v55  ;;  %v2845_v57 = vpop.f32.mrb[15].mxu1  ;;  %v1069_v8 = vld [vmem:[#allocation2 + $0xe2] sm:$0xff] }
 0x106   : > { %3717 = vst [vmem:[#allocation23_spill] sm:$0xff] %v2831_v53  ;;  %3721 = vst [vmem:[#allocation27_spill] sm:$0xff] %v2845_v57  ;;  %v1525_v20 = vadd.f32 %v1493_v31, %v1423_v42  ;;  %v2848_v36 = vmul.f32 %v2739_v47, %v866_v55  ;;  %v1039_v56 = vadd.f32 %v2745_v51, %v906_v6  ;;  %v856_v6 = vld [vmem:[#allocation2 + $0x60] sm:$0xff] }
 0x107   : > { %3719 = vst [vmem:[#allocation25_spill] sm:$0xff] %v2840_v63  ;;  %3720 = vst [vmem:[#allocation26_spill] sm:$0xff] %v2843_v29  ;;  %v1108_v59 = vmul.f32 %v2642_v28, %v1071_v16  ;;  %v1222_v10 = vadd.f32 %v2768_v7, %v1121_v46  ;;  %v1223_v49 = vadd.f32 %v1191_v30, %v1122_v41  ;;  %v3741_v63 = vld [vmem:[#allocation11_spill] sm:$0xff] }
 0x108   : > { %3722 = vst [vmem:[#allocation28_spill] sm:$0xff] %v2848_v36  ;;  %v1036_v50 = vadd.f32 %v2725_v43, %v903_v4  ;;  %v1207_v2 = vmul.f32 %v2694_v24, %v869_v48  ;;  %v1626_v57 = vadd.f32 %v2700_v26, %v1525_v20  ;;  %v2856_v31 = vadd.f32 %v1107_v0, %v1038_v45 }
 0x109   : > { %v2859_v55 = vmul.f32 %v2775_v11, %v1070_v12  ;;  %v2862_v51 = vmul.f32 %v2775_v11, %v1071_v16  ;;  %v2865_v42 = vmul.f32 %v2739_v47, %v869_v48  ;;  %v904_v46 = vmul.f32 %v2625_v19, %v867_v40 }
 0x10a   : > { %v1005_v43 = vmul.f32 %v2630_v21, %v2706_v32  ;;  %v1105_v7 = vmul.f32 %v2642_v28, %v1068_v35  ;;  %v2871_v26 = vadd.f32 %v1108_v59, %v1039_v56  ;;  %v2874_v30 = vmul.f32 %v2797_v17, %v1070_v12 }
 0x10b   : > { %3723 = vst [vmem:[#allocation29_spill] sm:$0xff] %v2865_v42  ;;  %v2877_v41 = vmul.f32 %v2797_v17, %v1071_v16  ;;  %v1106_v4 = vmul.f32 %v2642_v28, %v1069_v8  ;;  %v1726_v45 = vadd.f32 %v1694_v18, %v1625_v60  ;;  %v893_v48 = vmul.f32 %v2625_v19, %v856_v6 }
 0x10c   : > { %3724 = vst [vmem:[#allocation30_spill] sm:$0xff] %v2874_v30  ;;  %v1037_v0 = vadd.f32 %v1005_v43, %v904_v46  ;;  %v1137_v20 = vadd.f32 %v1105_v7, %v1036_v50  ;;  %v994_v1 = vmul.f32 %v2630_v21, %v2721_v39  ;;  %v2884_v54 = vmul.f32 %v2694_v24, %v856_v6  ;;  %v2899_v46 = vld [vmem:[%s3674_s4] ss:$0 sm:$0xff] }
 0x10d   : > { %3725 = vst [vmem:[#allocation31_spill] sm:$0xff] %v2877_v41  ;;  %v2888_v12 = vmul.f32 %v2657_v58, %v2721_v39  ;;  %v2891_v16 = vmul.f32 %v2739_v47, %v856_v6  ;;  %v1727_v56 = vadd.f32 %v1695_v37, %v1626_v57  ;;  %v3726_v18 = vmax.f32 %v2709_v33, 0.0 }
 0x10e   : > { %v1138_v59 = vadd.f32 %v1106_v4, %v1037_v0  ;;  %v1323_v50 = vadd.f32 %v2669_v5, %v1222_v10  ;;  %v1238_v43 = vadd.f32 %v2791_v38, %v1137_v20  ;;  %v3727_v7 = vmax.f32 %v2712_v34, 0.0 }
 0x10f   : > { %v733_v60 = vmin.f32 %v3726_v18, 6.0  ;;  %v702_v6 = vmax.f32 %v2761_v61, 0.0  ;;  %v1324_v37 = vadd.f32 %v2697_v25, %v1223_v49  ;;  %v2906_v57 = vadd.f32 %v994_v1, %v893_v48 }
 0x110   : > { %v736_v36 = vmin.f32 %v3727_v7, 6.0  ;;  %v2910_v5 = vmul.f32 %v2663_v62, %v2721_v39  ;;  %v2913_v33 = vmul.f32 %v2694_v24, %v867_v40  ;;  %v2917_v38 = vmul.f32 %v2657_v58, %v2706_v32 }
 0x111   : > { %820 = vst [vmem:[#allocation2 + $0x49] sm:$0xff] %v733_v60  ;;  %v2920_v34 = vmul.f32 %v2775_v11, %v1068_v35  ;;  %v2923_v61 = vmul.f32 %v2775_v11, %v1069_v8  ;;  %v2926_v25 = vmul.f32 %v2739_v47, %v867_v40  ;;  %v2929_v39 = vadd.f32 %v2899_v46, %v1726_v45 }
 0x112   : > { %3728 = vst [vmem:[#allocation32_spill] sm:$0xff] %v2913_v33  ;;  %3729 = vst [vmem:[#allocation33_spill] sm:$0xff] %v2917_v38  ;;  %v1239_v1 = vadd.f32 %v1207_v2, %v1138_v59  ;;  %v734_v10 = vmin.f32 %v702_v6, 6.0  ;;  %v2932_v49 = vadd.f32 %v2899_v46, %v1727_v56  ;;  %v659_v4 = vadd.f32 %v2665_v3, %v2635_v22 }
 0x113   : > { %3730 = vst [vmem:[#allocation34_spill] sm:$0xff] %v2920_v34  ;;  %3731 = vst [vmem:[#allocation35_spill] sm:$0xff] %v2923_v61  ;;  %v651_v40 = vadd.f32 %v2635_v22, %v2673_v9  ;;  %v1339_v45 = vadd.f32 %v2703_v27, %v1238_v43  ;;  %v662_v2 = vadd.f32 %v2679_v15, %v2635_v22 }
 0x114   : > { %3732 = vst [vmem:[#allocation36_spill] sm:$0xff] %v2926_v25  ;;  %823 = vst [vmem:[#allocation2 + $0x69] sm:$0xff] %v736_v36  ;;  %v654_v48 = vadd.f32 %v2635_v22, %v2689_v23  ;;  %v2952_v3 = vmul.f32 %v2663_v62, %v2706_v32  ;;  %v2955_v0 = vmul.f32 %v2797_v17, %v1068_v35  ;;  %v719_v15 = vmax.f32 %v659_v4, 0.0 }
 0x115   : > { %v2958_v20 = vmul.f32 %v2797_v17, %v1069_v8  ;;  %821 = vst [vmem:[#allocation2 + $0x51] sm:$0xff] %v734_v10  ;;  %v2291_v9 = vpack.c.bf16 %v2932_v49, %v2929_v39  ;;  %v992_v27 = vmul.f32 %v2630_v21, %v733_v60  ;;  %v717_v56 = vmax.f32 %v651_v40, 0.0 }
 0x116   : > { %3733 = vst [vmem:[#allocation37_spill] sm:$0xff] %v2952_v3  ;;  %3734 = vst [vmem:[#allocation38_spill] sm:$0xff] %v2955_v0  ;;  %v720_v59 = vmax.f32 %v662_v2, 0.0  ;;  %v1293_v23 = vmul.f32 %v2657_v58, %v733_v60  ;;  %v1424_v32 = vadd.f32 %v2805_v14, %v1323_v50  ;;  %v718_v18 = vmax.f32 %v654_v48, 0.0  ;;  %v3737_v48 = vld [vmem:[#allocation17_spill] sm:$0xff] }
 0x117   : > { %3735 = vst [vmem:[#allocation39_spill] sm:$0xff] %v2958_v20  ;;  %2292 = vst [vmem:[%s2941_s14] sm:$0xff] %v2291_v9   ;;  %v2967_v35 = vadd.f32 %v2748_v52, %v1239_v1  ;;  %v1595_v43 = vmul.f32 %v2663_v62, %v733_v60  ;;  %v2970_v7 = vmin.f32 %v719_v15, 6.0  ;;  %v2972_v6 = vmin.f32 %v717_v56, 6.0  ;;  %v3738_v56 = vld [vmem:[#allocation16_spill] sm:$0xff] }
 0x118   : > { %v854_v8 = vld [vmem:[#allocation2 + $0x48] sm:$0xff]  ;;  %v2974_v20 = vmin.f32 %v720_v59, 6.0  ;;  %v995_v14 = vmul.f32 %v2630_v21, %v736_v36  ;;  %v2979_v50 = vmin.f32 %v718_v18, 6.0  ;;  %v2982_v52 = vmul.f32 %v2657_v58, %v736_v36 }
 0x119   : > { %v1192_v4 = vmul.f32 %v2694_v24, %v854_v8  ;;  %v1494_v40 = vmul.f32 %v2739_v47, %v854_v8  ;;  %v2985_v60 = vmul.f32 %v2663_v62, %v736_v36  ;;  %v993_v1 = vmul.f32 %v2630_v21, %v734_v10  ;;  %838 = vst [vmem:[#allocation2 + $0x121] sm:$0xff] %v2970_v7 }
 0x11a   : > { %3736 = vst [vmem:[#allocation40_spill] sm:$0xff] %v2982_v52  ;;  %v1425_v9 = vadd.f32 %v3737_v48, %v1324_v37  ;;  %836 = vst [vmem:[#allocation2 + $0x109] sm:$0xff] %v2972_v6  ;;  %v891_v15 = vmul.f32 %v2625_v19, %v854_v8  ;;  %v1294_v36 = vmul.f32 %v2657_v58, %v734_v10  ;;  %v3739_v8 = vld [vmem:[#allocation7_spill] sm:$0xff] }
 0x11b   : > { %v857_v2 = vld [vmem:[#allocation2 + $0x68] sm:$0xff]  ;;  %839 = vst [vmem:[#allocation2 + $0x129] sm:$0xff] %v2974_v20  ;;  %v1224_v59 = vadd.f32 %v1192_v4, %v3738_v56  ;;  %v1526_v18 = vadd.f32 %v1494_v40, %v1424_v32  ;;  %837 = vst [vmem:[#allocation2 + $0x111] sm:$0xff] %v2979_v50  ;;  %v1596_v41 = vmul.f32 %v2663_v62, %v734_v10  ;;  %v3740_v56 = vld [vmem:[#allocation9_spill] sm:$0xff] }
 0x11c   : > { %v2994_v0 = vld [vmem:[#allocation2 + $0x62] sm:$0xff]  ;;  %v2996_v3 = vld [vmem:[#allocation2 + $0x6a] sm:$0xff]  ;;  %v894_v37 = vmul.f32 %v2625_v19, %v857_v2  ;;  %v1440_v30 = vadd.f32 %v2859_v55, %v1339_v45  ;;  %v3005_v4 = vadd.f32 %v3739_v8, %v2635_v22  ;;  %v3009_v42 = vadd.f32 %v2635_v22, %v3740_v56 }
 0x11d   : > { %v855_v48 = vld [vmem:[#allocation2 + $0x50] sm:$0xff]  ;;  %v1325_v32 = vadd.f32 %v1293_v23, %v1224_v59  ;;  %v1627_v40 = vadd.f32 %v1595_v43, %v1526_v18  ;;  %v3013_v61 = vadd.f32 %v3741_v63, %v2635_v22  ;;  %v1095_v34 = vmul.f32 %v2642_v28, %v2994_v0 }
 0x11e   : > { %v1056_v25 = vld [vmem:[#allocation2 + $0x4a] sm:$0xff]  ;;  %v3019_v55 = vmul.f32 %v2642_v28, %v2996_v3  ;;  %v3022_v10 = vmul.f32 %v2694_v24, %v857_v2  ;;  %v892_v45 = vmul.f32 %v2625_v19, %v855_v48  ;;  %v1024_v23 = vadd.f32 %v992_v27, %v891_v15  ;;  %v1057_v43 = vld [vmem:[#allocation2 + $0x52] sm:$0xff] }
 0x11f   : > { %v1193_v59 = vmul.f32 %v2694_v24, %v855_v48  ;;  %v1394_v18 = vmul.f32 %v2775_v11, %v1056_v25  ;;  %v1495_v63 = vmul.f32 %v2739_v47, %v855_v48  ;;  %v3028_v8 = vadd.f32 %v995_v14, %v894_v37 }
 0x120   : > { %3742 = vst [vmem:[#allocation17_spill] sm:$0xff] %v3019_v55  ;;  %v3032_v56 = vmul.f32 %v2775_v11, %v2994_v0  ;;  %v1093_v38 = vmul.f32 %v2642_v28, %v1056_v25  ;;  %v1696_v33 = vmul.f32 %v2797_v17, %v1056_v25  ;;  %v872_v53 = vld [vmem:[#allocation2 + $0x120] sm:$0xff]  ;;  %v1010_v13 = vmul.f32 %v2630_v21, %v2970_v7 }
 0x121   : > { %v1225_v29 = vadd.f32 %v1193_v59, %v2835_v44  ;;  %v1426_v27 = vadd.f32 %v1394_v18, %v1325_v32  ;;  %v1527_v15 = vadd.f32 %v1495_v63, %v1425_v9  ;;  %v1025_v52 = vadd.f32 %v993_v1, %v892_v45  ;;  %v870_v1 = vld [vmem:[#allocation2 + $0x108] sm:$0xff] }
 0x122   : > { %3743 = vst [vmem:[#allocation16_spill] sm:$0xff] %v3032_v56  ;;  %v1395_v14 = vmul.f32 %v2775_v11, %v1057_v43  ;;  %v1728_v37 = vadd.f32 %v1696_v33, %v1627_v40  ;;  %v909_v48 = vmul.f32 %v2625_v19, %v872_v53  ;;  %v1697_v25 = vmul.f32 %v2797_v17, %v1057_v43 }
 0x123   : > { %v1326_v22 = vadd.f32 %v1294_v36, %v1225_v29  ;;  %v1528_v56 = vadd.f32 %v2891_v16, %v1426_v27  ;;  %v1628_v55 = vadd.f32 %v1596_v41, %v1527_v15  ;;  %v3044_v44 = vadd.f32 %v1095_v34, %v2906_v57 }
 0x124   : > { %v1094_v9 = vmul.f32 %v2642_v28, %v1057_v43  ;;  %v1767_v32 = vadd.f32 %v2899_v46, %v1728_v37  ;;  %v1042_v59 = vadd.f32 %v1010_v13, %v909_v48  ;;  %v1497_v45 = vmul.f32 %v2739_v47, %v857_v2 }
 0x125   : > { %v1427_v33 = vadd.f32 %v1395_v14, %v1326_v22  ;;  %v1629_v40 = vadd.f32 %v2910_v5, %v1528_v56  ;;  %v1729_v29 = vadd.f32 %v1697_v25, %v1628_v55  ;;  %v3052_v41 = vmul.f32 %v2775_v11, %v2996_v3  ;;  %v3060_v22 = vld [vmem:[#allocation2 + $0x128] sm:$0xff] }
 0x126   : > { %v1125_v16 = vadd.f32 %v1093_v38, %v1024_v23  ;;  %v1126_v36 = vadd.f32 %v1094_v9, %v1025_v52  ;;  %v3055_v57 = vadd.f32 %v1767_v32, %v2929_v39  ;;  %v907_v13 = vmul.f32 %v2625_v19, %v870_v1  ;;  %v3062_v5 = vld [vmem:[#allocation2 + $0x122] sm:$0xff]  ;;  %v3071_v23 = vld [vmem:[#allocation2 + $0x12a] sm:$0xff] }
 0x127   : > { %v1529_v34 = vadd.f32 %v1497_v45, %v1427_v33  ;;  %v1768_v43 = vadd.f32 %v2899_v46, %v1729_v29  ;;  %v1208_v2 = vmul.f32 %v2694_v24, %v870_v1  ;;  %v1008_v55 = vmul.f32 %v2630_v21, %v2972_v6  ;;  %v1072_v29 = vld [vmem:[#allocation2 + $0x10a] sm:$0xff] }
 0x128   : > { %v1309_v38 = vmul.f32 %v2657_v58, %v2972_v6  ;;  %v1510_v39 = vmul.f32 %v2739_v47, %v870_v1  ;;  %v1611_v52 = vmul.f32 %v2663_v62, %v2972_v6  ;;  %v910_v14 = vmul.f32 %v2625_v19, %v3060_v22  ;;  %v871_v1 = vld [vmem:[#allocation2 + $0x110] sm:$0xff] }
 0x129   : > { %v3074_v18 = vadd.f32 %v2985_v60, %v1529_v34  ;;  %v2296_v63 = vpack.c.bf16 %v1768_v43, %v1767_v32  ;;  %v3077_v56 = vadd.f32 %v1768_v43, %v2932_v49  ;;  %v1240_v27 = vadd.f32 %v1208_v2, %v2856_v31 }
 0x12a   : > { %v1542_v15 = vadd.f32 %v1510_v39, %v1440_v30  ;;  %v1011_v37 = vmul.f32 %v2630_v21, %v2974_v20  ;;  %v1111_v6 = vmul.f32 %v2642_v28, %v3062_v5  ;;  %v1698_v60 = vmul.f32 %v2797_v17, %v2994_v0 }
 0x12b   : > { %v1699_v48 = vmul.f32 %v2797_v17, %v2996_v3  ;;  %2368 = vst [vmem:[%s2941_s14 + $0x8] sm:$0xff] %v2296_v63   ;;  %v1341_v49 = vadd.f32 %v1309_v38, %v1240_v27  ;;  %v1112_v31 = vmul.f32 %v2642_v28, %v3071_v23  ;;  %v1226_v30 = vadd.f32 %v2884_v54, %v1125_v16 }
 0x12c   : > { %v1643_v25 = vadd.f32 %v1611_v52, %v1542_v15  ;;  %v1043_v9 = vadd.f32 %v1011_v37, %v910_v14  ;;  %v3094_v32 = vadd.f32 %v1111_v6, %v1042_v59  ;;  %v1227_v45 = vadd.f32 %v3022_v10, %v1126_v36 }
 0x12d   : > { %v1210_v33 = vmul.f32 %v2694_v24, %v872_v53  ;;  %v1512_v0 = vmul.f32 %v2739_v47, %v872_v53  ;;  %v1613_v3 = vmul.f32 %v2663_v62, %v2970_v7  ;;  %v1730_v34 = vadd.f32 %v1698_v60, %v1629_v40  ;;  %v1073_v53 = vld [vmem:[#allocation2 + $0x112] sm:$0xff] }
 0x12e   : > { %3744 = vst [vmem:[#allocation7_spill] sm:$0xff] %v3094_v32  ;;  %v1040_v43 = vadd.f32 %v1008_v55, %v907_v13  ;;  %v3101_v2 = vadd.f32 %v1112_v31, %v1043_v9  ;;  %v1513_v54 = vmul.f32 %v2739_v47, %v3060_v22  ;;  %v1614_v59 = vmul.f32 %v2663_v62, %v2974_v20 }
 0x12f   : > { %v908_v10 = vmul.f32 %v2625_v19, %v871_v1  ;;  %v1009_v16 = vmul.f32 %v2630_v21, %v2979_v50  ;;  %v1209_v36 = vmul.f32 %v2694_v24, %v871_v1  ;;  %v1714_v40 = vmul.f32 %v2797_v17, %v3062_v5 }
 0x130   : > { %3745 = vst [vmem:[#allocation9_spill] sm:$0xff] %v3101_v2  ;;  %v1310_v13 = vmul.f32 %v2657_v58, %v2979_v50  ;;  %v1410_v55 = vmul.f32 %v2775_v11, %v1072_v29  ;;  %v1441_v38 = vadd.f32 %v2862_v51, %v2967_v35  ;;  %v1109_v39 = vmul.f32 %v2642_v28, %v1072_v29 }
 0x131   : > { %v1241_v52 = vadd.f32 %v1209_v36, %v2871_v26  ;;  %v1411_v63 = vmul.f32 %v2775_v11, %v1073_v53  ;;  %v1511_v27 = vmul.f32 %v2739_v47, %v871_v1  ;;  %v1110_v15 = vmul.f32 %v2642_v28, %v1073_v53 }
 0x132   : > { %v1442_v14 = vadd.f32 %v1410_v55, %v1341_v49  ;;  %v1612_v37 = vmul.f32 %v2663_v62, %v2979_v50  ;;  %v1712_v6 = vmul.f32 %v2797_v17, %v1072_v29  ;;  %v1041_v60 = vadd.f32 %v1009_v16, %v908_v10 }
 0x133   : > { %v1342_v31 = vadd.f32 %v1310_v13, %v1241_v52  ;;  %v1543_v9 = vadd.f32 %v1511_v27, %v1441_v38  ;;  %v1713_v51 = vmul.f32 %v2797_v17, %v1073_v53  ;;  %v707_v26 = vmax.f32 %v3005_v4, 0.0  ;;  %v3750_v52 = vld [vmem:[#allocation3_spill] sm:$0xff] }
 0x134   : > { %v1544_v35 = vadd.f32 %v1512_v0, %v1442_v14  ;;  %v1744_v2 = vadd.f32 %v1712_v6, %v1643_v25  ;;  %v705_v36 = vmax.f32 %v3009_v42, 0.0  ;;  %v1715_v1 = vmul.f32 %v2797_v17, %v3071_v23  ;;  %v3747_v42 = vld [vmem:[#allocation17_spill] sm:$0xff]  ;;  %v3755_v6 = vld [vmem:[#allocation10_spill] sm:$0xff] }
 0x135   : > { %v1443_v49 = vadd.f32 %v1411_v63, %v1342_v31  ;;  %v1644_v55 = vadd.f32 %v1612_v37, %v1543_v9  ;;  %v1327_v50 = vadd.f32 %v2888_v12, %v1226_v30  ;;  %v1141_v32 = vadd.f32 %v1109_v39, %v1040_v43  ;;  %v3749_v39 = vld [vmem:[#allocation13_spill] sm:$0xff] }
 0x136   : > { %v1645_v29 = vadd.f32 %v1613_v3, %v1544_v35  ;;  %v739_v10 = vmin.f32 %v707_v26, 6.0  ;;  %v737_v16 = vmin.f32 %v705_v36, 6.0  ;;  %v3133_v0 = vadd.f32 %v2899_v46, %v1744_v2 }
 0x137   : > { %v1545_v13 = vadd.f32 %v1513_v54, %v1443_v49  ;;  %v1745_v38 = vadd.f32 %v1713_v51, %v1644_v55  ;;  %v708_v4 = vmax.f32 %v3013_v61, 0.0  ;;  %v3138_v25 = vadd.f32 %v3747_v42, %v3028_v8 }
 0x138   : > { %3746 = vst [vmem:[#allocation11_spill] sm:$0xff] %v3133_v0  ;;  %v1311_v53 = vmul.f32 %v2657_v58, %v2970_v7  ;;  %v1211_v12 = vmul.f32 %v2694_v24, %v3060_v22  ;;  %v1142_v30 = vadd.f32 %v1110_v15, %v1041_v60  ;;  %826 = vst [vmem:[#allocation2 + $0x91] sm:$0xff] %v739_v10 }
 0x139   : > { %824 = vst [vmem:[#allocation2 + $0x79] sm:$0xff] %v737_v16  ;;  %v1731_v3 = vadd.f32 %v1699_v48, %v3074_v18  ;;  %v1646_v43 = vadd.f32 %v1614_v59, %v1545_v13  ;;  %v1746_v2 = vadd.f32 %v1714_v40, %v1645_v29  ;;  %v3146_v54 = vadd.f32 %v2899_v46, %v1745_v38  ;;  %v3751_v18 = vld [vmem:[#allocation40_spill] sm:$0xff] }
 0x13a   : > { %v3150_v61 = vmul.f32 %v2657_v58, %v2974_v20  ;;  %v1242_v8 = vadd.f32 %v1210_v33, %v1141_v32  ;;  %v740_v7 = vmin.f32 %v708_v4, 6.0  ;;  %v606_v22 = vadd.f32 %v3750_v52, %v3749_v39 }
 0x13b   : > { %3748 = vst [vmem:[#allocation17_spill] sm:$0xff] %v3146_v54  ;;  %v1747_v63 = vadd.f32 %v1715_v1, %v1646_v43  ;;  %v2336_v27 = vpack.c.bf16 %v3146_v54, %v3133_v0  ;;  %v1328_v48 = vadd.f32 %v3751_v18, %v1227_v45  ;;  %v1769_v59 = vadd.f32 %v2899_v46, %v1730_v34  ;;  %v3754_v34 = vld [vmem:[#allocation16_spill] sm:$0xff]  ;;  %v3775_v0 = vld [vmem:[#allocation9_spill] sm:$0xff] }
 0x13c   : > { %v3160_v40 = vmul.f32 %v2775_v11, %v3062_v5  ;;  %v3164_v20 = vmul.f32 %v2775_v11, %v3071_v23  ;;  %v3166_v32 = vadd.f32 %v1211_v12, %v1142_v30  ;;  %827 = vst [vmem:[#allocation2 + $0x99] sm:$0xff] %v740_v7  ;;  %v706_v33 = vmax.f32 %v606_v22, 0.0 }
 0x13d   : > { %v3169_v15 = vadd.f32 %v2899_v46, %v1746_v2  ;;  %v3172_v14 = vadd.f32 %v2899_v46, %v1747_v63  ;;  %2376 = vst [vmem:[%s2941_s14 + $0x48] sm:$0xff] %v2336_v27   ;;  %v1770_v45 = vadd.f32 %v2899_v46, %v1731_v3  ;;  %v3177_v5 = vadd.f32 %v3055_v57, %v1769_v59  ;;  %v3756_v57 = vld [vmem:[#allocation12_spill] sm:$0xff]  ;;  %v3757_v27 = vld [vmem:[#allocation14_spill] sm:$0xff] }
 0x13e   : > { %v1428_v23 = vadd.f32 %v3754_v34, %v1327_v50  ;;  %v738_v37 = vmin.f32 %v706_v33, 6.0  ;;  %v675_v60 = vadd.f32 %v3755_v6, %v3750_v52  ;;  %v1343_v31 = vadd.f32 %v1311_v53, %v1242_v8 }
 0x13f   : > { %3752 = vst [vmem:[#allocation13_spill] sm:$0xff] %v3169_v15  ;;  %3753 = vst [vmem:[#allocation3_spill] sm:$0xff] %v3172_v14  ;;  %v2341_v9 = vpack.c.bf16 %v3172_v14, %v3169_v15  ;;  %v860_v51 = vld [vmem:[#allocation2 + $0x90] sm:$0xff]  ;;  %v2301_v26 = vpack.c.bf16 %v1770_v45, %v1769_v59  ;;  %v3185_v36 = vadd.f32 %v3077_v56, %v1770_v45 }
 0x140   : > { %v858_v35 = vld [vmem:[#allocation2 + $0x78] sm:$0xff]  ;;  %v667_v1 = vadd.f32 %v3750_v52, %v3756_v57  ;;  %v998_v49 = vmul.f32 %v2630_v21, %v739_v10  ;;  %v3191_v55 = vmul.f32 %v2657_v58, %v739_v10  ;;  %v3194_v50 = vmul.f32 %v2663_v62, %v739_v10  ;;  %825 = vst [vmem:[#allocation2 + $0x81] sm:$0xff] %v738_v37 }
 0x141   : > { %v996_v29 = vmul.f32 %v2630_v21, %v737_v16  ;;  %2377 = vst [vmem:[%s2941_s14 + $0x50] sm:$0xff] %v2341_v9   ;;  %v1196_v13 = vmul.f32 %v2694_v24, %v858_v35  ;;  %v1297_v56 = vmul.f32 %v2657_v58, %v737_v16  ;;  %v1498_v38 = vmul.f32 %v2739_v47, %v858_v35 }
 0x142   : > { %v1599_v4 = vmul.f32 %v2663_v62, %v737_v16  ;;  %2369 = vst [vmem:[%s2941_s14 + $0x10] sm:$0xff] %v2301_v26   ;;  %v897_v42 = vmul.f32 %v2625_v19, %v860_v51  ;;  %v895_v53 = vmul.f32 %v2625_v19, %v858_v35  ;;  %v999_v10 = vmul.f32 %v2630_v21, %v740_v7 }
 0x143   : > { %v3207_v12 = vmul.f32 %v2657_v58, %v740_v7  ;;  %v1228_v30 = vadd.f32 %v1196_v13, %v3044_v44  ;;  %v1530_v3 = vadd.f32 %v1498_v38, %v1428_v23  ;;  %v861_v43 = vld [vmem:[#allocation2 + $0x98] sm:$0xff]  ;;  %v723_v8 = vmax.f32 %v675_v60, 0.0 }
 0x144   : > { %v1062_v2 = vld [vmem:[#allocation2 + $0x92] sm:$0xff]  ;;  %v721_v39 = vmax.f32 %v667_v1, 0.0  ;;  %v3211_v22 = vmul.f32 %v2694_v24, %v860_v51  ;;  %v3214_v16 = vmul.f32 %v2663_v62, %v740_v7  ;;  %v1429_v63 = vadd.f32 %v3052_v41, %v1328_v48  ;;  %v1063_v45 = vld [vmem:[#allocation2 + $0x9a] sm:$0xff] }
 0x145   : > { %v678_v18 = vadd.f32 %v3757_v27, %v3750_v52  ;;  %v1500_v59 = vmul.f32 %v2739_v47, %v860_v51  ;;  %v1329_v33 = vadd.f32 %v1297_v56, %v1228_v30  ;;  %v1631_v44 = vadd.f32 %v1599_v4, %v1530_v3 }
 0x146   : > { %v997_v34 = vmul.f32 %v2630_v21, %v738_v37  ;;  %v1030_v23 = vadd.f32 %v998_v49, %v897_v42  ;;  %v898_v6 = vmul.f32 %v2625_v19, %v861_v43  ;;  %v1099_v60 = vmul.f32 %v2642_v28, %v1062_v2 }
 0x147   : > { %v1298_v7 = vmul.f32 %v2657_v58, %v738_v37  ;;  %v1028_v9 = vadd.f32 %v996_v29, %v895_v53  ;;  %v859_v35 = vld [vmem:[#allocation2 + $0x80] sm:$0xff]  ;;  %v1600_v48 = vmul.f32 %v2663_v62, %v738_v37  ;;  %v3225_v52 = vmin.f32 %v723_v8, 6.0 }
 0x148   : > { %v1060_v41 = vld [vmem:[#allocation2 + $0x7a] sm:$0xff]  ;;  %v3227_v51 = vmin.f32 %v721_v39, 6.0  ;;  %v1100_v26 = vmul.f32 %v2642_v28, %v1063_v45  ;;  %v1199_v21 = vmul.f32 %v2694_v24, %v861_v43  ;;  %v896_v57 = vmul.f32 %v2625_v19, %v859_v35  ;;  %v1061_v29 = vld [vmem:[#allocation2 + $0x82] sm:$0xff] }
 0x149   : > { %v3233_v1 = vadd.f32 %v3160_v40, %v1343_v31  ;;  %v3236_v49 = vmul.f32 %v2775_v11, %v1062_v2  ;;  %v1197_v13 = vmul.f32 %v2694_v24, %v859_v35  ;;  %v1398_v37 = vmul.f32 %v2775_v11, %v1060_v41  ;;  %842 = vst [vmem:[#allocation2 + $0x151] sm:$0xff] %v3225_v52 }
 0x14a   : > { %v1499_v56 = vmul.f32 %v2739_v47, %v859_v35  ;;  %840 = vst [vmem:[#allocation2 + $0x139] sm:$0xff] %v3227_v51  ;;  %v1031_v38 = vadd.f32 %v999_v10, %v898_v6  ;;  %v3243_v4 = vadd.f32 %v1099_v60, %v1030_v23  ;;  %v3246_v19 = vmul.f32 %v2775_v11, %v1063_v45 }
 0x14b   : > { %v1700_v40 = vmul.f32 %v2797_v17, %v1060_v41  ;;  %v1097_v31 = vmul.f32 %v2642_v28, %v1060_v41  ;;  %v1229_v42 = vadd.f32 %v1197_v13, %v3138_v25  ;;  %v1430_v53 = vadd.f32 %v1398_v37, %v1329_v33 }
 0x14c   : > { %v1531_v30 = vadd.f32 %v1499_v56, %v1429_v63  ;;  %v1029_v3 = vadd.f32 %v997_v34, %v896_v57  ;;  %v1399_v8 = vmul.f32 %v2775_v11, %v1061_v29  ;;  %v724_v27 = vmax.f32 %v678_v18, 0.0 }
 0x14d   : > { %v1732_v39 = vadd.f32 %v1700_v40, %v1631_v44  ;;  %v1330_v35 = vadd.f32 %v1298_v7, %v1229_v42  ;;  %v1532_v10 = vadd.f32 %v1500_v59, %v1430_v53  ;;  %v1701_v6 = vmul.f32 %v2797_v17, %v1061_v29 }
 0x14e   : > { %v1632_v23 = vadd.f32 %v1600_v48, %v1531_v30  ;;  %v1501_v60 = vmul.f32 %v2739_v47, %v861_v43  ;;  %v1702_v14 = vmul.f32 %v2797_v17, %v1062_v2  ;;  %v1098_v41 = vmul.f32 %v2642_v28, %v1061_v29 }
 0x14f   : > { %v1771_v25 = vadd.f32 %v2899_v46, %v1732_v39  ;;  %v1129_v33 = vadd.f32 %v1097_v31, %v1028_v9  ;;  %v1431_v63 = vadd.f32 %v1399_v8, %v1330_v35  ;;  %v1633_v34 = vadd.f32 %v3194_v50, %v1532_v10  ;;  %v3268_v9 = vld [vmem:[%s3672_s2] ss:$0 sm:$0xff]  ;;  %v3758_v50 = vld [vmem:[#allocation15_spill] sm:$0xff]  ;;  %v3762_v35 = vld [vmem:[#allocation18_spill] sm:$0xff] }
 0x150   : > { %v1733_v57 = vadd.f32 %v1701_v6, %v1632_v23  ;;  %v1130_v44 = vadd.f32 %v1098_v41, %v1029_v3  ;;  %v756_v7 = vmin.f32 %v724_v27, 6.0  ;;  %v1344_v43 = vadd.f32 %v3150_v61, %v3166_v32  ;;  %v3277_v61 = vld [vmem:[%s3673_s3 + $0x1] ss:$0 sm:$0xff]  ;;  %v3761_v31 = vld [vmem:[#allocation7_spill] sm:$0xff] }
 0x151   : > { %v3259_v18 = vadd.f32 %v3177_v5, %v1771_v25  ;;  %v874_v59 = vld [vmem:[#allocation2 + $0x138] sm:$0xff]  ;;  %v1703_v2 = vmul.f32 %v2797_v17, %v1063_v45  ;;  %v1533_v48 = vadd.f32 %v1501_v60, %v1431_v63  ;;  %v670_v5 = vadd.f32 %v3268_v9, %v3758_v50  ;;  %3759 = vst [vmem:[#allocation40_spill] sm:$0xff] %v3277_v61  ;;  %v876_v3 = vld [vmem:[#allocation2 + $0x150] sm:$0xff] }
 0x152   : > { %v1772_v28 = vadd.f32 %v2899_v46, %v1733_v57  ;;  %v3272_v29 = vadd.f32 %v1100_v26, %v1031_v38  ;;  %v3281_v32 = vmul.f32 %v3277_v61, %v3225_v52  ;;  %v1212_v45 = vmul.f32 %v2694_v24, %v874_v59  ;;  %843 = vst [vmem:[#allocation2 + $0x159] sm:$0xff] %v756_v7  ;;  %v3763_v23 = vld [vmem:[#allocation19_spill] sm:$0xff] }
 0x153   : > { %v1313_v13 = vmul.f32 %v2657_v58, %v3227_v51  ;;  %v1230_v37 = vadd.f32 %v3211_v22, %v1129_v33  ;;  %v1634_v26 = vadd.f32 %v3214_v16, %v1533_v48  ;;  %v1231_v40 = vadd.f32 %v1199_v21, %v1130_v44  ;;  %v3309_v21 = vld [vmem:[%s3673_s3] ss:$0 sm:$0xff]  ;;  %v3766_v44 = vld [vmem:[#allocation23_spill] sm:$0xff] }
 0x154   : > { %3760 = vst [vmem:[#allocation16_spill] sm:$0xff] %v3281_v32  ;;  %v2306_v56 = vpack.c.bf16 %v1772_v28, %v1771_v25  ;;  %v3289_v38 = vadd.f32 %v3185_v36, %v1772_v28  ;;  %v1244_v42 = vadd.f32 %v1212_v45, %v3761_v31  ;;  %v1514_v53 = vmul.f32 %v2739_v47, %v874_v59  ;;  %v3350_v45 = vld [vmem:[%s3673_s3 + $0x7] ss:$0 sm:$0xff] }
 0x155   : > { %v1615_v30 = vmul.f32 %v2663_v62, %v3227_v51  ;;  %v3298_v8 = vmul.f32 %v2657_v58, %v3225_v52  ;;  %v3302_v22 = vmul.f32 %v2663_v62, %v3225_v52  ;;  %v1012_v36 = vmul.f32 %v3277_v61, %v3227_v51 }
 0x156   : > { %2370 = vst [vmem:[%s2941_s14 + $0x18] sm:$0xff] %v2306_v56   ;;  %v722_v16 = vmax.f32 %v670_v5, 0.0  ;;  %v911_v39 = vmul.f32 %v3309_v21, %v874_v59  ;;  %v3312_v27 = vadd.f32 %v1313_v13, %v1244_v42  ;;  %v1546_v58 = vadd.f32 %v1514_v53, %v3233_v1 }
 0x157   : > { %v627_v10 = vadd.f32 %v3268_v9, %v3762_v35  ;;  %v1734_v62 = vadd.f32 %v1702_v14, %v1633_v34  ;;  %v619_v51 = vadd.f32 %v3268_v9, %v3763_v23  ;;  %v1331_v6 = vadd.f32 %v3191_v55, %v1230_v37  ;;  %v3765_v34 = vld [vmem:[#allocation21_spill] sm:$0xff] }
 0x158   : > { %v754_v52 = vmin.f32 %v722_v16, 6.0  ;;  %v3321_v60 = vmul.f32 %v3309_v21, %v876_v3  ;;  %v3323_v41 = vadd.f32 %v1615_v30, %v1546_v58  ;;  %v1332_v33 = vadd.f32 %v3207_v12, %v1231_v40  ;;  %v3342_v12 = vld [vmem:[%s3673_s3 + $0x4] ss:$0 sm:$0xff] }
 0x159   : > { %v711_v25 = vmax.f32 %v627_v10, 0.0  ;;  %v3327_v1 = vmul.f32 %v2694_v24, %v876_v3  ;;  %v3329_v63 = vld [vmem:[#allocation2 + $0x158] sm:$0xff]  ;;  %v709_v14 = vmax.f32 %v619_v51, 0.0  ;;  %v630_v57 = vadd.f32 %v3268_v9, %v3765_v34  ;;  %3768 = vst [vmem:[#allocation14_spill] sm:$0xff] %v3342_v12 }
 0x15a   : > { %3764 = vst [vmem:[#allocation10_spill] sm:$0xff] %v3321_v60  ;;  %841 = vst [vmem:[#allocation2 + $0x141] sm:$0xff] %v754_v52  ;;  %v622_v55 = vadd.f32 %v3268_v9, %v3766_v44  ;;  %v1735_v59 = vadd.f32 %v1703_v2, %v1634_v26  ;;  %v1516_v48 = vmul.f32 %v2739_v47, %v876_v3  ;;  %v3361_v42 = vld [vmem:[#allocation2 + $0x152] sm:$0xff]  ;;  %v3363_v53 = vld [vmem:[#allocation2 + $0x15a] sm:$0xff] }
 0x15b   : > { %v1044_v28 = vadd.f32 %v1012_v36, %v911_v39  ;;  %v3337_v50 = vmul.f32 %v3277_v61, %v756_v7  ;;  %v3345_v5 = vmul.f32 %v3342_v12, %v756_v7  ;;  %v3353_v2 = vmul.f32 %v3350_v45, %v756_v7  ;;  %3769 = vst [vmem:[#allocation15_spill] sm:$0xff] %v3361_v42 }
 0x15c   : > { %v1013_v13 = vmul.f32 %v3277_v61, %v754_v52  ;;  %v1445_v37 = vadd.f32 %v3164_v20, %v1344_v43  ;;  %v1215_v26 = vmul.f32 %v2694_v24, %v3329_v63  ;;  %v1314_v56 = vmul.f32 %v3342_v12, %v754_v52  ;;  %3770 = vst [vmem:[#allocation7_spill] sm:$0xff] %v3363_v53 }
 0x15d   : > { %3767 = vst [vmem:[#allocation12_spill] sm:$0xff] %v3337_v50  ;;  %v1616_v40 = vmul.f32 %v3350_v45, %v754_v52  ;;  %v743_v31 = vmin.f32 %v711_v25, 6.0  ;;  %v1517_v7 = vmul.f32 %v2739_v47, %v3329_v63  ;;  %v741_v30 = vmin.f32 %v709_v14, 6.0 }
 0x15e   : > { %v712_v3 = vmax.f32 %v630_v57, 0.0  ;;  %v710_v36 = vmax.f32 %v622_v55, 0.0  ;;  %v3369_v20 = vmul.f32 %v2797_v17, %v3361_v42  ;;  %v3373_v24 = vmul.f32 %v2797_v17, %v3363_v53  ;;  %v3405_v57 = vld [vmem:[%s3673_s3 + $0x2] ss:$0 sm:$0xff] }
 0x15f   : > { %830 = vst [vmem:[#allocation2 + $0xc1] sm:$0xff] %v743_v31  ;;  %v1002_v43 = vmul.f32 %v3277_v61, %v743_v31  ;;  %v3377_v16 = vadd.f32 %v3236_v49, %v1331_v6  ;;  %v3380_v39 = vmul.f32 %v3342_v12, %v743_v31  ;;  %v3383_v58 = vmul.f32 %v3350_v45, %v743_v31  ;;  %v3412_v31 = vld [vmem:[%s3673_s3 + $0x3] ss:$0 sm:$0xff] }
 0x160   : > { %3771 = vst [vmem:[#allocation18_spill] sm:$0xff] %v3369_v20  ;;  %3772 = vst [vmem:[#allocation19_spill] sm:$0xff] %v3373_v24  ;;  %v3386_v35 = vmul.f32 %v3277_v61, %v741_v30  ;;  %v3388_v10 = vmin.f32 %v712_v3, 6.0  ;;  %v3391_v25 = vmul.f32 %v3342_v12, %v741_v30  ;;  %v3394_v49 = vmul.f32 %v3350_v45, %v741_v30 }
 0x161   : > { %828 = vst [vmem:[#allocation2 + $0xa9] sm:$0xff] %v741_v30  ;;  %v875_v52 = vld [vmem:[#allocation2 + $0x140] sm:$0xff]  ;;  %v3396_v6 = vmin.f32 %v710_v36, 6.0  ;;  %v3399_v14 = vadd.f32 %v3246_v19, %v1332_v33  ;;  %3773 = vst [vmem:[#allocation21_spill] sm:$0xff] %v3405_v57  ;;  %v3421_v36 = vadd.f32 %v2899_v46, %v1734_v62 }
 0x162   : > { %v1076_v23 = vld [vmem:[#allocation2 + $0x13a] sm:$0xff]  ;;  %v1077_v51 = vld [vmem:[#allocation2 + $0x142] sm:$0xff]  ;;  %v912_v34 = vmul.f32 %v3309_v21, %v875_v52  ;;  %3774 = vst [vmem:[#allocation23_spill] sm:$0xff] %v3412_v31  ;;  %v1213_v30 = vmul.f32 %v3412_v31, %v875_v52  ;;  %831 = vst [vmem:[#allocation2 + $0xc9] sm:$0xff] %v3388_v10  ;;  %v1515_v33 = vmul.f32 %v2739_v47, %v875_v52 }
 0x163   : > { %v1113_v44 = vmul.f32 %v3405_v57, %v1076_v23  ;;  %v1114_v55 = vmul.f32 %v3405_v57, %v1077_v51  ;;  %v1414_v19 = vmul.f32 %v2775_v11, %v1076_v23  ;;  %v1716_v3 = vmul.f32 %v2797_v17, %v1076_v23  ;;  %829 = vst [vmem:[#allocation2 + $0xb1] sm:$0xff] %v3396_v6 }
 0x164   : > { %v1045_v15 = vadd.f32 %v1013_v13, %v912_v34  ;;  %v1245_v53 = vadd.f32 %v1213_v30, %v3775_v0  ;;  %v1415_v50 = vmul.f32 %v2775_v11, %v1077_v51  ;;  %v1547_v32 = vadd.f32 %v1515_v33, %v1445_v37 }
 0x165   : > { %v1145_v54 = vadd.f32 %v1113_v44, %v1044_v28  ;;  %v1446_v42 = vadd.f32 %v1414_v19, %v3312_v27  ;;  %v1717_v60 = vmul.f32 %v2797_v17, %v1077_v51  ;;  %v1748_v47 = vadd.f32 %v1716_v3, %v3323_v41 }
 0x166   : > { %v1146_v52 = vadd.f32 %v1114_v55, %v1045_v15  ;;  %v1346_v23 = vadd.f32 %v1314_v56, %v1245_v53  ;;  %v864_v24 = vld [vmem:[#allocation2 + $0xc0] sm:$0xff]  ;;  %v1003_v62 = vmul.f32 %v3277_v61, %v3388_v10  ;;  %v3431_v13 = vadd.f32 %v2899_v46, %v1735_v59 }
 0x167   : > { %v3434_v0 = vadd.f32 %v3327_v1, %v1145_v54  ;;  %v1548_v11 = vadd.f32 %v1516_v48, %v1446_v42  ;;  %v1648_v28 = vadd.f32 %v1616_v40, %v1547_v32  ;;  %v901_v27 = vmul.f32 %v3309_v21, %v864_v24 }
 0x168   : > { %v862_v37 = vld [vmem:[#allocation2 + $0xa8] sm:$0xff]  ;;  %v3437_v17 = vadd.f32 %v1215_v26, %v1146_v52  ;;  %v1447_v41 = vadd.f32 %v1415_v50, %v1346_v23  ;;  %v3440_v15 = vadd.f32 %v2899_v46, %v1748_v47  ;;  %v3444_v56 = vmul.f32 %v3342_v12, %v3388_v10  ;;  %v3454_v50 = vld [vmem:[%s3673_s3 + $0x6] ss:$0 sm:$0xff] }
 0x169   : > { %v3447_v59 = vadd.f32 %v3302_v22, %v1548_v11  ;;  %v1749_v54 = vadd.f32 %v1717_v60, %v1648_v28  ;;  %v1034_v1 = vadd.f32 %v1002_v43, %v901_v27  ;;  %v899_v32 = vmul.f32 %v3309_v21, %v862_v37  ;;  %v865_v48 = vld [vmem:[#allocation2 + $0xc8] sm:$0xff] }
 0x16a   : > { %3776 = vst [vmem:[#allocation9_spill] sm:$0xff] %v3440_v15  ;;  %v1066_v40 = vld [vmem:[#allocation2 + $0xc2] sm:$0xff]  ;;  %v1549_v42 = vadd.f32 %v1517_v7, %v1447_v41  ;;  %v1200_v26 = vmul.f32 %v3412_v31, %v862_v37  ;;  %v1502_v53 = vmul.f32 %v3454_v50, %v862_v37  ;;  %v902_v51 = vmul.f32 %v3309_v21, %v865_v48  ;;  %v1067_v22 = vld [vmem:[#allocation2 + $0xca] sm:$0xff]  ;;  %v1065_v41 = vld [vmem:[#allocation2 + $0xb2] sm:$0xff] }
 0x16b   : > { %v3459_v60 = vadd.f32 %v2899_v46, %v1749_v54  ;;  %v1202_v43 = vmul.f32 %v3412_v31, %v864_v24  ;;  %v1504_v34 = vmul.f32 %v3454_v50, %v864_v24  ;;  %v1103_v7 = vmul.f32 %v3405_v57, %v1066_v40  ;;  %v863_v24 = vld [vmem:[#allocation2 + $0xb0] sm:$0xff]  ;;  %v3779_v28 = vld [vmem:[#allocation26_spill] sm:$0xff] }
 0x16c   : > { %v3465_v44 = vadd.f32 %v3353_v2, %v1549_v42  ;;  %v1232_v55 = vadd.f32 %v1200_v26, %v3243_v4  ;;  %v1534_v30 = vadd.f32 %v1502_v53, %v3377_v16  ;;  %v1035_v19 = vadd.f32 %v1003_v62, %v902_v51  ;;  %v3479_v4 = vld [vmem:[%s3673_s3 + $0x5] ss:$0 sm:$0xff]  ;;  %v1064_v62 = vld [vmem:[#allocation2 + $0xaa] sm:$0xff]  ;;  %v3491_v54 = vld [vmem:[%s3673_s3 + $0x8] ss:$0 sm:$0xff] }
 0x16d   : > { %3777 = vst [vmem:[#allocation41_spill] sm:$0xff] %v3459_v60  ;;  %v2346_v33 = vpack.c.bf16 %v3459_v60, %v3440_v15  ;;  %v1032_v3 = vadd.f32 %v3386_v35, %v899_v32  ;;  %v1104_v47 = vmul.f32 %v3405_v57, %v1067_v22  ;;  %v1135_v52 = vadd.f32 %v1103_v7, %v1034_v1  ;;  %v3780_v26 = vld [vmem:[#allocation32_spill] sm:$0xff]  ;;  %v3781_v51 = vld [vmem:[#allocation5_spill] sm:$0xff]  ;;  %v3784_v15 = vld [vmem:[#allocation35_spill] sm:$0xff] }
 0x16e   : > { %3778 = vst [vmem:[#allocation42_spill] sm:$0xff] %v3465_v44  ;;  %v1333_v23 = vadd.f32 %v3391_v25, %v1232_v55  ;;  %v1635_v11 = vadd.f32 %v3394_v49, %v1534_v30  ;;  %v1203_v2 = vmul.f32 %v3412_v31, %v865_v48  ;;  %v1404_v16 = vmul.f32 %v3479_v4, %v1066_v40 }
 0x16f   : > { %2378 = vst [vmem:[%s2941_s14 + $0x58] sm:$0xff] %v2346_v33   ;;  %v1136_v35 = vadd.f32 %v1104_v47, %v1035_v19  ;;  %v1236_v27 = vadd.f32 %v3779_v28, %v1135_v52  ;;  %v1405_v37 = vmul.f32 %v3479_v4, %v1067_v22  ;;  %v1505_v25 = vmul.f32 %v3454_v50, %v865_v48  ;;  %v3782_v19 = vld [vmem:[#allocation33_spill] sm:$0xff]  ;;  %v3783_v47 = vld [vmem:[#allocation34_spill] sm:$0xff] }
 0x170   : > { %v1606_v49 = vmul.f32 %v3350_v45, %v3388_v10  ;;  %v1706_v1 = vmul.f32 %v3491_v54, %v1066_v40  ;;  %v1707_v32 = vmul.f32 %v3491_v54, %v1067_v22  ;;  %v900_v42 = vmul.f32 %v3309_v21, %v863_v24 }
 0x171   : > { %v1237_v53 = vadd.f32 %v3780_v26, %v1136_v35  ;;  %v1337_v7 = vadd.f32 %v3781_v51, %v1236_v27  ;;  %v1001_v48 = vmul.f32 %v3277_v61, %v3396_v6  ;;  %v1101_v10 = vmul.f32 %v3405_v57, %v1064_v62  ;;  %v3785_v61 = vld [vmem:[#allocation25_spill] sm:$0xff] }
 0x172   : > { %v1102_v55 = vmul.f32 %v3405_v57, %v1065_v41  ;;  %v1201_v30 = vmul.f32 %v3412_v31, %v863_v24  ;;  %v1302_v40 = vmul.f32 %v3342_v12, %v3396_v6  ;;  %v1402_v22 = vmul.f32 %v3479_v4, %v1064_v62 }
 0x173   : > { %v1338_v33 = vadd.f32 %v3782_v19, %v1237_v53  ;;  %v1438_v52 = vadd.f32 %v3783_v47, %v1337_v7  ;;  %v1033_v35 = vadd.f32 %v1001_v48, %v900_v42  ;;  %v1133_v28 = vadd.f32 %v1101_v10, %v1032_v3  ;;  %v3786_v42 = vld [vmem:[#allocation29_spill] sm:$0xff]  ;;  %v3787_v7 = vld [vmem:[#allocation4_spill] sm:$0xff] }
 0x174   : > { %v1233_v27 = vadd.f32 %v1201_v30, %v3272_v29  ;;  %v1403_v26 = vmul.f32 %v3479_v4, %v1065_v41  ;;  %v1434_v51 = vadd.f32 %v1402_v22, %v1333_v23  ;;  %v1503_v60 = vmul.f32 %v3454_v50, %v863_v24 }
 0x175   : > { %v1439_v31 = vadd.f32 %v3784_v15, %v1338_v33  ;;  %v1540_v57 = vadd.f32 %v3785_v61, %v1438_v52  ;;  %v1134_v12 = vadd.f32 %v1102_v55, %v1033_v35  ;;  %v1234_v44 = vadd.f32 %v1202_v43, %v1133_v28  ;;  %v3788_v55 = vld [vmem:[#allocation8_spill] sm:$0xff]  ;;  %v3793_v52 = vld [vmem:[#allocation6_spill] sm:$0xff] }
 0x176   : > { %v1334_v20 = vadd.f32 %v1302_v40, %v1233_v27  ;;  %v1535_v53 = vadd.f32 %v1503_v60, %v3399_v14  ;;  %v1536_v19 = vadd.f32 %v1504_v34, %v1434_v51  ;;  %v1604_v3 = vmul.f32 %v3350_v45, %v3396_v6  ;;  %v3789_v14 = vld [vmem:[#allocation30_spill] sm:$0xff]  ;;  %v3794_v27 = vld [vmem:[#allocation37_spill] sm:$0xff] }
 0x177   : > { %v1541_v29 = vadd.f32 %v3786_v42, %v1439_v31  ;;  %v1641_v48 = vadd.f32 %v3787_v7, %v1540_v57  ;;  %v1235_v23 = vadd.f32 %v1203_v2, %v1134_v12  ;;  %v1335_v24 = vadd.f32 %v3380_v39, %v1234_v44  ;;  %v3790_v2 = vld [vmem:[#allocation31_spill] sm:$0xff]  ;;  %v3791_v44 = vld [vmem:[#allocation28_spill] sm:$0xff]  ;;  %v3795_v51 = vld [vmem:[#allocation38_spill] sm:$0xff] }
 0x178   : > { %v1435_v10 = vadd.f32 %v1403_v26, %v1334_v20  ;;  %v1636_v15 = vadd.f32 %v1604_v3, %v1535_v53  ;;  %v1637_v61 = vadd.f32 %v3383_v58, %v1536_v19  ;;  %v1704_v43 = vmul.f32 %v3491_v54, %v1064_v62  ;;  %v3796_v3 = vld [vmem:[#allocation20_spill] sm:$0xff] }
 0x179   : > { %v1642_v30 = vadd.f32 %v3788_v55, %v1541_v29  ;;  %v1742_v60 = vadd.f32 %v3789_v14, %v1641_v48  ;;  %v1336_v34 = vadd.f32 %v3444_v56, %v1235_v23  ;;  %v1436_v6 = vadd.f32 %v1404_v16, %v1335_v24  ;;  %v3792_v16 = vld [vmem:[#allocation36_spill] sm:$0xff]  ;;  %v3798_v23 = vld [vmem:[#allocation22_spill] sm:$0xff] }
 0x17a   : > { %v1537_v40 = vadd.f32 %v1505_v25, %v1435_v10  ;;  %v1705_v31 = vmul.f32 %v3491_v54, %v1065_v41  ;;  %v1736_v57 = vadd.f32 %v1704_v43, %v1635_v11  ;;  %v1738_v12 = vadd.f32 %v1706_v1, %v1637_v61 }
 0x17b   : > { %v1743_v39 = vadd.f32 %v3790_v2, %v1642_v30  ;;  %v1437_v20 = vadd.f32 %v1405_v37, %v1336_v34  ;;  %v1538_v22 = vadd.f32 %v3791_v44, %v1436_v6  ;;  %v1781_v58 = vadd.f32 %v2899_v46, %v1742_v60  ;;  %v3799_v60 = vld [vmem:[#allocation24_spill] sm:$0xff]  ;;  %v3802_v2 = vld [vmem:[#allocation42_spill] sm:$0xff] }
 0x17c   : > { %v1638_v62 = vadd.f32 %v1606_v49, %v1537_v40  ;;  %v1737_v33 = vadd.f32 %v1705_v31, %v1636_v15  ;;  %v1775_v47 = vadd.f32 %v2899_v46, %v1736_v57  ;;  %v1777_v56 = vadd.f32 %v2899_v46, %v1738_v12  ;;  %v3800_v31 = vld [vmem:[#allocation27_spill] sm:$0xff] }
 0x17d   : > { %v1539_v25 = vadd.f32 %v3792_v16, %v1437_v20  ;;  %v1639_v41 = vadd.f32 %v3793_v52, %v1538_v22  ;;  %v1782_v11 = vadd.f32 %v2899_v46, %v1743_v39  ;;  %v2311_v37 = vpack.c.bf16 %v3431_v13, %v3421_v36  ;;  %v3803_v39 = vld [vmem:[#allocation19_spill] sm:$0xff]  ;;  %v3804_v16 = vld [vmem:[#allocation10_spill] sm:$0xff] }
 0x17e   : > { %v1739_v1 = vadd.f32 %v1707_v32, %v1638_v62  ;;  %v1776_v35 = vadd.f32 %v2899_v46, %v1737_v33  ;;  %v1960_v49 = vadd.f32 %v3259_v18, %v3421_v36  ;;  %v1975_v28 = vadd.f32 %v3289_v38, %v3431_v13  ;;  %v3548_v46 = vld [vmem:[%s3674_s4] ss:$0 sm:$0xff]  ;;  %v3797_v13 = vld [vmem:[#allocation39_spill] sm:$0xff] }
 0x17f   : > { %v1640_v26 = vadd.f32 %v3794_v27, %v1539_v25  ;;  %v1740_v53 = vadd.f32 %v3795_v51, %v1639_v41  ;;  %2371 = vst [vmem:[%s2941_s14 + $0x20] sm:$0xff] %v2311_v37   ;;  %v2331_v19 = vpack.c.bf16 %v1782_v11, %v1781_v58  ;;  %v691_v42 = vadd.f32 %v3268_v9, %v3796_v3  ;;  %v3806_v52 = vld [vmem:[#allocation15_spill] sm:$0xff]  ;;  %v3808_v41 = vld [vmem:[#allocation12_spill] sm:$0xff]  ;;  %v3811_v3 = vld [vmem:[#allocation17_spill] sm:$0xff] }
 0x180   : > { %v1778_v18 = vadd.f32 %v3548_v46, %v1739_v1  ;;  %v2316_v36 = vpack.c.bf16 %v1776_v35, %v1775_v47  ;;  %v1961_v32 = vadd.f32 %v1960_v49, %v1775_v47  ;;  %v1976_v38 = vadd.f32 %v1975_v28, %v1776_v35  ;;  %v3809_v1 = vld [vmem:[#allocation7_spill] sm:$0xff] }
 0x181   : > { %v1741_v29 = vadd.f32 %v3797_v13, %v1640_v26  ;;  %v1779_v7 = vadd.f32 %v3548_v46, %v1740_v53  ;;  %2375 = vst [vmem:[%s2941_s14 + $0x40] sm:$0xff] %v2331_v19   ;;  %v727_v48 = vmax.f32 %v691_v42, 0.0  ;;  %v683_v24 = vadd.f32 %v3268_v9, %v3798_v23  ;;  %v3810_v26 = vld [vmem:[#allocation11_spill] sm:$0xff]  ;;  %v3813_v13 = vld [vmem:[#allocation13_spill] sm:$0xff] }
 0x182   : > { %2372 = vst [vmem:[%s2941_s14 + $0x28] sm:$0xff] %v2316_v36   ;;  %v2321_v10 = vpack.c.bf16 %v1778_v18, %v1777_v56  ;;  %v1962_v15 = vadd.f32 %v1961_v32, %v1777_v56  ;;  %v1977_v61 = vadd.f32 %v1976_v38, %v1778_v18  ;;  %v1347_v43 = vadd.f32 %v3298_v8, %v3434_v0  ;;  %v3801_v8 = vld [vmem:[#allocation18_spill] sm:$0xff]  ;;  %v2495_v23 = vld [vmem:[#allocation2] sm:$0xff] }
 0x183   : > { %v1780_v55 = vadd.f32 %v3548_v46, %v1741_v29  ;;  %v759_v30 = vmin.f32 %v727_v48, 6.0  ;;  %v725_v14 = vmax.f32 %v683_v24, 0.0  ;;  %v694_v34 = vadd.f32 %v3268_v9, %v3799_v60  ;;  %v3812_v36 = vld [vmem:[#allocation14_spill] sm:$0xff] }
 0x184   : > { %v914_v6 = vmul.f32 %v3309_v21, %v3329_v63  ;;  %2373 = vst [vmem:[%s2941_s14 + $0x30] sm:$0xff] %v2321_v10   ;;  %v1963_v40 = vadd.f32 %v1962_v15, %v1779_v7  ;;  %v686_v57 = vadd.f32 %v3268_v9, %v3800_v31  ;;  %v1348_v12 = vadd.f32 %v3345_v5, %v3437_v17  ;;  %v3805_v9 = vld [vmem:[#allocation16_spill] sm:$0xff]  ;;  %v3807_v5 = vld [vmem:[#allocation21_spill] sm:$0xff]  ;;  %v3814_v10 = vld [vmem:[#allocation3_spill] sm:$0xff] }
 0x185   : > { %v1750_v0 = vadd.f32 %v3801_v8, %v3447_v59  ;;  %v1751_v20 = vadd.f32 %v3803_v39, %v3802_v2  ;;  %v2326_v44 = vpack.c.bf16 %v1780_v55, %v1779_v7  ;;  %v1978_v22 = vadd.f32 %v1977_v61, %v1780_v55  ;;  %846 = vst [vmem:[#allocation2 + $0x181] sm:$0xff] %v759_v30  ;;  %v3817_v31 = vld [vmem:[#allocation23_spill] sm:$0xff]  ;;  %v3818_v8 = vld [vmem:[#allocation41_spill] sm:$0xff] }
 0x186   : > { %v1964_v62 = vadd.f32 %v1963_v40, %v1781_v58  ;;  %v757_v33 = vmin.f32 %v725_v14, 6.0  ;;  %v728_v63 = vmax.f32 %v694_v34, 0.0  ;;  %v726_v47 = vmax.f32 %v686_v57, 0.0  ;;  %v3815_v14 = vld [vmem:[#allocation40_spill] sm:$0xff] }
 0x187   : > { %2374 = vst [vmem:[%s2941_s14 + $0x38] sm:$0xff] %v2326_v44   ;;  %v1979_v56 = vadd.f32 %v1978_v22, %v1782_v11  ;;  %v1046_v25 = vadd.f32 %v3805_v9, %v3804_v16  ;;  %v1115_v17 = vmul.f32 %v3807_v5, %v3806_v52  ;;  %v1047_v37 = vadd.f32 %v3808_v41, %v914_v6  ;;  %v3816_v6 = vld [vmem:[#allocation9_spill] sm:$0xff] }
 0x188   : > { %844 = vst [vmem:[#allocation2 + $0x169] sm:$0xff] %v757_v33  ;;  %v3578_v59 = vmin.f32 %v728_v63, 6.0  ;;  %v1116_v35 = vmul.f32 %v3807_v5, %v3809_v1  ;;  %v1416_v58 = vmul.f32 %v3479_v4, %v3806_v52  ;;  %v758_v49 = vmin.f32 %v726_v47, 6.0 }
 0x189   : > { %v1417_v11 = vmul.f32 %v3479_v4, %v3809_v1  ;;  %v1789_v28 = vadd.f32 %v3548_v46, %v1750_v0  ;;  %v3590_v27 = vadd.f32 %v3548_v46, %v1751_v20  ;;  %v1965_v51 = vadd.f32 %v1964_v62, %v3810_v26 }
 0x18a   : > { %847 = vst [vmem:[#allocation2 + $0x189] sm:$0xff] %v3578_v59  ;;  %845 = vst [vmem:[#allocation2 + $0x171] sm:$0xff] %v758_v49  ;;  %v1147_v53 = vadd.f32 %v1115_v17, %v1046_v25  ;;  %v1980_v42 = vadd.f32 %v1979_v56, %v3811_v3  ;;  %v1148_v18 = vadd.f32 %v1116_v35, %v1047_v37 }
 0x18b   : > { %v2351_v19 = vpack.c.bf16 %v3590_v27, %v1789_v28  ;;  %v3596_v32 = vmul.f32 %v3812_v36, %v759_v30  ;;  %v1448_v38 = vadd.f32 %v1416_v58, %v1347_v43  ;;  %v1966_v29 = vadd.f32 %v1965_v51, %v3813_v13 }
 0x18c   : > { %v3600_v7 = vmul.f32 %v3350_v45, %v759_v30  ;;  %v1449_v48 = vadd.f32 %v1417_v11, %v1348_v12  ;;  %v3603_v24 = vmul.f32 %v2495_v23, %v3454_v50  ;;  %v1981_v15 = vadd.f32 %v1980_v42, %v3814_v10  ;;  %v1181_v61 = vld [vmem:[#allocation2 + $0x180] sm:$0xff] }
 0x18d   : > { %2379 = vst [vmem:[%s2941_s14 + $0x60] sm:$0xff] %v2351_v19   ;;  %v1016_v60 = vmul.f32 %v3815_v14, %v757_v33  ;;  %v1317_v34 = vmul.f32 %v3812_v36, %v757_v33  ;;  %v1619_v43 = vmul.f32 %v3350_v45, %v757_v33  ;;  %v1967_v40 = vadd.f32 %v1966_v29, %v3816_v6 }
 0x18e   : > { %v1982_v0 = vadd.f32 %v1981_v15, %v3818_v8  ;;  %v1320_v39 = vmul.f32 %v3812_v36, %v3578_v59  ;;  %v1017_v44 = vmul.f32 %v3815_v14, %v758_v49  ;;  %v1318_v22 = vmul.f32 %v3812_v36, %v758_v49  ;;  %v1687_v8 = vld [vmem:[#allocation2 + $0x19a] sm:$0xff] }
 0x18f   : > { %v878_v55 = vld [vmem:[#allocation2 + $0x168] sm:$0xff]  ;;  %v1968_v62 = vadd.f32 %v1967_v40, %v1789_v28  ;;  %v1218_v33 = vmul.f32 %v3817_v31, %v1181_v61  ;;  %v1620_v25 = vmul.f32 %v3350_v45, %v758_v49  ;;  %v1520_v52 = vmul.f32 %v3454_v50, %v1181_v61 }
 0x190   : > { %v915_v30 = vmul.f32 %v3309_v21, %v878_v55  ;;  %v1216_v57 = vmul.f32 %v3817_v31, %v878_v55  ;;  %v1518_v12 = vmul.f32 %v3454_v50, %v878_v55  ;;  %v1983_v61 = vadd.f32 %v1982_v0, %v3590_v27 }
 0x191   : > { %v1182_v2 = vld [vmem:[#allocation2 + $0x188] sm:$0xff]  ;;  %v879_v56 = vld [vmem:[#allocation2 + $0x170] sm:$0xff]  ;;  %v1622_v27 = vmul.f32 %v3350_v45, %v3578_v59  ;;  %v1724_v59 = vmul.f32 %v3491_v54, %v1687_v8 }
 0x192   : > { %v1383_v20 = vld [vmem:[#allocation2 + $0x182] sm:$0xff]  ;;  %v1248_v63 = vadd.f32 %v1216_v57, %v1147_v53  ;;  %v1550_v47 = vadd.f32 %v1518_v12, %v1448_v38  ;;  %v1080_v16 = vld [vmem:[#allocation2 + $0x16a] sm:$0xff]  ;;  %v1081_v9 = vld [vmem:[#allocation2 + $0x172] sm:$0xff]  ;;  %v1048_v17 = vadd.f32 %v1016_v60, %v915_v30  ;;  %v1219_v41 = vmul.f32 %v3817_v31, %v1182_v2 }
 0x193   : > { %v1420_v37 = vmul.f32 %v3479_v4, %v1383_v20  ;;  %v1521_v58 = vmul.f32 %v3454_v50, %v1182_v2  ;;  %v916_v11 = vmul.f32 %v3309_v21, %v879_v56  ;;  %v1117_v28 = vmul.f32 %v3807_v5, %v1080_v16  ;;  %v1384_v36 = vld [vmem:[#allocation2 + $0x18a] sm:$0xff] }
 0x194   : > { %v1349_v1 = vadd.f32 %v1317_v34, %v1248_v63  ;;  %v1651_v35 = vadd.f32 %v1619_v43, %v1550_v47  ;;  %v1118_v26 = vmul.f32 %v3807_v5, %v1081_v9  ;;  %v1217_v51 = vmul.f32 %v3817_v31, %v879_v56  ;;  %v1586_v5 = vld [vmem:[#allocation2 + $0x199] sm:$0xff]  ;;  %v1587_v31 = vld [vmem:[#allocation2 + $0x1a1] sm:$0xff] }
 0x195   : > { %v1418_v49 = vmul.f32 %v3479_v4, %v1080_v16  ;;  %v1049_v53 = vadd.f32 %v1017_v44, %v916_v11  ;;  %v1419_v19 = vmul.f32 %v3479_v4, %v1081_v9  ;;  %v1519_v3 = vmul.f32 %v3454_v50, %v879_v56 }
 0x196   : > { %v1720_v42 = vmul.f32 %v3491_v54, %v1080_v16  ;;  %v1149_v38 = vadd.f32 %v1117_v28, %v1048_v17  ;;  %v1249_v13 = vadd.f32 %v1217_v51, %v1148_v18  ;;  %v1721_v21 = vmul.f32 %v3491_v54, %v1081_v9 }
 0x197   : > { %v1450_v29 = vadd.f32 %v1418_v49, %v1349_v1  ;;  %v1150_v23 = vadd.f32 %v1118_v26, %v1049_v53  ;;  %v1551_v10 = vadd.f32 %v1519_v3, %v1449_v48  ;;  %v1722_v55 = vmul.f32 %v3491_v54, %v1383_v20 }
 0x198   : > { %v1752_v15 = vadd.f32 %v1720_v42, %v1651_v35  ;;  %v1250_v14 = vadd.f32 %v1218_v33, %v1149_v38  ;;  %v1350_v60 = vadd.f32 %v1318_v22, %v1249_v13  ;;  %v1421_v50 = vmul.f32 %v3479_v4, %v1384_v36  ;;  %v1688_v22 = vld [vmem:[#allocation2 + $0x1a2] sm:$0xff] }
 0x199   : > { %v1552_v34 = vadd.f32 %v1520_v52, %v1450_v29  ;;  %v1251_v43 = vadd.f32 %v1219_v41, %v1150_v23  ;;  %v1652_v6 = vadd.f32 %v1620_v25, %v1551_v10  ;;  %v1623_v48 = vmul.f32 %v3350_v45, %v1586_v5 }
 0x19a   : > { %v1791_v18 = vadd.f32 %v3548_v46, %v1752_v15  ;;  %v1351_v40 = vadd.f32 %v3596_v32, %v1250_v14  ;;  %v1451_v30 = vadd.f32 %v1419_v19, %v1350_v60  ;;  %v1723_v4 = vmul.f32 %v3491_v54, %v1384_v36 }
 0x19b   : > { %v1653_v57 = vadd.f32 %v3600_v7, %v1552_v34  ;;  %v1352_v12 = vadd.f32 %v1320_v39, %v1251_v43  ;;  %v1753_v0 = vadd.f32 %v1721_v21, %v1652_v6  ;;  %v1624_v63 = vmul.f32 %v3350_v45, %v1587_v31 }
 0x19c   : > { %v1969_v2 = vadd.f32 %v1968_v62, %v1791_v18  ;;  %v1452_v20 = vadd.f32 %v1420_v37, %v1351_v40  ;;  %v1553_v44 = vadd.f32 %v1521_v58, %v1451_v30  ;;  %v1725_v16 = vmul.f32 %v3491_v54, %v1688_v22 }
 0x19d   : > { %v1754_v33 = vadd.f32 %v1722_v55, %v1653_v57  ;;  %v1453_v32 = vadd.f32 %v1421_v50, %v1352_v12  ;;  %v1792_v47 = vadd.f32 %v3548_v46, %v1753_v0 }
 0x19e   : > { %v1554_v7 = vadd.f32 %v3603_v24, %v1452_v20  ;;  %v1654_v56 = vadd.f32 %v1622_v27, %v1553_v44 }
 0x19f   : > { %v1793_v39 = vadd.f32 %v3548_v46, %v1754_v33  ;;  %v1555_v62 = vadd.f32 %v3603_v24, %v1453_v32  ;;  %v2356_v9 = vpack.c.bf16 %v1792_v47, %v1791_v18  ;;  %v1984_v25 = vadd.f32 %v1983_v61, %v1792_v47 }
 0x1a0   : > { %v1655_v52 = vadd.f32 %v1623_v48, %v1554_v7  ;;  %v1755_v17 = vadd.f32 %v1723_v4, %v1654_v56 }
 0x1a1   : > { %v1970_v45 = vadd.f32 %v1969_v2, %v1793_v39  ;;  %v1656_v41 = vadd.f32 %v1624_v63, %v1555_v62  ;;  %2380 = vst [vmem:[%s2941_s14 + $0x68] sm:$0xff] %v2356_v9  }
 0x1a2   : > { %v1756_v37 = vadd.f32 %v1724_v59, %v1655_v52  ;;  %v1794_v1 = vadd.f32 %v3548_v46, %v1755_v17 }
 0x1a3   : > { %v1757_v35 = vadd.f32 %v1725_v16, %v1656_v41 }
 0x1a4   : > { %v1795_v58 = vadd.f32 %v3548_v46, %v1756_v37  ;;  %v2361_v11 = vpack.c.bf16 %v1794_v1, %v1793_v39  ;;  %v1985_v24 = vadd.f32 %v1984_v25, %v1794_v1 }
 0x1a5   : > { %v1796_v28 = vadd.f32 %v3548_v46, %v1757_v35 }
 0x1a6   : > { %2381 = vst [vmem:[%s2941_s14 + $0x70] sm:$0xff] %v2361_v11   ;;  %v1971_v54 = vadd.f32 %v1970_v45, %v1795_v58 }
 0x1a7   : > { %v2366_v26 = vpack.c.bf16 %v1796_v28, %v1795_v58  ;;  %v1986_v51 = vadd.f32 %v1985_v24, %v1796_v28 }
 0x1a9   : > { %2382 = vst [vmem:[%s2941_s14 + $0x78] sm:$0xff] %v2366_v26   ;;  %v1987_v49 = vadd.f32 %v1986_v51, %v1971_v54 }
 0x1ab   : > { %v1988_v53 = vrot.slane %v1987_v49, 4 }
 0x1ad   : > { %v1989_v19 = vadd.f32 %v1988_v53, %v1987_v49 }
 0x1af   : > { %v1990_v3 = vrot.slane %v1989_v19, 2 }
 0x1b1   : > { %v1991_v42 = vadd.f32 %v1990_v3, %v1989_v19 }
 0x1b3   : > { %v1992_v36 = vrot.slane %v1991_v42, 1 }
 0x1b5   : > { %v1993_v38 = vadd.f32 %v1992_v36, %v1991_v42 }
 0x1b7   : > { %1994 = vst [vmem:[%s350_s19] sm:$0x1] %v1993_v38 }
 0x1b8 PF: > { %s17_s23 = sadd.s32 1, %s2518_s23   ;;  %s3819_s21 = smov %s2514_s22 }
 0x1b9   : > { %p14_p5 = scmp.ge.s32.totalorder %s17_s23, 4   ;;  %s3820_s22 = smov %s3822_s24 }
 0x1bb   :  { %16 = sbr.rel (!%p14_p5) target bundleno = 2 (0x2), region = 96 }

</bundles_post_ra>
